<compile_context>
chip_gen: v6e
topology: v6e:2x2x1
jax: 0.10.0
libtpu: 0.0.40
codegen_flags: <defaults>
</compile_context>

<pallas_src>
import jax
import jax.numpy as jnp
from jax.experimental import pallas as pl
from jax.experimental.pallas import tpu as pltpu

NUM_CLASSES = 64
HIDDEN = 64
OUT = 4

# Tile size over the flattened token axis.  2048 is safe on all generations;
# on v6e (128 MiB VMEM) 4096-8192 would amortize per-step overhead further,
# on v7x (64 MiB VMEM) keep it <= ~4096.
TILE_N = 2048


def _table_lookup_kernel(idx_ref, tbl_ref, out_ref):
    # idx_ref: (TILE_N, 1) int32 token ids
    # tbl_ref: (64, 4)  f32 collapsed-MLP table (VMEM-resident across steps)
    # out_ref: (TILE_N, 4) f32 logits
    n = idx_ref.shape[0]
    # one_hot(idx, 64) built with iota + compare (no gather needed; padded or
    # out-of-range ids simply produce an all-zero row -> bias-only output
    # which is sliced off by the wrapper anyway).
    cls = jax.lax.broadcasted_iota(jnp.int32, (n, NUM_CLASSES), 1)
    one_hot = (cls == idx_ref[...]).astype(jnp.float32)
    # Single tiny MXU matmul: (TILE_N, 64) @ (64, 4) -> exact row selection.
    out_ref[...] = jnp.dot(one_hot, tbl_ref[...],
                           preferred_element_type=jnp.float32)


def my_torch_model_forward(inputs, w1, b1, w2, b2, *, tile_n=TILE_N):
    """inputs: int array of arbitrary shape with values in [0, 64).
    w1: (64, 64), b1: (64,), w2: (4, 64), b2: (4,)  (PyTorch Linear layout).
    Returns float32 array of shape inputs.shape + (4,)."""
    lead_shape = inputs.shape
    idx = inputs.reshape(-1).astype(jnp.int32)
    n = idx.shape[0]

    # Collapse the whole model into a (64, 4) table:
    #   out[n] = relu(W1^T[idx[n]] + b1) @ W2^T + b2 = T[idx[n]]
    w1t = jnp.asarray(w1, jnp.float32).T                      # (64, 64)
    b1r = jnp.asarray(b1, jnp.float32)                        # (64,)
    w2t = jnp.asarray(w2, jnp.float32).T                      # (64, 4)
    b2r = jnp.asarray(b2, jnp.float32)                        # (4,)
    hidden_tbl = jnp.maximum(w1t + b1r[None, :], 0.0)         # (64, 64)
    table = jnp.dot(hidden_tbl, w2t,
                    precision=jax.lax.Precision.HIGHEST) + b2r[None, :]  # (64, 4)

    # NOTE: for very small N a plain `table[idx]` gather would beat any kernel
    # launch; we always take the Pallas path here so the kernel is exercised.

    # Pad N up to a multiple of tile_n.
    num_tiles = pl.cdiv(n, tile_n)
    n_pad = num_tiles * tile_n
    idx_col = jnp.pad(idx, (0, n_pad - n)).reshape(n_pad, 1)

    out = pl.pallas_call(
        _table_lookup_kernel,
        out_shape=jax.ShapeDtypeStruct((n_pad, OUT), jnp.float32),
        grid=(num_tiles,),
        in_specs=[
            pl.BlockSpec((tile_n, 1), lambda i: (i, 0)),         # idx tile
            pl.BlockSpec((NUM_CLASSES, OUT), lambda i: (0, 0)),  # table (resident)
        ],
        out_specs=pl.BlockSpec((tile_n, OUT), lambda i: (i, 0)),
        compiler_params=pltpu.CompilerParams(
            dimension_semantics=("parallel",),   # shard steps across TCs on v7x
        ),
    )(idx_col, table)

    return out[:n].reshape(*lead_shape, OUT)


if __name__ == "__main__":
    key = jax.random.PRNGKey(0)
    k_idx, k_idx2, k_w1, k_b1, k_w2, k_b2 = jax.random.split(key, 6)

    # Deterministic parameter init mimicking torch.nn.Linear default
    # (uniform in [-1/sqrt(fan_in), 1/sqrt(fan_in)]).
    bound = 1.0 / (HIDDEN ** 0.5)
    w1 = jax.random.uniform(k_w1, (HIDDEN, HIDDEN), jnp.float32, -bound, bound)
    b1 = jax.random.uniform(k_b1, (HIDDEN,), jnp.float32, -bound, bound)
    w2 = jax.random.uniform(k_w2, (OUT, HIDDEN), jnp.float32, -bound, bound)
    b2 = jax.random.uniform(k_b2, (OUT,), jnp.float32, -bound, bound)

    def _reference(inputs):
        oh = jax.nn.one_hot(inputs, NUM_CLASSES, dtype=jnp.float32)
        h = jnp.maximum(
            jnp.dot(oh, w1.T, precision=jax.lax.Precision.HIGHEST) + b1, 0.0)
        return jnp.dot(h, w2.T, precision=jax.lax.Precision.HIGHEST) + b2

    # Small case: batch=8, seq=8 integer tokens (single padded grid step).
    inputs_small = jax.random.randint(k_idx, (8, 8), 0, NUM_CLASSES,
                                      dtype=jnp.int32)
    out_small = jax.block_until_ready(
        my_torch_model_forward(inputs_small, w1, b1, w2, b2))
    assert out_small.shape == (8, 8, OUT), out_small.shape
    assert jnp.allclose(out_small, _reference(inputs_small),
                        atol=1e-5, rtol=1e-5), "small-case mismatch vs reference"

    # Larger case exercising multiple grid steps and the N-padding path.
    inputs_big = jax.random.randint(k_idx2, (4, 3000), 0, NUM_CLASSES,
                                    dtype=jnp.int32)
    out_big = jax.block_until_ready(
        my_torch_model_forward(inputs_big, w1, b1, w2, b2))
    assert out_big.shape == (4, 3000, OUT), out_big.shape
    assert jnp.allclose(out_big, _reference(inputs_big),
                        atol=1e-5, rtol=1e-5), "big-case mismatch vs reference"

    print("KERNEL_OK")
</pallas_src>

<mosaic_0001>
module attributes {stable_mosaic.version = 11 : i64} {
  func.func @_table_lookup_kernel(%arg0: i32, %arg1: memref<2048x1xi32, #tpu.memory_space<vmem>>, %arg2: memref<64x4xf32, #tpu.memory_space<vmem>>, %arg3: memref<2048x4xf32, #tpu.memory_space<vmem>>) attributes {dimension_semantics = [#tpu.dimension_semantics<parallel>], iteration_bounds = array<i64: 1>, scalar_prefetch = 0 : i64, scratch_operands = 0 : i64, tpu.core_type = #tpu.core_type<tc>, window_params = [{transform_indices = @transform_0, window_bounds = array<i64: 2048, 1>}, {pipeline_mode = #tpu.pipeline_mode<synchronous>, transform_indices = @transform_1, window_bounds = array<i64: 64, 4>}, {transform_indices = @transform_2, window_bounds = array<i64: 2048, 4>}]} {
    %0 = tpu.iota {dimensions = array<i32: 1>} : vector<2048x64xi32>
    %c0 = arith.constant 0 : index
    %c0_0 = arith.constant 0 : index
    %1 = vector.load %arg1[%c0, %c0_0] : memref<2048x1xi32, #tpu.memory_space<vmem>>, vector<2048x1xi32>
    %2 = vector.broadcast %1 : vector<2048x1xi32> to vector<2048x64xi32>
    %3 = arith.cmpi eq, %0, %2 : vector<2048x64xi32>
    %4 = arith.extui %3 : vector<2048x64xi1> to vector<2048x64xi32>
    %5 = arith.sitofp %4 : vector<2048x64xi32> to vector<2048x64xf32>
    %c0_1 = arith.constant 0 : index
    %c0_2 = arith.constant 0 : index
    %6 = vector.load %arg2[%c0_1, %c0_2] : memref<64x4xf32, #tpu.memory_space<vmem>>, vector<64x4xf32>
    %cst = arith.constant dense<0.000000e+00> : vector<2048x4xf32>
    %7 = tpu.matmul %5, %6, %cst {dimension_numbers = #tpu.dot_dimension_numbers<[1], [0], [0], [1], [0, 0, 1, 1], [], []>} : vector<2048x64xf32>, vector<64x4xf32>, vector<2048x4xf32> -> vector<2048x4xf32>
    %c0_3 = arith.constant 0 : index
    %c0_4 = arith.constant 0 : index
    %8 = vector.load %arg3[%c0_3, %c0_4] : memref<2048x4xf32, #tpu.memory_space<vmem>>, vector<2048x4xf32>
    tpu.vector_store %arg3[%c0_3, %c0_4], %7 {strides = array<i32>} : memref<2048x4xf32, #tpu.memory_space<vmem>>, vector<2048x4xf32>,
    return
  }
  func.func @transform_0(%arg0: i32) -> (i32, i32) {
    %c0_i32 = arith.constant 0 : i32
    %c0_i32_0 = arith.constant 0 : i32
    return %arg0, %c0_i32 : i32, i32
  }
  func.func @transform_1(%arg0: i32) -> (i32, i32) {
    %c0_i32 = arith.constant 0 : i32
    %c0_i32_0 = arith.constant 0 : i32
    %c0_i32_1 = arith.constant 0 : i32
    return %c0_i32, %c0_i32_0 : i32, i32
  }
  func.func @transform_2(%arg0: i32) -> (i32, i32) {
    %c0_i32 = arith.constant 0 : i32
    %c0_i32_0 = arith.constant 0 : i32
    return %arg0, %c0_i32 : i32, i32
  }
}

</mosaic_0001>

<bundles_post_ra>
// kernel: tpu_custom_call.1
= control target key start
LH: loop header
LB: loop body
LE: loop exit
PB: predicated region body
PF: predicated region fallthrough
CT: control target
= control target key end

     0   :  { %v5384_v0 = vmov 0   ;;  %vm1813_vm0 = vcmask 523264   ;;  %s7987_s0 = inlined_call_operand.vmem [shape: s32[2048,1], index: 0, kind: input, shape index: {}]   ;;  %s7988_s1 = inlined_call_operand.vmem [shape: f32[64,4], index: 1, kind: input, shape index: {}]   ;;  %s7989_s2 = inlined_call_operand.vmem [shape: f32[2048,4], index: 2, kind: output, shape index: {}]  }
   0x1   :  { %5383 = vset.pattern.permute.xlu1 %v5384_v0  ;;  %5382 = vset.pattern.permute.xlu0 %v5384_v0  ;;  %v15_v1 = vld [vmem:[%s7987_s0 + $0x10] sm:$0xff]  ;;  %v13_v2 = vld [vmem:[%s7987_s0] sm:$0xff]  ;;  %v16_v3 = vld [vmem:[%s7987_s0 + $0x18] sm:$0xff] }
   0x2   :  { %276 = vperm.xlu1 %5383, %v15_v1   ;;  %270 = vperm.xlu0 %5382, %v13_v2   ;;  %v14_v4 = vld [vmem:[%s7987_s0 + $0x8] sm:$0xff]  ;;  %v17_v6 = vld [vmem:[%s7987_s0 + $0x20] sm:$0xff]  ;;  %v20_v7 = vld [vmem:[%s7987_s0 + $0x38] sm:$0xff] }
   0x3   :  { %v18_v5 = vld [vmem:[%s7987_s0 + $0x28] sm:$0xff]  ;;  %v19_v8 = vld [vmem:[%s7987_s0 + $0x30] sm:$0xff]  ;;  %v21_v10 = vld [vmem:[%s7987_s0 + $0x40] sm:$0xff] }
   0x4   :  { %v22_v9 = vld [vmem:[%s7987_s0 + $0x48] sm:$0xff]  ;;  %v24_v11 = vld [vmem:[%s7987_s0 + $0x58] sm:$0xff]  ;;  %v23_v12 = vld [vmem:[%s7987_s0 + $0x50] sm:$0xff] }
   0x5   :  { %v1812_v13 = vld [vmem:[%s7988_s1 + $0x38] sm:$0xff]  ;;  %v1811_v14 = vld [vmem:[%s7988_s1 + $0x30] sm:$0xff]  ;;  %v26_v15 = vld [vmem:[%s7987_s0 + $0x68] sm:$0xff] }
   0x6   :  { %279 = vperm.xlu1 %5383, %v16_v3   ;;  %273 = vperm.xlu0 %5382, %v14_v4   ;;  %v25_v16 = vld [vmem:[%s7987_s0 + $0x60] sm:$0xff]  ;;  %v1810_v17 = vld [vmem:[%s7988_s1 + $0x28] sm:$0xff]  ;;  %v28_v19 = vld [vmem:[%s7987_s0 + $0x78] sm:$0xff] }
   0x7   :  { %4964 = vmatprep.subr.mxu0 %v1812_v13  ;;  %5364 = vmatprep.subr.mxu1 %v1812_v13  ;;  %v1809_v18 = vld [vmem:[%s7988_s1 + $0x20] sm:$0xff]  ;;  %v27_v20 = vld [vmem:[%s7987_s0 + $0x70] sm:$0xff]  ;;  %v1808_v21 = vld [vmem:[%s7988_s1 + $0x18] sm:$0xff] }
   0x8   :  { %4965 = vmatpush3.msra.mxu0 %v1812_v13  ;;  %5372 = vmatpush3.msra.mxu1 %v1812_v13  ;;  %v30_v22 = vld [vmem:[%s7987_s0 + $0x88] sm:$0xff]  ;;  %v29_v23 = vld [vmem:[%s7987_s0 + $0x80] sm:$0xff]  ;;  %v1807_v24 = vld [vmem:[%s7988_s1 + $0x10] sm:$0xff]  ;;  %v5385_v13 = vmov 0.0  }
   0x9   :  { %4966 = vmatprep.subr.mxu0 %v1811_v14  ;;  %5365 = vmatprep.subr.mxu1 %v1811_v14  ;;  %v1806_v25 = vld [vmem:[%s7988_s1 + $0x8] sm:$0xff]  ;;  %v32_v26 = vld [vmem:[%s7987_s0 + $0x98] sm:$0xff]  ;;  %v31_v27 = vld [vmem:[%s7987_s0 + $0x90] sm:$0xff] }
   0xa   :  { %285 = vperm.xlu1 %5383, %v18_v5   ;;  %282 = vperm.xlu0 %5382, %v17_v6   ;;  %v1805_v28 = vld [vmem:[%s7988_s1] sm:$0xff]  ;;  %v34_v29 = vld [vmem:[%s7987_s0 + $0xa8] sm:$0xff]  ;;  %v36_v31 = vld [vmem:[%s7987_s0 + $0xb8] sm:$0xff]  ;;  %v11_v5 = vlaneseq }
   0xb   :  { %4967 = vmatpush3.msra.mxu0 %v1811_v14  ;;  %5373 = vmatpush3.msra.mxu1 %v1811_v14  ;;  %v33_v30 = vld [vmem:[%s7987_s0 + $0xa0] sm:$0xff]  ;;  %v35_v32 = vld [vmem:[%s7987_s0 + $0xb0] sm:$0xff]  ;;  %v38_v33 = vld [vmem:[%s7987_s0 + $0xc8] sm:$0xff] }
   0xc   :  { %4968 = vmatprep.subr.mxu0 %v1810_v17  ;;  %5366 = vmatprep.subr.mxu1 %v1810_v17  ;;  %v37_v34 = vld [vmem:[%s7987_s0 + $0xc0] sm:$0xff]  ;;  %v40_v35 = vld [vmem:[%s7987_s0 + $0xd8] sm:$0xff]  ;;  %v39_v36 = vld [vmem:[%s7987_s0 + $0xd0] sm:$0xff] }
   0xd   :  { %4969 = vmatpush3.msra.mxu0 %v1810_v17  ;;  %5374 = vmatpush3.msra.mxu1 %v1810_v17  ;;  %v42_v37 = vld [vmem:[%s7987_s0 + $0xe8] sm:$0xff]  ;;  %v41_v38 = vld [vmem:[%s7987_s0 + $0xe0] sm:$0xff]  ;;  %v44_v39 = vld [vmem:[%s7987_s0 + $0xf8] sm:$0xff] }
   0xe   :  { %291 = vperm.xlu1 %5383, %v20_v7   ;;  %288 = vperm.xlu0 %5382, %v19_v8   ;;  %v43_v40 = vld [vmem:[%s7987_s0 + $0xf0] sm:$0xff]  ;;  %v46_v41 = vld [vmem:[%s7987_s0 + $0x108] sm:$0xff]  ;;  %v45_v42 = vld [vmem:[%s7987_s0 + $0x100] sm:$0xff]  ;;  %v5611_v8 = vand.u32 127, %v11_v5 }
   0xf   :  { %4970 = vmatprep.subr.mxu0 %v1809_v18  ;;  %5367 = vmatprep.subr.mxu1 %v1809_v18  ;;  %v48_v43 = vld [vmem:[%s7987_s0 + $0x118] sm:$0xff]  ;;  %v47_v44 = vld [vmem:[%s7987_s0 + $0x110] sm:$0xff]  ;;  %v50_v45 = vld [vmem:[%s7987_s0 + $0x128] sm:$0xff] }
  0x10   :  { %4971 = vmatpush3.msra.mxu0 %v1809_v18  ;;  %5375 = vmatpush3.msra.mxu1 %v1809_v18  ;;  %v49_v46 = vld [vmem:[%s7987_s0 + $0x120] sm:$0xff]  ;;  %v52_v47 = vld [vmem:[%s7987_s0 + $0x138] sm:$0xff]  ;;  %v51_v48 = vld [vmem:[%s7987_s0 + $0x130] sm:$0xff] }
  0x11   :  { %4972 = vmatprep.subr.mxu0 %v1808_v21  ;;  %5368 = vmatprep.subr.mxu1 %v1808_v21  ;;  %v54_v49 = vld [vmem:[%s7987_s0 + $0x148] sm:$0xff]  ;;  %v53_v50 = vld [vmem:[%s7987_s0 + $0x140] sm:$0xff]  ;;  %v56_v51 = vld [vmem:[%s7987_s0 + $0x158] sm:$0xff] }
  0x12   :  { %297 = vperm.xlu1 %5383, %v22_v9   ;;  %294 = vperm.xlu0 %5382, %v21_v10   ;;  %v55_v52 = vld [vmem:[%s7987_s0 + $0x150] sm:$0xff]  ;;  %v58_v53 = vld [vmem:[%s7987_s0 + $0x168] sm:$0xff]  ;;  %v57_v54 = vld [vmem:[%s7987_s0 + $0x160] sm:$0xff] }
  0x13   :  { %4973 = vmatpush3.msra.mxu0 %v1808_v21  ;;  %5376 = vmatpush3.msra.mxu1 %v1808_v21  ;;  %v60_v55 = vld [vmem:[%s7987_s0 + $0x178] sm:$0xff]  ;;  %v59_v56 = vld [vmem:[%s7987_s0 + $0x170] sm:$0xff]  ;;  %v62_v57 = vld [vmem:[%s7987_s0 + $0x188] sm:$0xff] }
  0x14   :  { %4974 = vmatprep.subr.mxu0 %v1807_v24  ;;  %5369 = vmatprep.subr.mxu1 %v1807_v24  ;;  %v61_v58 = vld [vmem:[%s7987_s0 + $0x180] sm:$0xff]  ;;  %v64_v59 = vld [vmem:[%s7987_s0 + $0x198] sm:$0xff]  ;;  %v63_v60 = vld [vmem:[%s7987_s0 + $0x190] sm:$0xff] }
  0x15   :  { %4975 = vmatpush3.msra.mxu0 %v1807_v24  ;;  %5377 = vmatpush3.msra.mxu1 %v1807_v24  ;;  %v66_v61 = vld [vmem:[%s7987_s0 + $0x1a8] sm:$0xff]  ;;  %v65_v62 = vld [vmem:[%s7987_s0 + $0x1a0] sm:$0xff]  ;;  %v68_v63 = vld [vmem:[%s7987_s0 + $0x1b8] sm:$0xff] }
  0x16   :  { %303 = vperm.xlu1 %5383, %v24_v11   ;;  %300 = vperm.xlu0 %5382, %v23_v12   ;;  %v67_v0 = vld [vmem:[%s7987_s0 + $0x1b0] sm:$0xff]  ;;  %v70_v1 = vld [vmem:[%s7987_s0 + $0x1c8] sm:$0xff]  ;;  %v69_v2 = vld [vmem:[%s7987_s0 + $0x1c0] sm:$0xff] }
  0x17   :  { %4976 = vmatprep.subr.mxu0 %v1806_v25  ;;  %5370 = vmatprep.subr.mxu1 %v1806_v25  ;;  %v72_v3 = vld [vmem:[%s7987_s0 + $0x1d8] sm:$0xff]  ;;  %v71_v4 = vld [vmem:[%s7987_s0 + $0x1d0] sm:$0xff]  ;;  %v74_v6 = vld [vmem:[%s7987_s0 + $0x1e8] sm:$0xff] }
  0x18   :  { %4977 = vmatpush3.msra.mxu0 %v1806_v25  ;;  %5378 = vmatpush3.msra.mxu1 %v1806_v25  ;;  %v73_v7 = vld [vmem:[%s7987_s0 + $0x1e0] sm:$0xff]  ;;  %v76_v9 = vld [vmem:[%s7987_s0 + $0x1f8] sm:$0xff]  ;;  %v75_v10 = vld [vmem:[%s7987_s0 + $0x1f0] sm:$0xff] }
  0x19   :  { %4978 = vmatprep.subr.mxu0 %v1805_v28  ;;  %5371 = vmatprep.subr.mxu1 %v1805_v28  ;;  %v79_v21 = vld [vmem:[%s7987_s0 + $0x210] sm:$0xff]  ;;  %v96_v5 = vld [vmem:[%s7987_s0 + $0x298] sm:$0xff] }
  0x1a   :  { %309 = vperm.xlu1 %5383, %v26_v15   ;;  %306 = vperm.xlu0 %5382, %v25_v16   ;;  %v78_v15 = vld [vmem:[%s7987_s0 + $0x208] sm:$0xff]  ;;  %v77_v16 = vld [vmem:[%s7987_s0 + $0x200] sm:$0xff] }
  0x1b   :  { %4979 = vmatpush3.msra.mxu0 %v1805_v28  ;;  %5379 = vmatpush3.msra.mxu1 %v1805_v28  ;;  %v81_v28 = vld [vmem:[%s7987_s0 + $0x220] sm:$0xff] }
  0x1e   :  { %315 = vperm.xlu1 %5383, %v28_v19   ;;  %312 = vperm.xlu0 %5382, %v27_v20   ;;  %v80_v20 = vld [vmem:[%s7987_s0 + $0x218] sm:$0xff] }
  0x22   :  { %321 = vperm.xlu1 %5383, %v30_v22   ;;  %318 = vperm.xlu0 %5382, %v29_v23  }
  0x26   :  { %327 = vperm.xlu1 %5383, %v32_v26   ;;  %324 = vperm.xlu0 %5382, %v31_v27   ;;  %v82_v27 = vld [vmem:[%s7987_s0 + $0x228] sm:$0xff] }
  0x2a   :  { %333 = vperm.xlu1 %5383, %v34_v29   ;;  %330 = vperm.xlu0 %5382, %v33_v30  }
  0x2e   :  { %339 = vperm.xlu1 %5383, %v36_v31   ;;  %336 = vperm.xlu0 %5382, %v35_v32  }
  0x32   :  { %345 = vperm.xlu1 %5383, %v38_v33   ;;  %342 = vperm.xlu0 %5382, %v37_v34   ;;  %v84_v33 = vld [vmem:[%s7987_s0 + $0x238] sm:$0xff]  ;;  %v83_v34 = vld [vmem:[%s7987_s0 + $0x230] sm:$0xff] }
  0x36   :  { %351 = vperm.xlu1 %5383, %v40_v35   ;;  %348 = vperm.xlu0 %5382, %v39_v36  }
  0x3a   :  { %357 = vperm.xlu1 %5383, %v42_v37   ;;  %354 = vperm.xlu0 %5382, %v41_v38  }
  0x3e   :  { %363 = vperm.xlu1 %5383, %v44_v39   ;;  %360 = vperm.xlu0 %5382, %v43_v40   ;;  %v86_v39 = vld [vmem:[%s7987_s0 + $0x248] sm:$0xff]  ;;  %v85_v40 = vld [vmem:[%s7987_s0 + $0x240] sm:$0xff] }
  0x42   :  { %369 = vperm.xlu1 %5383, %v46_v41   ;;  %366 = vperm.xlu0 %5382, %v45_v42  }
  0x46   :  { %375 = vperm.xlu1 %5383, %v48_v43   ;;  %372 = vperm.xlu0 %5382, %v47_v44  }
  0x4a   :  { %381 = vperm.xlu1 %5383, %v50_v45   ;;  %378 = vperm.xlu0 %5382, %v49_v46   ;;  %v88_v45 = vld [vmem:[%s7987_s0 + $0x258] sm:$0xff]  ;;  %v87_v46 = vld [vmem:[%s7987_s0 + $0x250] sm:$0xff] }
  0x4e   :  { %387 = vperm.xlu1 %5383, %v52_v47   ;;  %384 = vperm.xlu0 %5382, %v51_v48  }
  0x52   :  { %393 = vperm.xlu1 %5383, %v54_v49   ;;  %390 = vperm.xlu0 %5382, %v53_v50  }
  0x56   :  { %399 = vperm.xlu1 %5383, %v56_v51   ;;  %396 = vperm.xlu0 %5382, %v55_v52   ;;  %v90_v51 = vld [vmem:[%s7987_s0 + $0x268] sm:$0xff]  ;;  %v89_v52 = vld [vmem:[%s7987_s0 + $0x260] sm:$0xff] }
  0x5a   :  { %405 = vperm.xlu1 %5383, %v58_v53   ;;  %402 = vperm.xlu0 %5382, %v57_v54  }
  0x5e   :  { %411 = vperm.xlu1 %5383, %v60_v55   ;;  %408 = vperm.xlu0 %5382, %v59_v56  }
  0x62   :  { %417 = vperm.xlu1 %5383, %v62_v57   ;;  %414 = vperm.xlu0 %5382, %v61_v58   ;;  %v92_v57 = vld [vmem:[%s7987_s0 + $0x278] sm:$0xff]  ;;  %v91_v58 = vld [vmem:[%s7987_s0 + $0x270] sm:$0xff] }
  0x66   :  { %423 = vperm.xlu1 %5383, %v64_v59   ;;  %420 = vperm.xlu0 %5382, %v63_v60  }
  0x6a   :  { %429 = vperm.xlu1 %5383, %v66_v61   ;;  %426 = vperm.xlu0 %5382, %v65_v62  }
  0x6e   :  { %435 = vperm.xlu1 %5383, %v68_v63   ;;  %432 = vperm.xlu0 %5382, %v67_v0   ;;  %v94_v63 = vld [vmem:[%s7987_s0 + $0x288] sm:$0xff]  ;;  %v93_v0 = vld [vmem:[%s7987_s0 + $0x280] sm:$0xff] }
  0x72   :  { %441 = vperm.xlu1 %5383, %v70_v1   ;;  %438 = vperm.xlu0 %5382, %v69_v2  }
  0x76   :  { %447 = vperm.xlu1 %5383, %v72_v3   ;;  %444 = vperm.xlu0 %5382, %v71_v4  }
  0x7a   :  { %453 = vperm.xlu1 %5383, %v74_v6   ;;  %450 = vperm.xlu0 %5382, %v73_v7   ;;  %v95_v6 = vld [vmem:[%s7987_s0 + $0x290] sm:$0xff] }
  0x7d   :  { %v277_v11 = vpop.permute.xlu1 %276  ;;  %v271_v12 = vpop.permute.xlu0 %270 }
  0x7e   :  { %459 = vperm.xlu1 %5383, %v76_v9   ;;  %456 = vperm.xlu0 %5382, %v75_v10   ;;  %vm1037_vm1 = vcmp.eq.s32.totalorder %v5611_v8, %v271_v12  ;;  %vm1039_vm2 = vcmp.eq.s32.totalorder %v5611_v8, %v277_v11  ;;  %v98_v12 = vld [vmem:[%s7987_s0 + $0x2a8] sm:$0xff] }
  0x7f   :  { %v4188_v14 = vsel %vm1037_vm1, 1.0, %v5385_v13  ;;  %v4190_v22 = vsel %vm1039_vm2, 1.0, %v5385_v13 }
  0x80   :  { %4980 = vmatprep.mubr.msk.f32.mxu0 %vm1813_vm0, %v4188_v14  ;;  %v97_v14 = vld [vmem:[%s7987_s0 + $0x2a0] sm:$0xff] }
  0x81   :  { %v280_v17 = vpop.permute.xlu1 %279  ;;  %v274_v18 = vpop.permute.xlu0 %273 }
  0x82   :  { %vm1038_vm3 = vcmp.eq.s32.totalorder %v5611_v8, %v274_v18  ;;  %465 = vperm.xlu1 %5383, %v78_v15   ;;  %462 = vperm.xlu0 %5382, %v77_v16   ;;  %vm1040_vm4 = vcmp.eq.s32.totalorder %v5611_v8, %v280_v17 }
  0x83   :  { %v4189_v19 = vsel %vm1038_vm3, 1.0, %v5385_v13  ;;  %v4191_v25 = vsel %vm1040_vm4, 1.0, %v5385_v13 }
  0x84   :  { %4981 = vmatmul.mubr.msk.f32.vlgmr.msra.gmra.mxu0 %vm1813_vm0, %v4189_v19  ;;  %v100_v19 = vld [vmem:[%s7987_s0 + $0x2b8] sm:$0xff] }
  0x85   :  { %v286_v23 = vpop.permute.xlu1 %285  ;;  %4983 = vmatprep.mubr.msk.f32.mxu0 %vm1813_vm0, %v4190_v22  ;;  %v283_v24 = vpop.permute.xlu0 %282 }
  0x86   :  { %vm1041_vm5 = vcmp.eq.s32.totalorder %v5611_v8, %v283_v24  ;;  %471 = vperm.xlu1 %5383, %v80_v20   ;;  %468 = vperm.xlu0 %5382, %v79_v21   ;;  %vm1042_vm6 = vcmp.eq.s32.totalorder %v5611_v8, %v286_v23  ;;  %v99_v20 = vld [vmem:[%s7987_s0 + $0x2b0] sm:$0xff] }
  0x87   :  { %v4192_v26 = vsel %vm1041_vm5, 1.0, %v5385_v13  ;;  %v4193_v31 = vsel %vm1042_vm6, 1.0, %v5385_v13 }
  0x88   :  { %4984 = vmatmul.mubr.msk.f32.gmra.mxu0 %vm1813_vm0, %v4191_v25  ;;  %v102_v25 = vld [vmem:[%s7987_s0 + $0x2c8] sm:$0xff] }
  0x89   :  { %v292_v29 = vpop.permute.xlu1 %291  ;;  %4986 = vmatprep.mubr.msk.f32.mxu0 %vm1813_vm0, %v4192_v26  ;;  %v289_v30 = vpop.permute.xlu0 %288  ;;  %v101_v26 = vld [vmem:[%s7987_s0 + $0x2c0] sm:$0xff] }
  0x8a   :  { %vm1043_vm7 = vcmp.eq.s32.totalorder %v5611_v8, %v289_v30  ;;  %477 = vperm.xlu1 %5383, %v82_v27   ;;  %474 = vperm.xlu0 %5382, %v81_v28   ;;  %vm1044_vm8 = vcmp.eq.s32.totalorder %v5611_v8, %v292_v29 }
  0x8b   :  { %v4194_v32 = vsel %vm1043_vm7, 1.0, %v5385_v13  ;;  %v4195_v37 = vsel %vm1044_vm8, 1.0, %v5385_v13 }
  0x8c   :  { %4987 = vmatmul.mubr.msk.f32.gmra.mxu0 %vm1813_vm0, %v4193_v31  ;;  %v104_v31 = vld [vmem:[%s7987_s0 + $0x2d8] sm:$0xff] }
  0x8d   :  { %v298_v35 = vpop.permute.xlu1 %297  ;;  %4989 = vmatprep.mubr.msk.f32.mxu0 %vm1813_vm0, %v4194_v32  ;;  %v295_v36 = vpop.permute.xlu0 %294  ;;  %v103_v32 = vld [vmem:[%s7987_s0 + $0x2d0] sm:$0xff] }
  0x8e   :  { %vm1045_vm9 = vcmp.eq.s32.totalorder %v5611_v8, %v295_v36  ;;  %483 = vperm.xlu1 %5383, %v84_v33   ;;  %480 = vperm.xlu0 %5382, %v83_v34   ;;  %vm1046_vm10 = vcmp.eq.s32.totalorder %v5611_v8, %v298_v35 }
  0x8f   :  { %v4196_v38 = vsel %vm1045_vm9, 1.0, %v5385_v13  ;;  %v4197_v43 = vsel %vm1046_vm10, 1.0, %v5385_v13 }
  0x90   :  { %4990 = vmatmul.mubr.msk.f32.gmra.mxu0 %vm1813_vm0, %v4195_v37  ;;  %v106_v37 = vld [vmem:[%s7987_s0 + $0x2e8] sm:$0xff] }
  0x91   :  { %v304_v41 = vpop.permute.xlu1 %303  ;;  %4992 = vmatprep.mubr.msk.f32.mxu0 %vm1813_vm0, %v4196_v38  ;;  %v301_v42 = vpop.permute.xlu0 %300  ;;  %v105_v38 = vld [vmem:[%s7987_s0 + $0x2e0] sm:$0xff] }
  0x92   :  { %vm1047_vm11 = vcmp.eq.s32.totalorder %v5611_v8, %v301_v42  ;;  %489 = vperm.xlu1 %5383, %v86_v39   ;;  %486 = vperm.xlu0 %5382, %v85_v40   ;;  %vm1048_vm12 = vcmp.eq.s32.totalorder %v5611_v8, %v304_v41 }
  0x93   :  { %v4198_v44 = vsel %vm1047_vm11, 1.0, %v5385_v13  ;;  %v4199_v49 = vsel %vm1048_vm12, 1.0, %v5385_v13 }
  0x94   :  { %4993 = vmatmul.mubr.msk.f32.gmra.mxu0 %vm1813_vm0, %v4197_v43  ;;  %v108_v43 = vld [vmem:[%s7987_s0 + $0x2f8] sm:$0xff] }
  0x95   :  { %v310_v47 = vpop.permute.xlu1 %309  ;;  %4995 = vmatprep.mubr.msk.f32.mxu0 %vm1813_vm0, %v4198_v44  ;;  %v307_v48 = vpop.permute.xlu0 %306  ;;  %v107_v44 = vld [vmem:[%s7987_s0 + $0x2f0] sm:$0xff] }
  0x96   :  { %vm1049_vm13 = vcmp.eq.s32.totalorder %v5611_v8, %v307_v48  ;;  %495 = vperm.xlu1 %5383, %v88_v45   ;;  %492 = vperm.xlu0 %5382, %v87_v46   ;;  %vm1050_vm14 = vcmp.eq.s32.totalorder %v5611_v8, %v310_v47 }
  0x97   :  { %v4200_v50 = vsel %vm1049_vm13, 1.0, %v5385_v13  ;;  %v4201_v55 = vsel %vm1050_vm14, 1.0, %v5385_v13 }
  0x98   :  { %4996 = vmatmul.mubr.msk.f32.gmra.mxu0 %vm1813_vm0, %v4199_v49  ;;  %v110_v49 = vld [vmem:[%s7987_s0 + $0x308] sm:$0xff] }
  0x99   :  { %v316_v53 = vpop.permute.xlu1 %315  ;;  %4998 = vmatprep.mubr.msk.f32.mxu0 %vm1813_vm0, %v4200_v50  ;;  %v313_v54 = vpop.permute.xlu0 %312  ;;  %v109_v50 = vld [vmem:[%s7987_s0 + $0x300] sm:$0xff] }
  0x9a   :  { %vm1051_vm15 = vcmp.eq.s32.totalorder %v5611_v8, %v313_v54  ;;  %501 = vperm.xlu1 %5383, %v90_v51   ;;  %498 = vperm.xlu0 %5382, %v89_v52   ;;  %vm1052_vm1 = vcmp.eq.s32.totalorder %v5611_v8, %v316_v53 }
  0x9b   :  { %v4202_v56 = vsel %vm1051_vm15, 1.0, %v5385_v13  ;;  %v4203_v61 = vsel %vm1052_vm1, 1.0, %v5385_v13 }
  0x9c   :  { %4999 = vmatmul.mubr.msk.f32.gmra.mxu0 %vm1813_vm0, %v4201_v55  ;;  %v112_v55 = vld [vmem:[%s7987_s0 + $0x318] sm:$0xff] }
  0x9d   :  { %v322_v59 = vpop.permute.xlu1 %321  ;;  %5001 = vmatprep.mubr.msk.f32.mxu0 %vm1813_vm0, %v4202_v56  ;;  %v319_v60 = vpop.permute.xlu0 %318  ;;  %v111_v56 = vld [vmem:[%s7987_s0 + $0x310] sm:$0xff] }
  0x9e   :  { %vm1053_vm2 = vcmp.eq.s32.totalorder %v5611_v8, %v319_v60  ;;  %507 = vperm.xlu1 %5383, %v92_v57   ;;  %504 = vperm.xlu0 %5382, %v91_v58   ;;  %vm1054_vm3 = vcmp.eq.s32.totalorder %v5611_v8, %v322_v59 }
  0x9f   :  { %v4204_v62 = vsel %vm1053_vm2, 1.0, %v5385_v13  ;;  %v4205_v3 = vsel %vm1054_vm3, 1.0, %v5385_v13 }
  0xa0   :  { %5002 = vmatmul.mubr.msk.f32.gmra.mxu0 %vm1813_vm0, %v4203_v61  ;;  %v114_v61 = vld [vmem:[%s7987_s0 + $0x328] sm:$0xff] }
  0xa1   :  { %v328_v1 = vpop.permute.xlu1 %327  ;;  %5004 = vmatprep.mubr.msk.f32.mxu0 %vm1813_vm0, %v4204_v62  ;;  %v325_v2 = vpop.permute.xlu0 %324  ;;  %v113_v62 = vld [vmem:[%s7987_s0 + $0x320] sm:$0xff] }
  0xa2   :  { %vm1055_vm4 = vcmp.eq.s32.totalorder %v5611_v8, %v325_v2  ;;  %513 = vperm.xlu1 %5383, %v94_v63   ;;  %510 = vperm.xlu0 %5382, %v93_v0   ;;  %vm1056_vm5 = vcmp.eq.s32.totalorder %v5611_v8, %v328_v1 }
  0xa3   :  { %v4206_v4 = vsel %vm1055_vm4, 1.0, %v5385_v13  ;;  %v4207_v10 = vsel %vm1056_vm5, 1.0, %v5385_v13 }
  0xa4   :  { %5005 = vmatmul.mubr.msk.f32.gmra.mxu0 %vm1813_vm0, %v4205_v3  ;;  %v116_v3 = vld [vmem:[%s7987_s0 + $0x338] sm:$0xff] }
  0xa5   :  { %v334_v7 = vpop.permute.xlu1 %333  ;;  %5007 = vmatprep.mubr.msk.f32.mxu0 %vm1813_vm0, %v4206_v4  ;;  %v331_v9 = vpop.permute.xlu0 %330  ;;  %v115_v4 = vld [vmem:[%s7987_s0 + $0x330] sm:$0xff] }
  0xa6   :  { %vm1057_vm6 = vcmp.eq.s32.totalorder %v5611_v8, %v331_v9  ;;  %519 = vperm.xlu1 %5383, %v96_v5   ;;  %516 = vperm.xlu0 %5382, %v95_v6   ;;  %vm1058_vm7 = vcmp.eq.s32.totalorder %v5611_v8, %v334_v7 }
  0xa7   :  { %v4208_v11 = vsel %vm1057_vm6, 1.0, %v5385_v13  ;;  %v4209_v17 = vsel %vm1058_vm7, 1.0, %v5385_v13 }
  0xa8   :  { %5008 = vmatmul.mubr.msk.f32.gmra.mxu0 %vm1813_vm0, %v4207_v10  ;;  %v118_v10 = vld [vmem:[%s7987_s0 + $0x348] sm:$0xff] }
  0xa9   :  { %v340_v15 = vpop.permute.xlu1 %339  ;;  %5010 = vmatprep.mubr.msk.f32.mxu0 %vm1813_vm0, %v4208_v11  ;;  %v337_v16 = vpop.permute.xlu0 %336  ;;  %v117_v11 = vld [vmem:[%s7987_s0 + $0x340] sm:$0xff] }
  0xaa   :  { %vm1059_vm8 = vcmp.eq.s32.totalorder %v5611_v8, %v337_v16  ;;  %525 = vperm.xlu1 %5383, %v98_v12   ;;  %522 = vperm.xlu0 %5382, %v97_v14   ;;  %vm1060_vm9 = vcmp.eq.s32.totalorder %v5611_v8, %v340_v15 }
  0xab   :  { %v4210_v18 = vsel %vm1059_vm8, 1.0, %v5385_v13  ;;  %v4211_v23 = vsel %vm1060_vm9, 1.0, %v5385_v13 }
  0xac   :  { %5011 = vmatmul.mubr.msk.f32.gmra.mxu0 %vm1813_vm0, %v4209_v17  ;;  %v120_v17 = vld [vmem:[%s7987_s0 + $0x358] sm:$0xff] }
  0xad   :  { %v346_v21 = vpop.permute.xlu1 %345  ;;  %5013 = vmatprep.mubr.msk.f32.mxu0 %vm1813_vm0, %v4210_v18  ;;  %v343_v22 = vpop.permute.xlu0 %342  ;;  %v119_v18 = vld [vmem:[%s7987_s0 + $0x350] sm:$0xff] }
  0xae   :  { %vm1061_vm10 = vcmp.eq.s32.totalorder %v5611_v8, %v343_v22  ;;  %531 = vperm.xlu1 %5383, %v100_v19   ;;  %528 = vperm.xlu0 %5382, %v99_v20   ;;  %vm1062_vm11 = vcmp.eq.s32.totalorder %v5611_v8, %v346_v21 }
  0xaf   :  { %v4212_v24 = vsel %vm1061_vm10, 1.0, %v5385_v13  ;;  %v4213_v29 = vsel %vm1062_vm11, 1.0, %v5385_v13 }
  0xb0   :  { %5014 = vmatmul.mubr.msk.f32.gmra.mxu0 %vm1813_vm0, %v4211_v23  ;;  %v122_v23 = vld [vmem:[%s7987_s0 + $0x368] sm:$0xff] }
  0xb1   :  { %v352_v27 = vpop.permute.xlu1 %351  ;;  %5016 = vmatprep.mubr.msk.f32.mxu0 %vm1813_vm0, %v4212_v24  ;;  %v349_v28 = vpop.permute.xlu0 %348  ;;  %v121_v24 = vld [vmem:[%s7987_s0 + $0x360] sm:$0xff] }
  0xb2   :  { %vm1063_vm12 = vcmp.eq.s32.totalorder %v5611_v8, %v349_v28  ;;  %537 = vperm.xlu1 %5383, %v102_v25   ;;  %534 = vperm.xlu0 %5382, %v101_v26   ;;  %vm1064_vm13 = vcmp.eq.s32.totalorder %v5611_v8, %v352_v27 }
  0xb3   :  { %v4214_v30 = vsel %vm1063_vm12, 1.0, %v5385_v13  ;;  %v4215_v35 = vsel %vm1064_vm13, 1.0, %v5385_v13 }
  0xb4   :  { %5017 = vmatmul.mubr.msk.f32.gmra.mxu0 %vm1813_vm0, %v4213_v29  ;;  %v124_v29 = vld [vmem:[%s7987_s0 + $0x378] sm:$0xff] }
  0xb5   :  { %v358_v33 = vpop.permute.xlu1 %357  ;;  %5019 = vmatprep.mubr.msk.f32.mxu0 %vm1813_vm0, %v4214_v30  ;;  %v355_v34 = vpop.permute.xlu0 %354  ;;  %v123_v30 = vld [vmem:[%s7987_s0 + $0x370] sm:$0xff] }
  0xb6   :  { %vm1065_vm14 = vcmp.eq.s32.totalorder %v5611_v8, %v355_v34  ;;  %543 = vperm.xlu1 %5383, %v104_v31   ;;  %540 = vperm.xlu0 %5382, %v103_v32   ;;  %vm1066_vm15 = vcmp.eq.s32.totalorder %v5611_v8, %v358_v33 }
  0xb7   :  { %v4216_v36 = vsel %vm1065_vm14, 1.0, %v5385_v13  ;;  %v4217_v41 = vsel %vm1066_vm15, 1.0, %v5385_v13 }
  0xb8   :  { %5020 = vmatmul.mubr.msk.f32.gmra.mxu0 %vm1813_vm0, %v4215_v35  ;;  %v126_v35 = vld [vmem:[%s7987_s0 + $0x388] sm:$0xff] }
  0xb9   :  { %v364_v39 = vpop.permute.xlu1 %363  ;;  %5022 = vmatprep.mubr.msk.f32.mxu0 %vm1813_vm0, %v4216_v36  ;;  %v361_v40 = vpop.permute.xlu0 %360  ;;  %v125_v36 = vld [vmem:[%s7987_s0 + $0x380] sm:$0xff] }
  0xba   :  { %vm1067_vm1 = vcmp.eq.s32.totalorder %v5611_v8, %v361_v40  ;;  %549 = vperm.xlu1 %5383, %v106_v37   ;;  %546 = vperm.xlu0 %5382, %v105_v38   ;;  %vm1068_vm2 = vcmp.eq.s32.totalorder %v5611_v8, %v364_v39 }
  0xbb   :  { %v4218_v42 = vsel %vm1067_vm1, 1.0, %v5385_v13  ;;  %v4219_v47 = vsel %vm1068_vm2, 1.0, %v5385_v13 }
  0xbc   :  { %5023 = vmatmul.mubr.msk.f32.gmra.mxu0 %vm1813_vm0, %v4217_v41  ;;  %v128_v41 = vld [vmem:[%s7987_s0 + $0x398] sm:$0xff] }
  0xbd   :  { %v370_v45 = vpop.permute.xlu1 %369  ;;  %5025 = vmatprep.mubr.msk.f32.mxu0 %vm1813_vm0, %v4218_v42  ;;  %v367_v46 = vpop.permute.xlu0 %366  ;;  %v127_v42 = vld [vmem:[%s7987_s0 + $0x390] sm:$0xff] }
  0xbe   :  { %vm1069_vm3 = vcmp.eq.s32.totalorder %v5611_v8, %v367_v46  ;;  %555 = vperm.xlu1 %5383, %v108_v43   ;;  %552 = vperm.xlu0 %5382, %v107_v44   ;;  %vm1070_vm4 = vcmp.eq.s32.totalorder %v5611_v8, %v370_v45 }
  0xbf   :  { %v4220_v48 = vsel %vm1069_vm3, 1.0, %v5385_v13  ;;  %v4221_v53 = vsel %vm1070_vm4, 1.0, %v5385_v13 }
  0xc0   :  { %5026 = vmatmul.mubr.msk.f32.gmra.mxu0 %vm1813_vm0, %v4219_v47  ;;  %v130_v47 = vld [vmem:[%s7987_s0 + $0x3a8] sm:$0xff] }
  0xc1   :  { %v376_v51 = vpop.permute.xlu1 %375  ;;  %5028 = vmatprep.mubr.msk.f32.mxu0 %vm1813_vm0, %v4220_v48  ;;  %v373_v52 = vpop.permute.xlu0 %372  ;;  %v129_v48 = vld [vmem:[%s7987_s0 + $0x3a0] sm:$0xff] }
  0xc2   :  { %vm1071_vm5 = vcmp.eq.s32.totalorder %v5611_v8, %v373_v52  ;;  %561 = vperm.xlu1 %5383, %v110_v49   ;;  %558 = vperm.xlu0 %5382, %v109_v50   ;;  %vm1072_vm6 = vcmp.eq.s32.totalorder %v5611_v8, %v376_v51 }
  0xc3   :  { %v4222_v54 = vsel %vm1071_vm5, 1.0, %v5385_v13  ;;  %v4223_v59 = vsel %vm1072_vm6, 1.0, %v5385_v13 }
  0xc4   :  { %5029 = vmatmul.mubr.msk.f32.gmra.mxu0 %vm1813_vm0, %v4221_v53  ;;  %v132_v53 = vld [vmem:[%s7987_s0 + $0x3b8] sm:$0xff] }
  0xc5   :  { %v382_v57 = vpop.permute.xlu1 %381  ;;  %5031 = vmatprep.mubr.msk.f32.mxu0 %vm1813_vm0, %v4222_v54  ;;  %v379_v58 = vpop.permute.xlu0 %378  ;;  %v131_v54 = vld [vmem:[%s7987_s0 + $0x3b0] sm:$0xff] }
  0xc6   :  { %vm1073_vm7 = vcmp.eq.s32.totalorder %v5611_v8, %v379_v58  ;;  %567 = vperm.xlu1 %5383, %v112_v55   ;;  %564 = vperm.xlu0 %5382, %v111_v56   ;;  %vm1074_vm8 = vcmp.eq.s32.totalorder %v5611_v8, %v382_v57 }
  0xc7   :  { %v4224_v60 = vsel %vm1073_vm7, 1.0, %v5385_v13  ;;  %v4225_v1 = vsel %vm1074_vm8, 1.0, %v5385_v13 }
  0xc8   :  { %5032 = vmatmul.mubr.msk.f32.gmra.mxu0 %vm1813_vm0, %v4223_v59  ;;  %v134_v59 = vld [vmem:[%s7987_s0 + $0x3c8] sm:$0xff] }
  0xc9   :  { %v388_v63 = vpop.permute.xlu1 %387  ;;  %5034 = vmatprep.mubr.msk.f32.mxu0 %vm1813_vm0, %v4224_v60  ;;  %v385_v0 = vpop.permute.xlu0 %384  ;;  %v133_v60 = vld [vmem:[%s7987_s0 + $0x3c0] sm:$0xff] }
  0xca   :  { %vm1075_vm9 = vcmp.eq.s32.totalorder %v5611_v8, %v385_v0  ;;  %573 = vperm.xlu1 %5383, %v114_v61   ;;  %570 = vperm.xlu0 %5382, %v113_v62   ;;  %vm1076_vm10 = vcmp.eq.s32.totalorder %v5611_v8, %v388_v63 }
  0xcb   :  { %v4226_v2 = vsel %vm1075_vm9, 1.0, %v5385_v13  ;;  %v4227_v7 = vsel %vm1076_vm10, 1.0, %v5385_v13 }
  0xcc   :  { %5035 = vmatmul.mubr.msk.f32.gmra.mxu0 %vm1813_vm0, %v4225_v1  ;;  %v136_v1 = vld [vmem:[%s7987_s0 + $0x3d8] sm:$0xff] }
  0xcd   :  { %v394_v5 = vpop.permute.xlu1 %393  ;;  %5037 = vmatprep.mubr.msk.f32.mxu0 %vm1813_vm0, %v4226_v2  ;;  %v391_v6 = vpop.permute.xlu0 %390  ;;  %v135_v2 = vld [vmem:[%s7987_s0 + $0x3d0] sm:$0xff] }
  0xce   :  { %vm1077_vm11 = vcmp.eq.s32.totalorder %v5611_v8, %v391_v6  ;;  %579 = vperm.xlu1 %5383, %v116_v3   ;;  %576 = vperm.xlu0 %5382, %v115_v4   ;;  %vm1078_vm12 = vcmp.eq.s32.totalorder %v5611_v8, %v394_v5 }
  0xcf   :  { %v4228_v9 = vsel %vm1077_vm11, 1.0, %v5385_v13  ;;  %v4229_v15 = vsel %vm1078_vm12, 1.0, %v5385_v13 }
  0xd0   :  { %5038 = vmatmul.mubr.msk.f32.gmra.mxu0 %vm1813_vm0, %v4227_v7  ;;  %v138_v7 = vld [vmem:[%s7987_s0 + $0x3e8] sm:$0xff] }
  0xd1   :  { %v400_v12 = vpop.permute.xlu1 %399  ;;  %5040 = vmatprep.mubr.msk.f32.mxu0 %vm1813_vm0, %v4228_v9  ;;  %v397_v14 = vpop.permute.xlu0 %396  ;;  %v137_v9 = vld [vmem:[%s7987_s0 + $0x3e0] sm:$0xff] }
  0xd2   :  { %vm1079_vm13 = vcmp.eq.s32.totalorder %v5611_v8, %v397_v14  ;;  %585 = vperm.xlu1 %5383, %v118_v10   ;;  %582 = vperm.xlu0 %5382, %v117_v11   ;;  %vm1080_vm14 = vcmp.eq.s32.totalorder %v5611_v8, %v400_v12 }
  0xd3   :  { %v4230_v16 = vsel %vm1079_vm13, 1.0, %v5385_v13  ;;  %v4231_v21 = vsel %vm1080_vm14, 1.0, %v5385_v13 }
  0xd4   :  { %5041 = vmatmul.mubr.msk.f32.gmra.mxu0 %vm1813_vm0, %v4229_v15  ;;  %v140_v15 = vld [vmem:[%s7987_s0 + $0x3f8] sm:$0xff] }
  0xd5   :  { %v406_v19 = vpop.permute.xlu1 %405  ;;  %5043 = vmatprep.mubr.msk.f32.mxu0 %vm1813_vm0, %v4230_v16  ;;  %v403_v20 = vpop.permute.xlu0 %402  ;;  %v139_v16 = vld [vmem:[%s7987_s0 + $0x3f0] sm:$0xff] }
  0xd6   :  { %vm1081_vm15 = vcmp.eq.s32.totalorder %v5611_v8, %v403_v20  ;;  %591 = vperm.xlu1 %5383, %v120_v17   ;;  %588 = vperm.xlu0 %5382, %v119_v18   ;;  %vm1082_vm1 = vcmp.eq.s32.totalorder %v5611_v8, %v406_v19 }
  0xd7   :  { %v4232_v22 = vsel %vm1081_vm15, 1.0, %v5385_v13  ;;  %v4233_v27 = vsel %vm1082_vm1, 1.0, %v5385_v13 }
  0xd8   :  { %5044 = vmatmul.mubr.msk.f32.gmra.mxu0 %vm1813_vm0, %v4231_v21  ;;  %v142_v21 = vld [vmem:[%s7987_s0 + $0x408] sm:$0xff] }
  0xd9   :  { %v412_v25 = vpop.permute.xlu1 %411  ;;  %5046 = vmatprep.mubr.msk.f32.mxu0 %vm1813_vm0, %v4232_v22  ;;  %v409_v26 = vpop.permute.xlu0 %408  ;;  %v141_v22 = vld [vmem:[%s7987_s0 + $0x400] sm:$0xff] }
  0xda   :  { %vm1083_vm2 = vcmp.eq.s32.totalorder %v5611_v8, %v409_v26  ;;  %597 = vperm.xlu1 %5383, %v122_v23   ;;  %594 = vperm.xlu0 %5382, %v121_v24   ;;  %vm1084_vm3 = vcmp.eq.s32.totalorder %v5611_v8, %v412_v25 }
  0xdb   :  { %v4234_v28 = vsel %vm1083_vm2, 1.0, %v5385_v13  ;;  %v4235_v33 = vsel %vm1084_vm3, 1.0, %v5385_v13 }
  0xdc   :  { %5047 = vmatmul.mubr.msk.f32.gmra.mxu0 %vm1813_vm0, %v4233_v27  ;;  %v144_v27 = vld [vmem:[%s7987_s0 + $0x418] sm:$0xff] }
  0xdd   :  { %v418_v31 = vpop.permute.xlu1 %417  ;;  %5049 = vmatprep.mubr.msk.f32.mxu0 %vm1813_vm0, %v4234_v28  ;;  %v415_v32 = vpop.permute.xlu0 %414  ;;  %v143_v28 = vld [vmem:[%s7987_s0 + $0x410] sm:$0xff] }
  0xde   :  { %vm1085_vm4 = vcmp.eq.s32.totalorder %v5611_v8, %v415_v32  ;;  %603 = vperm.xlu1 %5383, %v124_v29   ;;  %600 = vperm.xlu0 %5382, %v123_v30   ;;  %vm1086_vm5 = vcmp.eq.s32.totalorder %v5611_v8, %v418_v31 }
  0xdf   :  { %v4236_v34 = vsel %vm1085_vm4, 1.0, %v5385_v13  ;;  %v4237_v39 = vsel %vm1086_vm5, 1.0, %v5385_v13 }
  0xe0   :  { %5050 = vmatmul.mubr.msk.f32.gmra.mxu0 %vm1813_vm0, %v4235_v33  ;;  %v146_v33 = vld [vmem:[%s7987_s0 + $0x428] sm:$0xff] }
  0xe1   :  { %v424_v37 = vpop.permute.xlu1 %423  ;;  %5052 = vmatprep.mubr.msk.f32.mxu0 %vm1813_vm0, %v4236_v34  ;;  %v421_v38 = vpop.permute.xlu0 %420  ;;  %v145_v34 = vld [vmem:[%s7987_s0 + $0x420] sm:$0xff] }
  0xe2   :  { %vm1087_vm6 = vcmp.eq.s32.totalorder %v5611_v8, %v421_v38  ;;  %609 = vperm.xlu1 %5383, %v126_v35   ;;  %606 = vperm.xlu0 %5382, %v125_v36   ;;  %vm1088_vm7 = vcmp.eq.s32.totalorder %v5611_v8, %v424_v37 }
  0xe3   :  { %v4238_v40 = vsel %vm1087_vm6, 1.0, %v5385_v13  ;;  %v4239_v45 = vsel %vm1088_vm7, 1.0, %v5385_v13 }
  0xe4   :  { %5053 = vmatmul.mubr.msk.f32.gmra.mxu0 %vm1813_vm0, %v4237_v39  ;;  %v148_v39 = vld [vmem:[%s7987_s0 + $0x438] sm:$0xff] }
  0xe5   :  { %v430_v43 = vpop.permute.xlu1 %429  ;;  %5055 = vmatprep.mubr.msk.f32.mxu0 %vm1813_vm0, %v4238_v40  ;;  %v427_v44 = vpop.permute.xlu0 %426  ;;  %v147_v40 = vld [vmem:[%s7987_s0 + $0x430] sm:$0xff] }
  0xe6   :  { %vm1089_vm8 = vcmp.eq.s32.totalorder %v5611_v8, %v427_v44  ;;  %615 = vperm.xlu1 %5383, %v128_v41   ;;  %612 = vperm.xlu0 %5382, %v127_v42   ;;  %vm1090_vm9 = vcmp.eq.s32.totalorder %v5611_v8, %v430_v43 }
  0xe7   :  { %v4240_v46 = vsel %vm1089_vm8, 1.0, %v5385_v13  ;;  %v4241_v51 = vsel %vm1090_vm9, 1.0, %v5385_v13 }
  0xe8   :  { %5056 = vmatmul.mubr.msk.f32.gmra.mxu0 %vm1813_vm0, %v4239_v45  ;;  %v150_v45 = vld [vmem:[%s7987_s0 + $0x448] sm:$0xff] }
  0xe9   :  { %v436_v49 = vpop.permute.xlu1 %435  ;;  %5058 = vmatprep.mubr.msk.f32.mxu0 %vm1813_vm0, %v4240_v46  ;;  %v433_v50 = vpop.permute.xlu0 %432  ;;  %v149_v46 = vld [vmem:[%s7987_s0 + $0x440] sm:$0xff] }
  0xea   :  { %vm1091_vm10 = vcmp.eq.s32.totalorder %v5611_v8, %v433_v50  ;;  %621 = vperm.xlu1 %5383, %v130_v47   ;;  %618 = vperm.xlu0 %5382, %v129_v48   ;;  %vm1092_vm11 = vcmp.eq.s32.totalorder %v5611_v8, %v436_v49 }
  0xeb   :  { %v4242_v52 = vsel %vm1091_vm10, 1.0, %v5385_v13  ;;  %v4243_v57 = vsel %vm1092_vm11, 1.0, %v5385_v13 }
  0xec   :  { %5059 = vmatmul.mubr.msk.f32.gmra.mxu0 %vm1813_vm0, %v4241_v51  ;;  %v152_v51 = vld [vmem:[%s7987_s0 + $0x458] sm:$0xff] }
  0xed   :  { %v442_v55 = vpop.permute.xlu1 %441  ;;  %5061 = vmatprep.mubr.msk.f32.mxu0 %vm1813_vm0, %v4242_v52  ;;  %v439_v56 = vpop.permute.xlu0 %438  ;;  %v151_v52 = vld [vmem:[%s7987_s0 + $0x450] sm:$0xff] }
  0xee   :  { %vm1093_vm12 = vcmp.eq.s32.totalorder %v5611_v8, %v439_v56  ;;  %627 = vperm.xlu1 %5383, %v132_v53   ;;  %624 = vperm.xlu0 %5382, %v131_v54   ;;  %vm1094_vm13 = vcmp.eq.s32.totalorder %v5611_v8, %v442_v55 }
  0xef   :  { %v4244_v58 = vsel %vm1093_vm12, 1.0, %v5385_v13  ;;  %v4245_v63 = vsel %vm1094_vm13, 1.0, %v5385_v13 }
  0xf0   :  { %5062 = vmatmul.mubr.msk.f32.gmra.mxu0 %vm1813_vm0, %v4243_v57  ;;  %v154_v57 = vld [vmem:[%s7987_s0 + $0x468] sm:$0xff] }
  0xf1   :  { %v448_v61 = vpop.permute.xlu1 %447  ;;  %5064 = vmatprep.mubr.msk.f32.mxu0 %vm1813_vm0, %v4244_v58  ;;  %v445_v62 = vpop.permute.xlu0 %444  ;;  %v153_v58 = vld [vmem:[%s7987_s0 + $0x460] sm:$0xff] }
  0xf2   :  { %vm1095_vm14 = vcmp.eq.s32.totalorder %v5611_v8, %v445_v62  ;;  %633 = vperm.xlu1 %5383, %v134_v59   ;;  %630 = vperm.xlu0 %5382, %v133_v60   ;;  %vm1096_vm15 = vcmp.eq.s32.totalorder %v5611_v8, %v448_v61 }
  0xf3   :  { %v4246_v0 = vsel %vm1095_vm14, 1.0, %v5385_v13  ;;  %v4247_v5 = vsel %vm1096_vm15, 1.0, %v5385_v13 }
  0xf4   :  { %5065 = vmatmul.mubr.msk.f32.gmra.mxu0 %vm1813_vm0, %v4245_v63  ;;  %v156_v63 = vld [vmem:[%s7987_s0 + $0x478] sm:$0xff] }
  0xf5   :  { %v454_v3 = vpop.permute.xlu1 %453  ;;  %5067 = vmatprep.mubr.msk.f32.mxu0 %vm1813_vm0, %v4246_v0  ;;  %v451_v4 = vpop.permute.xlu0 %450  ;;  %v155_v0 = vld [vmem:[%s7987_s0 + $0x470] sm:$0xff] }
  0xf6   :  { %vm1097_vm1 = vcmp.eq.s32.totalorder %v5611_v8, %v451_v4  ;;  %639 = vperm.xlu1 %5383, %v136_v1   ;;  %636 = vperm.xlu0 %5382, %v135_v2   ;;  %vm1098_vm2 = vcmp.eq.s32.totalorder %v5611_v8, %v454_v3 }
  0xf7   :  { %v4248_v6 = vsel %vm1097_vm1, 1.0, %v5385_v13  ;;  %v4249_v12 = vsel %vm1098_vm2, 1.0, %v5385_v13 }
  0xf8   :  { %5068 = vmatmul.mubr.msk.f32.gmra.mxu0 %vm1813_vm0, %v4247_v5  ;;  %v158_v5 = vld [vmem:[%s7987_s0 + $0x488] sm:$0xff] }
  0xf9   :  { %v460_v10 = vpop.permute.xlu1 %459  ;;  %5070 = vmatprep.mubr.msk.f32.mxu0 %vm1813_vm0, %v4248_v6  ;;  %v457_v11 = vpop.permute.xlu0 %456  ;;  %v157_v6 = vld [vmem:[%s7987_s0 + $0x480] sm:$0xff] }
  0xfa   :  { %vm1099_vm3 = vcmp.eq.s32.totalorder %v5611_v8, %v457_v11  ;;  %645 = vperm.xlu1 %5383, %v138_v7   ;;  %642 = vperm.xlu0 %5382, %v137_v9   ;;  %vm1100_vm4 = vcmp.eq.s32.totalorder %v5611_v8, %v460_v10 }
  0xfb   :  { %v4250_v14 = vsel %vm1099_vm3, 1.0, %v5385_v13  ;;  %v4251_v19 = vsel %vm1100_vm4, 1.0, %v5385_v13 }
  0xfc   :  { %5071 = vmatmul.mubr.msk.f32.gmra.mxu0 %vm1813_vm0, %v4249_v12  ;;  %v160_v12 = vld [vmem:[%s7987_s0 + $0x498] sm:$0xff] }
  0xfd   :  { %v466_v17 = vpop.permute.xlu1 %465  ;;  %5073 = vmatprep.mubr.msk.f32.mxu0 %vm1813_vm0, %v4250_v14  ;;  %v463_v18 = vpop.permute.xlu0 %462  ;;  %v159_v14 = vld [vmem:[%s7987_s0 + $0x490] sm:$0xff] }
  0xfe   :  { %vm1101_vm5 = vcmp.eq.s32.totalorder %v5611_v8, %v463_v18  ;;  %651 = vperm.xlu1 %5383, %v140_v15   ;;  %648 = vperm.xlu0 %5382, %v139_v16   ;;  %vm1102_vm6 = vcmp.eq.s32.totalorder %v5611_v8, %v466_v17 }
  0xff   :  { %v4252_v20 = vsel %vm1101_vm5, 1.0, %v5385_v13  ;;  %v4253_v25 = vsel %vm1102_vm6, 1.0, %v5385_v13 }
 0x100   :  { %5074 = vmatmul.mubr.msk.f32.gmra.mxu0 %vm1813_vm0, %v4251_v19  ;;  %v162_v19 = vld [vmem:[%s7987_s0 + $0x4a8] sm:$0xff] }
 0x101   :  { %v472_v23 = vpop.permute.xlu1 %471  ;;  %5076 = vmatprep.mubr.msk.f32.mxu0 %vm1813_vm0, %v4252_v20  ;;  %v469_v24 = vpop.permute.xlu0 %468  ;;  %v161_v20 = vld [vmem:[%s7987_s0 + $0x4a0] sm:$0xff] }
 0x102   :  { %vm1103_vm7 = vcmp.eq.s32.totalorder %v5611_v8, %v469_v24  ;;  %657 = vperm.xlu1 %5383, %v142_v21   ;;  %654 = vperm.xlu0 %5382, %v141_v22   ;;  %vm1104_vm8 = vcmp.eq.s32.totalorder %v5611_v8, %v472_v23 }
 0x103   :  { %v4254_v26 = vsel %vm1103_vm7, 1.0, %v5385_v13  ;;  %v4255_v31 = vsel %vm1104_vm8, 1.0, %v5385_v13 }
 0x104   :  { %5077 = vmatmul.mubr.msk.f32.gmra.mxu0 %vm1813_vm0, %v4253_v25  ;;  %v164_v25 = vld [vmem:[%s7987_s0 + $0x4b8] sm:$0xff] }
 0x105   :  { %v478_v29 = vpop.permute.xlu1 %477  ;;  %5079 = vmatprep.mubr.msk.f32.mxu0 %vm1813_vm0, %v4254_v26  ;;  %v475_v30 = vpop.permute.xlu0 %474  ;;  %v163_v26 = vld [vmem:[%s7987_s0 + $0x4b0] sm:$0xff] }
 0x106   :  { %vm1105_vm9 = vcmp.eq.s32.totalorder %v5611_v8, %v475_v30  ;;  %663 = vperm.xlu1 %5383, %v144_v27   ;;  %660 = vperm.xlu0 %5382, %v143_v28   ;;  %vm1106_vm10 = vcmp.eq.s32.totalorder %v5611_v8, %v478_v29 }
 0x107   :  { %v4256_v32 = vsel %vm1105_vm9, 1.0, %v5385_v13  ;;  %v4257_v37 = vsel %vm1106_vm10, 1.0, %v5385_v13 }
 0x108   :  { %5080 = vmatmul.mubr.msk.f32.gmra.mxu0 %vm1813_vm0, %v4255_v31  ;;  %v166_v31 = vld [vmem:[%s7987_s0 + $0x4c8] sm:$0xff] }
 0x109   :  { %v484_v35 = vpop.permute.xlu1 %483  ;;  %5082 = vmatprep.mubr.msk.f32.mxu0 %vm1813_vm0, %v4256_v32  ;;  %v481_v36 = vpop.permute.xlu0 %480  ;;  %v165_v32 = vld [vmem:[%s7987_s0 + $0x4c0] sm:$0xff] }
 0x10a   :  { %vm1107_vm11 = vcmp.eq.s32.totalorder %v5611_v8, %v481_v36  ;;  %669 = vperm.xlu1 %5383, %v146_v33   ;;  %666 = vperm.xlu0 %5382, %v145_v34   ;;  %vm1108_vm12 = vcmp.eq.s32.totalorder %v5611_v8, %v484_v35 }
 0x10b   :  { %v4258_v38 = vsel %vm1107_vm11, 1.0, %v5385_v13  ;;  %v4259_v43 = vsel %vm1108_vm12, 1.0, %v5385_v13 }
 0x10c   :  { %5083 = vmatmul.mubr.msk.f32.gmra.mxu0 %vm1813_vm0, %v4257_v37  ;;  %v168_v37 = vld [vmem:[%s7987_s0 + $0x4d8] sm:$0xff] }
 0x10d   :  { %v490_v41 = vpop.permute.xlu1 %489  ;;  %5085 = vmatprep.mubr.msk.f32.mxu0 %vm1813_vm0, %v4258_v38  ;;  %v487_v42 = vpop.permute.xlu0 %486  ;;  %v167_v38 = vld [vmem:[%s7987_s0 + $0x4d0] sm:$0xff] }
 0x10e   :  { %vm1109_vm13 = vcmp.eq.s32.totalorder %v5611_v8, %v487_v42  ;;  %675 = vperm.xlu1 %5383, %v148_v39   ;;  %672 = vperm.xlu0 %5382, %v147_v40   ;;  %vm1110_vm14 = vcmp.eq.s32.totalorder %v5611_v8, %v490_v41 }
 0x10f   :  { %v4260_v44 = vsel %vm1109_vm13, 1.0, %v5385_v13  ;;  %v4261_v49 = vsel %vm1110_vm14, 1.0, %v5385_v13 }
 0x110   :  { %5086 = vmatmul.mubr.msk.f32.gmra.mxu0 %vm1813_vm0, %v4259_v43  ;;  %v170_v43 = vld [vmem:[%s7987_s0 + $0x4e8] sm:$0xff] }
 0x111   :  { %v496_v47 = vpop.permute.xlu1 %495  ;;  %5088 = vmatprep.mubr.msk.f32.mxu0 %vm1813_vm0, %v4260_v44  ;;  %v493_v48 = vpop.permute.xlu0 %492  ;;  %v169_v44 = vld [vmem:[%s7987_s0 + $0x4e0] sm:$0xff] }
 0x112   :  { %vm1111_vm15 = vcmp.eq.s32.totalorder %v5611_v8, %v493_v48  ;;  %681 = vperm.xlu1 %5383, %v150_v45   ;;  %678 = vperm.xlu0 %5382, %v149_v46   ;;  %vm1112_vm1 = vcmp.eq.s32.totalorder %v5611_v8, %v496_v47 }
 0x113   :  { %v4262_v50 = vsel %vm1111_vm15, 1.0, %v5385_v13  ;;  %v4263_v55 = vsel %vm1112_vm1, 1.0, %v5385_v13 }
 0x114   :  { %5089 = vmatmul.mubr.msk.f32.gmra.mxu0 %vm1813_vm0, %v4261_v49  ;;  %v172_v49 = vld [vmem:[%s7987_s0 + $0x4f8] sm:$0xff] }
 0x115   :  { %v502_v53 = vpop.permute.xlu1 %501  ;;  %5091 = vmatprep.mubr.msk.f32.mxu0 %vm1813_vm0, %v4262_v50  ;;  %v499_v54 = vpop.permute.xlu0 %498  ;;  %v171_v50 = vld [vmem:[%s7987_s0 + $0x4f0] sm:$0xff] }
 0x116   :  { %vm1113_vm2 = vcmp.eq.s32.totalorder %v5611_v8, %v499_v54  ;;  %687 = vperm.xlu1 %5383, %v152_v51   ;;  %684 = vperm.xlu0 %5382, %v151_v52   ;;  %vm1114_vm3 = vcmp.eq.s32.totalorder %v5611_v8, %v502_v53 }
 0x117   :  { %v4264_v56 = vsel %vm1113_vm2, 1.0, %v5385_v13  ;;  %v4265_v61 = vsel %vm1114_vm3, 1.0, %v5385_v13 }
 0x118   :  { %5092 = vmatmul.mubr.msk.f32.gmra.mxu0 %vm1813_vm0, %v4263_v55  ;;  %v174_v55 = vld [vmem:[%s7987_s0 + $0x508] sm:$0xff] }
 0x119   :  { %v508_v59 = vpop.permute.xlu1 %507  ;;  %5094 = vmatprep.mubr.msk.f32.mxu0 %vm1813_vm0, %v4264_v56  ;;  %v505_v60 = vpop.permute.xlu0 %504  ;;  %v173_v56 = vld [vmem:[%s7987_s0 + $0x500] sm:$0xff] }
 0x11a   :  { %vm1115_vm4 = vcmp.eq.s32.totalorder %v5611_v8, %v505_v60  ;;  %693 = vperm.xlu1 %5383, %v154_v57   ;;  %690 = vperm.xlu0 %5382, %v153_v58   ;;  %vm1116_vm5 = vcmp.eq.s32.totalorder %v5611_v8, %v508_v59 }
 0x11b   :  { %v4266_v62 = vsel %vm1115_vm4, 1.0, %v5385_v13  ;;  %v4267_v3 = vsel %vm1116_vm5, 1.0, %v5385_v13 }
 0x11c   :  { %5095 = vmatmul.mubr.msk.f32.gmra.mxu0 %vm1813_vm0, %v4265_v61  ;;  %v176_v61 = vld [vmem:[%s7987_s0 + $0x518] sm:$0xff] }
 0x11d   :  { %v514_v1 = vpop.permute.xlu1 %513  ;;  %5097 = vmatprep.mubr.msk.f32.mxu0 %vm1813_vm0, %v4266_v62  ;;  %v511_v2 = vpop.permute.xlu0 %510  ;;  %v175_v62 = vld [vmem:[%s7987_s0 + $0x510] sm:$0xff] }
 0x11e   :  { %vm1117_vm6 = vcmp.eq.s32.totalorder %v5611_v8, %v511_v2  ;;  %699 = vperm.xlu1 %5383, %v156_v63   ;;  %696 = vperm.xlu0 %5382, %v155_v0   ;;  %vm1118_vm7 = vcmp.eq.s32.totalorder %v5611_v8, %v514_v1 }
 0x11f   :  { %v4268_v4 = vsel %vm1117_vm6, 1.0, %v5385_v13  ;;  %v4269_v10 = vsel %vm1118_vm7, 1.0, %v5385_v13 }
 0x120   :  { %5098 = vmatmul.mubr.msk.f32.gmra.mxu0 %vm1813_vm0, %v4267_v3 }
 0x121   :  { %v520_v7 = vpop.permute.xlu1 %519  ;;  %5100 = vmatprep.mubr.msk.f32.mxu0 %vm1813_vm0, %v4268_v4  ;;  %v517_v9 = vpop.permute.xlu0 %516 }
 0x122   :  { %vm1119_vm8 = vcmp.eq.s32.totalorder %v5611_v8, %v517_v9  ;;  %705 = vperm.xlu1 %5383, %v158_v5   ;;  %702 = vperm.xlu0 %5382, %v157_v6   ;;  %vm1120_vm9 = vcmp.eq.s32.totalorder %v5611_v8, %v520_v7  ;;  %v178_v5 = vld [vmem:[%s7987_s0 + $0x528] sm:$0xff]  ;;  %v177_v6 = vld [vmem:[%s7987_s0 + $0x520] sm:$0xff] }
 0x123   :  { %v4270_v11 = vsel %vm1119_vm8, 1.0, %v5385_v13  ;;  %v4271_v17 = vsel %vm1120_vm9, 1.0, %v5385_v13 }
 0x124   :  { %5101 = vmatmul.mubr.msk.f32.gmra.mxu0 %vm1813_vm0, %v4269_v10 }
 0x125   :  { %v526_v15 = vpop.permute.xlu1 %525  ;;  %5103 = vmatprep.mubr.msk.f32.mxu0 %vm1813_vm0, %v4270_v11  ;;  %v523_v16 = vpop.permute.xlu0 %522 }
 0x126   :  { %vm1121_vm10 = vcmp.eq.s32.totalorder %v5611_v8, %v523_v16  ;;  %711 = vperm.xlu1 %5383, %v160_v12   ;;  %708 = vperm.xlu0 %5382, %v159_v14   ;;  %vm1122_vm11 = vcmp.eq.s32.totalorder %v5611_v8, %v526_v15  ;;  %v180_v15 = vld [vmem:[%s7987_s0 + $0x538] sm:$0xff]  ;;  %v179_v16 = vld [vmem:[%s7987_s0 + $0x530] sm:$0xff] }
 0x127   :  { %v4272_v18 = vsel %vm1121_vm10, 1.0, %v5385_v13  ;;  %v4273_v23 = vsel %vm1122_vm11, 1.0, %v5385_v13  ;;  %vm3927_vm10 = vcmask 31744  }
 0x128   :  { %5104 = vmatmul.mubr.msk.f32.gmra.mxu0 %vm1813_vm0, %v4271_v17 }
 0x129   :  { %v532_v21 = vpop.permute.xlu1 %531  ;;  %5106 = vmatprep.mubr.msk.f32.mxu0 %vm1813_vm0, %v4272_v18  ;;  %v529_v22 = vpop.permute.xlu0 %528 }
 0x12a   :  { %vm1123_vm12 = vcmp.eq.s32.totalorder %v5611_v8, %v529_v22  ;;  %717 = vperm.xlu1 %5383, %v162_v19   ;;  %714 = vperm.xlu0 %5382, %v161_v20   ;;  %vm1124_vm13 = vcmp.eq.s32.totalorder %v5611_v8, %v532_v21 }
 0x12b   :  { %v4274_v24 = vsel %vm1123_vm12, 1.0, %v5385_v13  ;;  %v4275_v29 = vsel %vm1124_vm13, 1.0, %v5385_v13 }
 0x12c   :  { %5107 = vmatmul.mubr.msk.f32.gmra.mxu0 %vm1813_vm0, %v4273_v23  ;;  %v182_v23 = vld [vmem:[%s7987_s0 + $0x548] sm:$0xff] }
 0x12d   :  { %v538_v27 = vpop.permute.xlu1 %537  ;;  %5109 = vmatprep.mubr.msk.f32.mxu0 %vm1813_vm0, %v4274_v24  ;;  %v535_v28 = vpop.permute.xlu0 %534  ;;  %v181_v24 = vld [vmem:[%s7987_s0 + $0x540] sm:$0xff] }
 0x12e   :  { %vm1125_vm14 = vcmp.eq.s32.totalorder %v5611_v8, %v535_v28  ;;  %723 = vperm.xlu1 %5383, %v164_v25   ;;  %720 = vperm.xlu0 %5382, %v163_v26   ;;  %vm1126_vm15 = vcmp.eq.s32.totalorder %v5611_v8, %v538_v27 }
 0x12f   :  { %v4276_v30 = vsel %vm1125_vm14, 1.0, %v5385_v13  ;;  %v4277_v35 = vsel %vm1126_vm15, 1.0, %v5385_v13 }
 0x130   :  { %5110 = vmatmul.mubr.msk.f32.gmra.mxu0 %vm1813_vm0, %v4275_v29 }
 0x131   :  { %v544_v33 = vpop.permute.xlu1 %543  ;;  %5112 = vmatprep.mubr.msk.f32.mxu0 %vm1813_vm0, %v4276_v30  ;;  %v541_v34 = vpop.permute.xlu0 %540 }
 0x132   :  { %vm1127_vm1 = vcmp.eq.s32.totalorder %v5611_v8, %v541_v34  ;;  %729 = vperm.xlu1 %5383, %v166_v31   ;;  %726 = vperm.xlu0 %5382, %v165_v32   ;;  %vm1128_vm2 = vcmp.eq.s32.totalorder %v5611_v8, %v544_v33  ;;  %v184_v31 = vld [vmem:[%s7987_s0 + $0x558] sm:$0xff]  ;;  %v183_v32 = vld [vmem:[%s7987_s0 + $0x550] sm:$0xff] }
 0x133   :  { %v4278_v36 = vsel %vm1127_vm1, 1.0, %v5385_v13  ;;  %v4279_v41 = vsel %vm1128_vm2, 1.0, %v5385_v13 }
 0x134   :  { %5113 = vmatmul.mubr.msk.f32.gmra.mxu0 %vm1813_vm0, %v4277_v35 }
 0x135   :  { %v550_v39 = vpop.permute.xlu1 %549  ;;  %5115 = vmatprep.mubr.msk.f32.mxu0 %vm1813_vm0, %v4278_v36  ;;  %v547_v40 = vpop.permute.xlu0 %546 }
 0x136   :  { %vm1129_vm3 = vcmp.eq.s32.totalorder %v5611_v8, %v547_v40  ;;  %735 = vperm.xlu1 %5383, %v168_v37   ;;  %732 = vperm.xlu0 %5382, %v167_v38   ;;  %vm1130_vm4 = vcmp.eq.s32.totalorder %v5611_v8, %v550_v39  ;;  %v186_v39 = vld [vmem:[%s7987_s0 + $0x568] sm:$0xff]  ;;  %v185_v40 = vld [vmem:[%s7987_s0 + $0x560] sm:$0xff] }
 0x137   :  { %v4280_v42 = vsel %vm1129_vm3, 1.0, %v5385_v13  ;;  %v4281_v47 = vsel %vm1130_vm4, 1.0, %v5385_v13 }
 0x138   :  { %5116 = vmatmul.mubr.msk.f32.gmra.mxu0 %vm1813_vm0, %v4279_v41 }
 0x139   :  { %v556_v45 = vpop.permute.xlu1 %555  ;;  %5118 = vmatprep.mubr.msk.f32.mxu0 %vm1813_vm0, %v4280_v42  ;;  %v553_v46 = vpop.permute.xlu0 %552 }
 0x13a   :  { %vm1131_vm5 = vcmp.eq.s32.totalorder %v5611_v8, %v553_v46  ;;  %741 = vperm.xlu1 %5383, %v170_v43   ;;  %738 = vperm.xlu0 %5382, %v169_v44   ;;  %vm1132_vm6 = vcmp.eq.s32.totalorder %v5611_v8, %v556_v45 }
 0x13b   :  { %v4282_v48 = vsel %vm1131_vm5, 1.0, %v5385_v13  ;;  %v4283_v53 = vsel %vm1132_vm6, 1.0, %v5385_v13 }
 0x13c   :  { %5119 = vmatmul.mubr.msk.f32.gmra.mxu0 %vm1813_vm0, %v4281_v47  ;;  %v188_v47 = vld [vmem:[%s7987_s0 + $0x578] sm:$0xff] }
 0x13d   :  { %v562_v51 = vpop.permute.xlu1 %561  ;;  %5121 = vmatprep.mubr.msk.f32.mxu0 %vm1813_vm0, %v4282_v48  ;;  %v559_v52 = vpop.permute.xlu0 %558  ;;  %v187_v48 = vld [vmem:[%s7987_s0 + $0x570] sm:$0xff] }
 0x13e   :  { %vm1133_vm7 = vcmp.eq.s32.totalorder %v5611_v8, %v559_v52  ;;  %747 = vperm.xlu1 %5383, %v172_v49   ;;  %744 = vperm.xlu0 %5382, %v171_v50   ;;  %vm1134_vm8 = vcmp.eq.s32.totalorder %v5611_v8, %v562_v51 }
 0x13f   :  { %v4284_v54 = vsel %vm1133_vm7, 1.0, %v5385_v13  ;;  %v4285_v59 = vsel %vm1134_vm8, 1.0, %v5385_v13 }
 0x140   :  { %5122 = vmatmul.mubr.msk.f32.gmra.mxu0 %vm1813_vm0, %v4283_v53 }
 0x141   :  { %v568_v57 = vpop.permute.xlu1 %567  ;;  %5124 = vmatprep.mubr.msk.f32.mxu0 %vm1813_vm0, %v4284_v54  ;;  %v565_v58 = vpop.permute.xlu0 %564 }
 0x142   :  { %vm1135_vm9 = vcmp.eq.s32.totalorder %v5611_v8, %v565_v58  ;;  %753 = vperm.xlu1 %5383, %v174_v55   ;;  %750 = vperm.xlu0 %5382, %v173_v56   ;;  %vm1136_vm11 = vcmp.eq.s32.totalorder %v5611_v8, %v568_v57  ;;  %v190_v55 = vld [vmem:[%s7987_s0 + $0x588] sm:$0xff]  ;;  %v189_v56 = vld [vmem:[%s7987_s0 + $0x580] sm:$0xff] }
 0x143   :  { %v4286_v60 = vsel %vm1135_vm9, 1.0, %v5385_v13  ;;  %v4287_v3 = vsel %vm1136_vm11, 1.0, %v5385_v13 }
 0x144   :  { %v4982_v63 = vpop.f32.mrf.mxu0  ;;  %5125 = vmatmul.mubr.msk.f32.gmra.mxu0 %vm1813_vm0, %v4285_v59 }
 0x145   :  { %3929 = vst.msk [vmem:[%s7989_s2 + $0x8] sm:$0xff] %vm3927_vm10, %v4982_v63  ;;  %v574_v0 = vpop.permute.xlu1 %573  ;;  %5127 = vmatprep.mubr.msk.f32.mxu0 %vm1813_vm0, %v4286_v60  ;;  %v571_v1 = vpop.permute.xlu0 %570  ;;  %v192_v63 = vld [vmem:[%s7987_s0 + $0x598] sm:$0xff] }
 0x146   :  { %vm1137_vm12 = vcmp.eq.s32.totalorder %v5611_v8, %v571_v1  ;;  %759 = vperm.xlu1 %5383, %v176_v61   ;;  %v2648_v2 = vpop.f32.mrf.mxu0  ;;  %756 = vperm.xlu0 %5382, %v175_v62   ;;  %vm1138_vm13 = vcmp.eq.s32.totalorder %v5611_v8, %v574_v0  ;;  %v191_v0 = vld [vmem:[%s7987_s0 + $0x590] sm:$0xff] }
 0x147   :  { %v4288_v4 = vsel %vm1137_vm12, 1.0, %v5385_v13  ;;  %3928 = vst.msk [vmem:[%s7989_s2] sm:$0xff] %vm3927_vm10, %v2648_v2  ;;  %v4289_v12 = vsel %vm1138_vm13, 1.0, %v5385_v13 }
 0x148   :  { %v4985_v7 = vpop.f32.mrf.mxu0  ;;  %5128 = vmatmul.mubr.msk.f32.gmra.mxu0 %vm1813_vm0, %v4287_v3 }
 0x149   :  { %3931 = vst.msk [vmem:[%s7989_s2 + $0x18] sm:$0xff] %vm3927_vm10, %v4985_v7  ;;  %v580_v9 = vpop.permute.xlu1 %579  ;;  %5130 = vmatprep.mubr.msk.f32.mxu0 %vm1813_vm0, %v4288_v4  ;;  %v577_v10 = vpop.permute.xlu0 %576  ;;  %v194_v7 = vld [vmem:[%s7987_s0 + $0x5a8] sm:$0xff] }
 0x14a   :  { %vm1139_vm14 = vcmp.eq.s32.totalorder %v5611_v8, %v577_v10  ;;  %765 = vperm.xlu1 %5383, %v178_v5   ;;  %v2658_v11 = vpop.f32.mrf.mxu0  ;;  %762 = vperm.xlu0 %5382, %v177_v6   ;;  %vm1140_vm15 = vcmp.eq.s32.totalorder %v5611_v8, %v580_v9  ;;  %v193_v9 = vld [vmem:[%s7987_s0 + $0x5a0] sm:$0xff] }
 0x14b   :  { %v4290_v14 = vsel %vm1139_vm14, 1.0, %v5385_v13  ;;  %3930 = vst.msk [vmem:[%s7989_s2 + $0x10] sm:$0xff] %vm3927_vm10, %v2658_v11  ;;  %v4291_v21 = vsel %vm1140_vm15, 1.0, %v5385_v13 }
 0x14c   :  { %v4988_v17 = vpop.f32.mrf.mxu0  ;;  %5131 = vmatmul.mubr.msk.f32.gmra.mxu0 %vm1813_vm0, %v4289_v12 }
 0x14d   :  { %3933 = vst.msk [vmem:[%s7989_s2 + $0x28] sm:$0xff] %vm3927_vm10, %v4988_v17  ;;  %v586_v18 = vpop.permute.xlu1 %585  ;;  %5133 = vmatprep.mubr.msk.f32.mxu0 %vm1813_vm0, %v4290_v14  ;;  %v583_v19 = vpop.permute.xlu0 %582  ;;  %v196_v17 = vld [vmem:[%s7987_s0 + $0x5b8] sm:$0xff] }
 0x14e   :  { %vm1141_vm1 = vcmp.eq.s32.totalorder %v5611_v8, %v583_v19  ;;  %771 = vperm.xlu1 %5383, %v180_v15   ;;  %v2668_v20 = vpop.f32.mrf.mxu0  ;;  %768 = vperm.xlu0 %5382, %v179_v16   ;;  %vm1142_vm2 = vcmp.eq.s32.totalorder %v5611_v8, %v586_v18  ;;  %v195_v18 = vld [vmem:[%s7987_s0 + $0x5b0] sm:$0xff] }
 0x14f   :  { %v4292_v22 = vsel %vm1141_vm1, 1.0, %v5385_v13  ;;  %3932 = vst.msk [vmem:[%s7989_s2 + $0x20] sm:$0xff] %vm3927_vm10, %v2668_v20  ;;  %v4293_v29 = vsel %vm1142_vm2, 1.0, %v5385_v13 }
 0x150   :  { %v4991_v25 = vpop.f32.mrf.mxu0  ;;  %5134 = vmatmul.mubr.msk.f32.gmra.mxu0 %vm1813_vm0, %v4291_v21 }
 0x151   :  { %3935 = vst.msk [vmem:[%s7989_s2 + $0x38] sm:$0xff] %vm3927_vm10, %v4991_v25  ;;  %v592_v26 = vpop.permute.xlu1 %591  ;;  %5136 = vmatprep.mubr.msk.f32.mxu0 %vm1813_vm0, %v4292_v22  ;;  %v589_v27 = vpop.permute.xlu0 %588  ;;  %v198_v25 = vld [vmem:[%s7987_s0 + $0x5c8] sm:$0xff] }
 0x152   :  { %vm1143_vm3 = vcmp.eq.s32.totalorder %v5611_v8, %v589_v27  ;;  %777 = vperm.xlu1 %5383, %v182_v23   ;;  %v2678_v28 = vpop.f32.mrf.mxu0  ;;  %774 = vperm.xlu0 %5382, %v181_v24   ;;  %vm1144_vm4 = vcmp.eq.s32.totalorder %v5611_v8, %v592_v26  ;;  %v197_v26 = vld [vmem:[%s7987_s0 + $0x5c0] sm:$0xff] }
 0x153   :  { %v4294_v30 = vsel %vm1143_vm3, 1.0, %v5385_v13  ;;  %3934 = vst.msk [vmem:[%s7989_s2 + $0x30] sm:$0xff] %vm3927_vm10, %v2678_v28  ;;  %v4295_v37 = vsel %vm1144_vm4, 1.0, %v5385_v13 }
 0x154   :  { %v4994_v33 = vpop.f32.mrf.mxu0  ;;  %5137 = vmatmul.mubr.msk.f32.gmra.mxu0 %vm1813_vm0, %v4293_v29 }
 0x155   :  { %3937 = vst.msk [vmem:[%s7989_s2 + $0x48] sm:$0xff] %vm3927_vm10, %v4994_v33  ;;  %v598_v34 = vpop.permute.xlu1 %597  ;;  %5139 = vmatprep.mubr.msk.f32.mxu0 %vm1813_vm0, %v4294_v30  ;;  %v595_v35 = vpop.permute.xlu0 %594  ;;  %v200_v33 = vld [vmem:[%s7987_s0 + $0x5d8] sm:$0xff] }
 0x156   :  { %vm1145_vm5 = vcmp.eq.s32.totalorder %v5611_v8, %v595_v35  ;;  %783 = vperm.xlu1 %5383, %v184_v31   ;;  %v2688_v36 = vpop.f32.mrf.mxu0  ;;  %780 = vperm.xlu0 %5382, %v183_v32   ;;  %vm1146_vm6 = vcmp.eq.s32.totalorder %v5611_v8, %v598_v34  ;;  %v199_v34 = vld [vmem:[%s7987_s0 + $0x5d0] sm:$0xff] }
 0x157   :  { %v4296_v38 = vsel %vm1145_vm5, 1.0, %v5385_v13  ;;  %3936 = vst.msk [vmem:[%s7989_s2 + $0x40] sm:$0xff] %vm3927_vm10, %v2688_v36  ;;  %v4297_v45 = vsel %vm1146_vm6, 1.0, %v5385_v13 }
 0x158   :  { %v4997_v41 = vpop.f32.mrf.mxu0  ;;  %5140 = vmatmul.mubr.msk.f32.gmra.mxu0 %vm1813_vm0, %v4295_v37 }
 0x159   :  { %3939 = vst.msk [vmem:[%s7989_s2 + $0x58] sm:$0xff] %vm3927_vm10, %v4997_v41  ;;  %v604_v42 = vpop.permute.xlu1 %603  ;;  %5142 = vmatprep.mubr.msk.f32.mxu0 %vm1813_vm0, %v4296_v38  ;;  %v601_v43 = vpop.permute.xlu0 %600  ;;  %v202_v41 = vld [vmem:[%s7987_s0 + $0x5e8] sm:$0xff] }
 0x15a   :  { %vm1147_vm7 = vcmp.eq.s32.totalorder %v5611_v8, %v601_v43  ;;  %789 = vperm.xlu1 %5383, %v186_v39   ;;  %v2698_v44 = vpop.f32.mrf.mxu0  ;;  %786 = vperm.xlu0 %5382, %v185_v40   ;;  %vm1148_vm8 = vcmp.eq.s32.totalorder %v5611_v8, %v604_v42  ;;  %v201_v42 = vld [vmem:[%s7987_s0 + $0x5e0] sm:$0xff] }
 0x15b   :  { %v4298_v46 = vsel %vm1147_vm7, 1.0, %v5385_v13  ;;  %3938 = vst.msk [vmem:[%s7989_s2 + $0x50] sm:$0xff] %vm3927_vm10, %v2698_v44  ;;  %v4299_v53 = vsel %vm1148_vm8, 1.0, %v5385_v13 }
 0x15c   :  { %v5000_v49 = vpop.f32.mrf.mxu0  ;;  %5143 = vmatmul.mubr.msk.f32.gmra.mxu0 %vm1813_vm0, %v4297_v45 }
 0x15d   :  { %3941 = vst.msk [vmem:[%s7989_s2 + $0x68] sm:$0xff] %vm3927_vm10, %v5000_v49  ;;  %v610_v50 = vpop.permute.xlu1 %609  ;;  %5145 = vmatprep.mubr.msk.f32.mxu0 %vm1813_vm0, %v4298_v46  ;;  %v607_v51 = vpop.permute.xlu0 %606  ;;  %v204_v49 = vld [vmem:[%s7987_s0 + $0x5f8] sm:$0xff] }
 0x15e   :  { %vm1149_vm9 = vcmp.eq.s32.totalorder %v5611_v8, %v607_v51  ;;  %795 = vperm.xlu1 %5383, %v188_v47   ;;  %v2708_v52 = vpop.f32.mrf.mxu0  ;;  %792 = vperm.xlu0 %5382, %v187_v48   ;;  %vm1150_vm11 = vcmp.eq.s32.totalorder %v5611_v8, %v610_v50  ;;  %v203_v50 = vld [vmem:[%s7987_s0 + $0x5f0] sm:$0xff] }
 0x15f   :  { %v4300_v54 = vsel %vm1149_vm9, 1.0, %v5385_v13  ;;  %3940 = vst.msk [vmem:[%s7989_s2 + $0x60] sm:$0xff] %vm3927_vm10, %v2708_v52  ;;  %v4301_v61 = vsel %vm1150_vm11, 1.0, %v5385_v13 }
 0x160   :  { %v5003_v57 = vpop.f32.mrf.mxu0  ;;  %5146 = vmatmul.mubr.msk.f32.gmra.mxu0 %vm1813_vm0, %v4299_v53 }
 0x161   :  { %3943 = vst.msk [vmem:[%s7989_s2 + $0x78] sm:$0xff] %vm3927_vm10, %v5003_v57  ;;  %v616_v58 = vpop.permute.xlu1 %615  ;;  %5148 = vmatprep.mubr.msk.f32.mxu0 %vm1813_vm0, %v4300_v54  ;;  %v613_v59 = vpop.permute.xlu0 %612 }
 0x162   :  { %vm1151_vm12 = vcmp.eq.s32.totalorder %v5611_v8, %v613_v59  ;;  %801 = vperm.xlu1 %5383, %v190_v55   ;;  %v2718_v60 = vpop.f32.mrf.mxu0  ;;  %798 = vperm.xlu0 %5382, %v189_v56   ;;  %vm1152_vm13 = vcmp.eq.s32.totalorder %v5611_v8, %v616_v58  ;;  %v206_v58 = vld [vmem:[%s7987_s0 + $0x608] sm:$0xff]  ;;  %v205_v59 = vld [vmem:[%s7987_s0 + $0x600] sm:$0xff] }
 0x163   :  { %v4302_v62 = vsel %vm1151_vm12, 1.0, %v5385_v13  ;;  %3942 = vst.msk [vmem:[%s7989_s2 + $0x70] sm:$0xff] %vm3927_vm10, %v2718_v60  ;;  %v4303_v5 = vsel %vm1152_vm13, 1.0, %v5385_v13 }
 0x164   :  { %v5006_v1 = vpop.f32.mrf.mxu0  ;;  %5149 = vmatmul.mubr.msk.f32.gmra.mxu0 %vm1813_vm0, %v4301_v61 }
 0x165   :  { %3945 = vst.msk [vmem:[%s7989_s2 + $0x88] sm:$0xff] %vm3927_vm10, %v5006_v1  ;;  %v622_v2 = vpop.permute.xlu1 %621  ;;  %5151 = vmatprep.mubr.msk.f32.mxu0 %vm1813_vm0, %v4302_v62  ;;  %v619_v3 = vpop.permute.xlu0 %618 }
 0x166   :  { %vm1153_vm14 = vcmp.eq.s32.totalorder %v5611_v8, %v619_v3  ;;  %807 = vperm.xlu1 %5383, %v192_v63   ;;  %v2728_v4 = vpop.f32.mrf.mxu0  ;;  %804 = vperm.xlu0 %5382, %v191_v0   ;;  %vm1154_vm15 = vcmp.eq.s32.totalorder %v5611_v8, %v622_v2  ;;  %v208_v2 = vld [vmem:[%s7987_s0 + $0x618] sm:$0xff]  ;;  %v207_v3 = vld [vmem:[%s7987_s0 + $0x610] sm:$0xff] }
 0x167   :  { %v4304_v6 = vsel %vm1153_vm14, 1.0, %v5385_v13  ;;  %3944 = vst.msk [vmem:[%s7989_s2 + $0x80] sm:$0xff] %vm3927_vm10, %v2728_v4  ;;  %v4305_v15 = vsel %vm1154_vm15, 1.0, %v5385_v13 }
 0x168   :  { %v5009_v10 = vpop.f32.mrf.mxu0  ;;  %5152 = vmatmul.mubr.msk.f32.gmra.mxu0 %vm1813_vm0, %v4303_v5 }
 0x169   :  { %3947 = vst.msk [vmem:[%s7989_s2 + $0x98] sm:$0xff] %vm3927_vm10, %v5009_v10  ;;  %v628_v11 = vpop.permute.xlu1 %627  ;;  %5154 = vmatprep.mubr.msk.f32.mxu0 %vm1813_vm0, %v4304_v6  ;;  %v625_v12 = vpop.permute.xlu0 %624 }
 0x16a   :  { %vm1155_vm1 = vcmp.eq.s32.totalorder %v5611_v8, %v625_v12  ;;  %813 = vperm.xlu1 %5383, %v194_v7   ;;  %v2738_v14 = vpop.f32.mrf.mxu0  ;;  %810 = vperm.xlu0 %5382, %v193_v9   ;;  %vm1156_vm2 = vcmp.eq.s32.totalorder %v5611_v8, %v628_v11  ;;  %v210_v11 = vld [vmem:[%s7987_s0 + $0x628] sm:$0xff]  ;;  %v209_v12 = vld [vmem:[%s7987_s0 + $0x620] sm:$0xff] }
 0x16b   :  { %v4306_v16 = vsel %vm1155_vm1, 1.0, %v5385_v13  ;;  %3946 = vst.msk [vmem:[%s7989_s2 + $0x90] sm:$0xff] %vm3927_vm10, %v2738_v14  ;;  %v4307_v23 = vsel %vm1156_vm2, 1.0, %v5385_v13 }
 0x16c   :  { %v5012_v19 = vpop.f32.mrf.mxu0  ;;  %5155 = vmatmul.mubr.msk.f32.gmra.mxu0 %vm1813_vm0, %v4305_v15 }
 0x16d   :  { %3949 = vst.msk [vmem:[%s7989_s2 + $0xa8] sm:$0xff] %vm3927_vm10, %v5012_v19  ;;  %v634_v20 = vpop.permute.xlu1 %633  ;;  %5157 = vmatprep.mubr.msk.f32.mxu0 %vm1813_vm0, %v4306_v16  ;;  %v631_v21 = vpop.permute.xlu0 %630 }
 0x16e   :  { %vm1157_vm3 = vcmp.eq.s32.totalorder %v5611_v8, %v631_v21  ;;  %819 = vperm.xlu1 %5383, %v196_v17   ;;  %v2748_v22 = vpop.f32.mrf.mxu0  ;;  %816 = vperm.xlu0 %5382, %v195_v18   ;;  %vm1158_vm4 = vcmp.eq.s32.totalorder %v5611_v8, %v634_v20  ;;  %v212_v20 = vld [vmem:[%s7987_s0 + $0x638] sm:$0xff]  ;;  %v211_v21 = vld [vmem:[%s7987_s0 + $0x630] sm:$0xff] }
 0x16f   :  { %v4308_v24 = vsel %vm1157_vm3, 1.0, %v5385_v13  ;;  %3948 = vst.msk [vmem:[%s7989_s2 + $0xa0] sm:$0xff] %vm3927_vm10, %v2748_v22  ;;  %v4309_v31 = vsel %vm1158_vm4, 1.0, %v5385_v13 }
 0x170   :  { %v5015_v27 = vpop.f32.mrf.mxu0  ;;  %5158 = vmatmul.mubr.msk.f32.gmra.mxu0 %vm1813_vm0, %v4307_v23 }
 0x171   :  { %3951 = vst.msk [vmem:[%s7989_s2 + $0xb8] sm:$0xff] %vm3927_vm10, %v5015_v27  ;;  %v640_v28 = vpop.permute.xlu1 %639  ;;  %5160 = vmatprep.mubr.msk.f32.mxu0 %vm1813_vm0, %v4308_v24  ;;  %v637_v29 = vpop.permute.xlu0 %636 }
 0x172   :  { %vm1159_vm5 = vcmp.eq.s32.totalorder %v5611_v8, %v637_v29  ;;  %825 = vperm.xlu1 %5383, %v198_v25   ;;  %v2758_v30 = vpop.f32.mrf.mxu0  ;;  %822 = vperm.xlu0 %5382, %v197_v26   ;;  %vm1160_vm6 = vcmp.eq.s32.totalorder %v5611_v8, %v640_v28  ;;  %v214_v28 = vld [vmem:[%s7987_s0 + $0x648] sm:$0xff]  ;;  %v213_v29 = vld [vmem:[%s7987_s0 + $0x640] sm:$0xff] }
 0x173   :  { %v4310_v32 = vsel %vm1159_vm5, 1.0, %v5385_v13  ;;  %3950 = vst.msk [vmem:[%s7989_s2 + $0xb0] sm:$0xff] %vm3927_vm10, %v2758_v30  ;;  %v4311_v39 = vsel %vm1160_vm6, 1.0, %v5385_v13 }
 0x174   :  { %v5018_v35 = vpop.f32.mrf.mxu0  ;;  %5161 = vmatmul.mubr.msk.f32.gmra.mxu0 %vm1813_vm0, %v4309_v31 }
 0x175   :  { %3953 = vst.msk [vmem:[%s7989_s2 + $0xc8] sm:$0xff] %vm3927_vm10, %v5018_v35  ;;  %v646_v36 = vpop.permute.xlu1 %645  ;;  %5163 = vmatprep.mubr.msk.f32.mxu0 %vm1813_vm0, %v4310_v32  ;;  %v643_v37 = vpop.permute.xlu0 %642 }
 0x176   :  { %vm1161_vm7 = vcmp.eq.s32.totalorder %v5611_v8, %v643_v37  ;;  %831 = vperm.xlu1 %5383, %v200_v33   ;;  %v2768_v38 = vpop.f32.mrf.mxu0  ;;  %828 = vperm.xlu0 %5382, %v199_v34   ;;  %vm1162_vm8 = vcmp.eq.s32.totalorder %v5611_v8, %v646_v36  ;;  %v216_v36 = vld [vmem:[%s7987_s0 + $0x658] sm:$0xff]  ;;  %v215_v37 = vld [vmem:[%s7987_s0 + $0x650] sm:$0xff] }
 0x177   :  { %v4312_v40 = vsel %vm1161_vm7, 1.0, %v5385_v13  ;;  %3952 = vst.msk [vmem:[%s7989_s2 + $0xc0] sm:$0xff] %vm3927_vm10, %v2768_v38  ;;  %v4313_v47 = vsel %vm1162_vm8, 1.0, %v5385_v13 }
 0x178   :  { %v5021_v43 = vpop.f32.mrf.mxu0  ;;  %5164 = vmatmul.mubr.msk.f32.gmra.mxu0 %vm1813_vm0, %v4311_v39 }
 0x179   :  { %3955 = vst.msk [vmem:[%s7989_s2 + $0xd8] sm:$0xff] %vm3927_vm10, %v5021_v43  ;;  %v652_v44 = vpop.permute.xlu1 %651  ;;  %5166 = vmatprep.mubr.msk.f32.mxu0 %vm1813_vm0, %v4312_v40  ;;  %v649_v45 = vpop.permute.xlu0 %648 }
 0x17a   :  { %vm1163_vm9 = vcmp.eq.s32.totalorder %v5611_v8, %v649_v45  ;;  %837 = vperm.xlu1 %5383, %v202_v41   ;;  %v2778_v46 = vpop.f32.mrf.mxu0  ;;  %834 = vperm.xlu0 %5382, %v201_v42   ;;  %vm1164_vm11 = vcmp.eq.s32.totalorder %v5611_v8, %v652_v44  ;;  %v218_v44 = vld [vmem:[%s7987_s0 + $0x668] sm:$0xff]  ;;  %v217_v45 = vld [vmem:[%s7987_s0 + $0x660] sm:$0xff] }
 0x17b   :  { %v4314_v48 = vsel %vm1163_vm9, 1.0, %v5385_v13  ;;  %3954 = vst.msk [vmem:[%s7989_s2 + $0xd0] sm:$0xff] %vm3927_vm10, %v2778_v46  ;;  %v4315_v55 = vsel %vm1164_vm11, 1.0, %v5385_v13 }
 0x17c   :  { %v5024_v51 = vpop.f32.mrf.mxu0  ;;  %5167 = vmatmul.mubr.msk.f32.gmra.mxu0 %vm1813_vm0, %v4313_v47 }
 0x17d   :  { %3957 = vst.msk [vmem:[%s7989_s2 + $0xe8] sm:$0xff] %vm3927_vm10, %v5024_v51  ;;  %v658_v52 = vpop.permute.xlu1 %657  ;;  %5169 = vmatprep.mubr.msk.f32.mxu0 %vm1813_vm0, %v4314_v48  ;;  %v655_v53 = vpop.permute.xlu0 %654 }
 0x17e   :  { %vm1166_vm12 = vcmp.eq.s32.totalorder %v5611_v8, %v658_v52  ;;  %843 = vperm.xlu1 %5383, %v204_v49   ;;  %v2788_v54 = vpop.f32.mrf.mxu0  ;;  %840 = vperm.xlu0 %5382, %v203_v50   ;;  %vm1165_vm13 = vcmp.eq.s32.totalorder %v5611_v8, %v655_v53  ;;  %v220_v52 = vld [vmem:[%s7987_s0 + $0x678] sm:$0xff]  ;;  %v219_v53 = vld [vmem:[%s7987_s0 + $0x670] sm:$0xff] }
 0x17f   :  { %v4317_v56 = vsel %vm1166_vm12, 1.0, %v5385_v13  ;;  %3956 = vst.msk [vmem:[%s7989_s2 + $0xe0] sm:$0xff] %vm3927_vm10, %v2788_v54  ;;  %v4316_v57 = vsel %vm1165_vm13, 1.0, %v5385_v13 }
 0x180   :  { %v5027_v60 = vpop.f32.mrf.mxu0  ;;  %5170 = vmatmul.mubr.msk.f32.gmra.mxu0 %vm1813_vm0, %v4315_v55  ;;  %5172 = vmatprep.mubr.msk.f32.mxu1 %vm1813_vm0, %v4316_v57 }
 0x181   :  { %3959 = vst.msk [vmem:[%s7989_s2 + $0xf8] sm:$0xff] %vm3927_vm10, %v5027_v60  ;;  %v664_v61 = vpop.permute.xlu1 %663  ;;  %5173 = vmatmul.mubr.msk.f32.vlgmr.msra.gmra.mxu1 %vm1813_vm0, %v4317_v56  ;;  %v661_v62 = vpop.permute.xlu0 %660  ;;  %v222_v60 = vld [vmem:[%s7987_s0 + $0x688] sm:$0xff] }
 0x182   :  { %vm1168_vm14 = vcmp.eq.s32.totalorder %v5611_v8, %v664_v61  ;;  %vm1167_vm15 = vcmp.eq.s32.totalorder %v5611_v8, %v661_v62  ;;  %849 = vperm.xlu1 %5383, %v206_v58   ;;  %v2798_v63 = vpop.f32.mrf.mxu0  ;;  %846 = vperm.xlu0 %5382, %v205_v59   ;;  %v221_v61 = vld [vmem:[%s7987_s0 + $0x680] sm:$0xff] }
 0x183   :  { %v4319_v0 = vsel %vm1168_vm14, 1.0, %v5385_v13  ;;  %v4318_v1 = vsel %vm1167_vm15, 1.0, %v5385_v13  ;;  %3958 = vst.msk [vmem:[%s7989_s2 + $0xf0] sm:$0xff] %vm3927_vm10, %v2798_v63 }
 0x184   :  { %v5030_v4 = vpop.f32.mrf.mxu0  ;;  %5175 = vmatprep.mubr.msk.f32.mxu1 %vm1813_vm0, %v4318_v1 }
 0x185   :  { %3961 = vst.msk [vmem:[%s7989_s2 + $0x108] sm:$0xff] %vm3927_vm10, %v5030_v4  ;;  %v670_v5 = vpop.permute.xlu1 %669  ;;  %5176 = vmatmul.mubr.msk.f32.gmra.mxu1 %vm1813_vm0, %v4319_v0  ;;  %v667_v6 = vpop.permute.xlu0 %666  ;;  %v224_v4 = vld [vmem:[%s7987_s0 + $0x698] sm:$0xff] }
 0x186   :  { %vm1170_vm1 = vcmp.eq.s32.totalorder %v5611_v8, %v670_v5  ;;  %vm1169_vm2 = vcmp.eq.s32.totalorder %v5611_v8, %v667_v6  ;;  %855 = vperm.xlu1 %5383, %v208_v2   ;;  %v2808_v7 = vpop.f32.mrf.mxu0  ;;  %852 = vperm.xlu0 %5382, %v207_v3   ;;  %v223_v5 = vld [vmem:[%s7987_s0 + $0x690] sm:$0xff] }
 0x187   :  { %v4321_v9 = vsel %vm1170_vm1, 1.0, %v5385_v13  ;;  %v4320_v10 = vsel %vm1169_vm2, 1.0, %v5385_v13  ;;  %3960 = vst.msk [vmem:[%s7989_s2 + $0x100] sm:$0xff] %vm3927_vm10, %v2808_v7 }
 0x188   :  { %v5033_v14 = vpop.f32.mrf.mxu0  ;;  %5178 = vmatprep.mubr.msk.f32.mxu1 %vm1813_vm0, %v4320_v10 }
 0x189   :  { %3963 = vst.msk [vmem:[%s7989_s2 + $0x118] sm:$0xff] %vm3927_vm10, %v5033_v14  ;;  %v676_v15 = vpop.permute.xlu1 %675  ;;  %5179 = vmatmul.mubr.msk.f32.gmra.mxu1 %vm1813_vm0, %v4321_v9  ;;  %v673_v16 = vpop.permute.xlu0 %672  ;;  %v226_v14 = vld [vmem:[%s7987_s0 + $0x6a8] sm:$0xff] }
 0x18a   :  { %vm1172_vm3 = vcmp.eq.s32.totalorder %v5611_v8, %v676_v15  ;;  %vm1171_vm4 = vcmp.eq.s32.totalorder %v5611_v8, %v673_v16  ;;  %861 = vperm.xlu1 %5383, %v210_v11   ;;  %v2818_v17 = vpop.f32.mrf.mxu0  ;;  %858 = vperm.xlu0 %5382, %v209_v12   ;;  %v225_v15 = vld [vmem:[%s7987_s0 + $0x6a0] sm:$0xff] }
 0x18b   :  { %v4323_v18 = vsel %vm1172_vm3, 1.0, %v5385_v13  ;;  %v4322_v19 = vsel %vm1171_vm4, 1.0, %v5385_v13  ;;  %3962 = vst.msk [vmem:[%s7989_s2 + $0x110] sm:$0xff] %vm3927_vm10, %v2818_v17 }
 0x18c   :  { %v5036_v22 = vpop.f32.mrf.mxu0  ;;  %5181 = vmatprep.mubr.msk.f32.mxu1 %vm1813_vm0, %v4322_v19 }
 0x18d   :  { %3965 = vst.msk [vmem:[%s7989_s2 + $0x128] sm:$0xff] %vm3927_vm10, %v5036_v22  ;;  %v682_v23 = vpop.permute.xlu1 %681  ;;  %5182 = vmatmul.mubr.msk.f32.gmra.mxu1 %vm1813_vm0, %v4323_v18  ;;  %v679_v24 = vpop.permute.xlu0 %678  ;;  %v228_v22 = vld [vmem:[%s7987_s0 + $0x6b8] sm:$0xff] }
 0x18e   :  { %vm1174_vm5 = vcmp.eq.s32.totalorder %v5611_v8, %v682_v23  ;;  %vm1173_vm6 = vcmp.eq.s32.totalorder %v5611_v8, %v679_v24  ;;  %867 = vperm.xlu1 %5383, %v212_v20   ;;  %v2828_v25 = vpop.f32.mrf.mxu0  ;;  %864 = vperm.xlu0 %5382, %v211_v21   ;;  %v227_v23 = vld [vmem:[%s7987_s0 + $0x6b0] sm:$0xff] }
 0x18f   :  { %v4325_v26 = vsel %vm1174_vm5, 1.0, %v5385_v13  ;;  %v4324_v27 = vsel %vm1173_vm6, 1.0, %v5385_v13  ;;  %3964 = vst.msk [vmem:[%s7989_s2 + $0x120] sm:$0xff] %vm3927_vm10, %v2828_v25 }
 0x190   :  { %v5039_v30 = vpop.f32.mrf.mxu0  ;;  %5184 = vmatprep.mubr.msk.f32.mxu1 %vm1813_vm0, %v4324_v27 }
 0x191   :  { %3967 = vst.msk [vmem:[%s7989_s2 + $0x138] sm:$0xff] %vm3927_vm10, %v5039_v30  ;;  %v688_v31 = vpop.permute.xlu1 %687  ;;  %5185 = vmatmul.mubr.msk.f32.gmra.mxu1 %vm1813_vm0, %v4325_v26  ;;  %v685_v32 = vpop.permute.xlu0 %684  ;;  %v230_v30 = vld [vmem:[%s7987_s0 + $0x6c8] sm:$0xff] }
 0x192   :  { %vm1176_vm7 = vcmp.eq.s32.totalorder %v5611_v8, %v688_v31  ;;  %vm1175_vm8 = vcmp.eq.s32.totalorder %v5611_v8, %v685_v32  ;;  %873 = vperm.xlu1 %5383, %v214_v28   ;;  %v2838_v33 = vpop.f32.mrf.mxu0  ;;  %870 = vperm.xlu0 %5382, %v213_v29   ;;  %v229_v31 = vld [vmem:[%s7987_s0 + $0x6c0] sm:$0xff] }
 0x193   :  { %v4327_v34 = vsel %vm1176_vm7, 1.0, %v5385_v13  ;;  %v4326_v35 = vsel %vm1175_vm8, 1.0, %v5385_v13  ;;  %3966 = vst.msk [vmem:[%s7989_s2 + $0x130] sm:$0xff] %vm3927_vm10, %v2838_v33 }
 0x194   :  { %v5042_v38 = vpop.f32.mrf.mxu0  ;;  %5187 = vmatprep.mubr.msk.f32.mxu1 %vm1813_vm0, %v4326_v35 }
 0x195   :  { %3969 = vst.msk [vmem:[%s7989_s2 + $0x148] sm:$0xff] %vm3927_vm10, %v5042_v38  ;;  %v694_v39 = vpop.permute.xlu1 %693  ;;  %5188 = vmatmul.mubr.msk.f32.gmra.mxu1 %vm1813_vm0, %v4327_v34  ;;  %v691_v40 = vpop.permute.xlu0 %690  ;;  %v232_v38 = vld [vmem:[%s7987_s0 + $0x6d8] sm:$0xff] }
 0x196   :  { %vm1178_vm9 = vcmp.eq.s32.totalorder %v5611_v8, %v694_v39  ;;  %vm1177_vm11 = vcmp.eq.s32.totalorder %v5611_v8, %v691_v40  ;;  %879 = vperm.xlu1 %5383, %v216_v36   ;;  %v2848_v41 = vpop.f32.mrf.mxu0  ;;  %876 = vperm.xlu0 %5382, %v215_v37   ;;  %v231_v39 = vld [vmem:[%s7987_s0 + $0x6d0] sm:$0xff] }
 0x197   :  { %v4329_v42 = vsel %vm1178_vm9, 1.0, %v5385_v13  ;;  %v4328_v43 = vsel %vm1177_vm11, 1.0, %v5385_v13  ;;  %3968 = vst.msk [vmem:[%s7989_s2 + $0x140] sm:$0xff] %vm3927_vm10, %v2848_v41 }
 0x198   :  { %v5045_v46 = vpop.f32.mrf.mxu0  ;;  %5190 = vmatprep.mubr.msk.f32.mxu1 %vm1813_vm0, %v4328_v43 }
 0x199   :  { %3971 = vst.msk [vmem:[%s7989_s2 + $0x158] sm:$0xff] %vm3927_vm10, %v5045_v46  ;;  %v700_v47 = vpop.permute.xlu1 %699  ;;  %5191 = vmatmul.mubr.msk.f32.gmra.mxu1 %vm1813_vm0, %v4329_v42  ;;  %v697_v48 = vpop.permute.xlu0 %696  ;;  %v234_v46 = vld [vmem:[%s7987_s0 + $0x6e8] sm:$0xff] }
 0x19a   :  { %vm1180_vm12 = vcmp.eq.s32.totalorder %v5611_v8, %v700_v47  ;;  %vm1179_vm13 = vcmp.eq.s32.totalorder %v5611_v8, %v697_v48  ;;  %885 = vperm.xlu1 %5383, %v218_v44   ;;  %v2858_v49 = vpop.f32.mrf.mxu0  ;;  %882 = vperm.xlu0 %5382, %v217_v45   ;;  %v233_v47 = vld [vmem:[%s7987_s0 + $0x6e0] sm:$0xff] }
 0x19b   :  { %v4331_v50 = vsel %vm1180_vm12, 1.0, %v5385_v13  ;;  %v4330_v51 = vsel %vm1179_vm13, 1.0, %v5385_v13  ;;  %3970 = vst.msk [vmem:[%s7989_s2 + $0x150] sm:$0xff] %vm3927_vm10, %v2858_v49 }
 0x19c   :  { %v5048_v54 = vpop.f32.mrf.mxu0  ;;  %5193 = vmatprep.mubr.msk.f32.mxu1 %vm1813_vm0, %v4330_v51 }
 0x19d   :  { %3973 = vst.msk [vmem:[%s7989_s2 + $0x168] sm:$0xff] %vm3927_vm10, %v5048_v54  ;;  %v706_v55 = vpop.permute.xlu1 %705  ;;  %5194 = vmatmul.mubr.msk.f32.gmra.mxu1 %vm1813_vm0, %v4331_v50  ;;  %v703_v56 = vpop.permute.xlu0 %702  ;;  %v236_v54 = vld [vmem:[%s7987_s0 + $0x6f8] sm:$0xff] }
 0x19e   :  { %vm1182_vm14 = vcmp.eq.s32.totalorder %v5611_v8, %v706_v55  ;;  %vm1181_vm15 = vcmp.eq.s32.totalorder %v5611_v8, %v703_v56  ;;  %891 = vperm.xlu1 %5383, %v220_v52   ;;  %v2868_v57 = vpop.f32.mrf.mxu0  ;;  %888 = vperm.xlu0 %5382, %v219_v53   ;;  %v235_v55 = vld [vmem:[%s7987_s0 + $0x6f0] sm:$0xff] }
 0x19f   :  { %v4333_v58 = vsel %vm1182_vm14, 1.0, %v5385_v13  ;;  %v4332_v59 = vsel %vm1181_vm15, 1.0, %v5385_v13  ;;  %3972 = vst.msk [vmem:[%s7989_s2 + $0x160] sm:$0xff] %vm3927_vm10, %v2868_v57 }
 0x1a0   :  { %v5051_v62 = vpop.f32.mrf.mxu0  ;;  %5196 = vmatprep.mubr.msk.f32.mxu1 %vm1813_vm0, %v4332_v59 }
 0x1a1   :  { %3975 = vst.msk [vmem:[%s7989_s2 + $0x178] sm:$0xff] %vm3927_vm10, %v5051_v62  ;;  %v712_v63 = vpop.permute.xlu1 %711  ;;  %5197 = vmatmul.mubr.msk.f32.gmra.mxu1 %vm1813_vm0, %v4333_v58  ;;  %v709_v0 = vpop.permute.xlu0 %708  ;;  %v238_v62 = vld [vmem:[%s7987_s0 + $0x708] sm:$0xff] }
 0x1a2   :  { %vm1184_vm1 = vcmp.eq.s32.totalorder %v5611_v8, %v712_v63  ;;  %vm1183_vm2 = vcmp.eq.s32.totalorder %v5611_v8, %v709_v0  ;;  %897 = vperm.xlu1 %5383, %v222_v60   ;;  %v2878_v1 = vpop.f32.mrf.mxu0  ;;  %894 = vperm.xlu0 %5382, %v221_v61   ;;  %v237_v63 = vld [vmem:[%s7987_s0 + $0x700] sm:$0xff] }
 0x1a3   :  { %v4335_v2 = vsel %vm1184_vm1, 1.0, %v5385_v13  ;;  %v4334_v3 = vsel %vm1183_vm2, 1.0, %v5385_v13  ;;  %3974 = vst.msk [vmem:[%s7989_s2 + $0x170] sm:$0xff] %vm3927_vm10, %v2878_v1 }
 0x1a4   :  { %v5054_v6 = vpop.f32.mrf.mxu0  ;;  %5199 = vmatprep.mubr.msk.f32.mxu1 %vm1813_vm0, %v4334_v3 }
 0x1a5   :  { %3977 = vst.msk [vmem:[%s7989_s2 + $0x188] sm:$0xff] %vm3927_vm10, %v5054_v6  ;;  %v718_v7 = vpop.permute.xlu1 %717  ;;  %5200 = vmatmul.mubr.msk.f32.gmra.mxu1 %vm1813_vm0, %v4335_v2  ;;  %v715_v9 = vpop.permute.xlu0 %714  ;;  %v240_v6 = vld [vmem:[%s7987_s0 + $0x718] sm:$0xff] }
 0x1a6   :  { %vm1186_vm3 = vcmp.eq.s32.totalorder %v5611_v8, %v718_v7  ;;  %vm1185_vm4 = vcmp.eq.s32.totalorder %v5611_v8, %v715_v9  ;;  %903 = vperm.xlu1 %5383, %v224_v4   ;;  %v2888_v10 = vpop.f32.mrf.mxu0  ;;  %900 = vperm.xlu0 %5382, %v223_v5   ;;  %v239_v7 = vld [vmem:[%s7987_s0 + $0x710] sm:$0xff] }
 0x1a7   :  { %v4337_v11 = vsel %vm1186_vm3, 1.0, %v5385_v13  ;;  %v4336_v12 = vsel %vm1185_vm4, 1.0, %v5385_v13  ;;  %3976 = vst.msk [vmem:[%s7989_s2 + $0x180] sm:$0xff] %vm3927_vm10, %v2888_v10 }
 0x1a8   :  { %v5057_v16 = vpop.f32.mrf.mxu0  ;;  %5202 = vmatprep.mubr.msk.f32.mxu1 %vm1813_vm0, %v4336_v12 }
 0x1a9   :  { %3979 = vst.msk [vmem:[%s7989_s2 + $0x198] sm:$0xff] %vm3927_vm10, %v5057_v16  ;;  %v724_v17 = vpop.permute.xlu1 %723  ;;  %5203 = vmatmul.mubr.msk.f32.gmra.mxu1 %vm1813_vm0, %v4337_v11  ;;  %v721_v18 = vpop.permute.xlu0 %720  ;;  %v242_v16 = vld [vmem:[%s7987_s0 + $0x728] sm:$0xff] }
 0x1aa   :  { %vm1188_vm5 = vcmp.eq.s32.totalorder %v5611_v8, %v724_v17  ;;  %vm1187_vm6 = vcmp.eq.s32.totalorder %v5611_v8, %v721_v18  ;;  %909 = vperm.xlu1 %5383, %v226_v14   ;;  %v2898_v19 = vpop.f32.mrf.mxu0  ;;  %906 = vperm.xlu0 %5382, %v225_v15   ;;  %v241_v17 = vld [vmem:[%s7987_s0 + $0x720] sm:$0xff] }
 0x1ab   :  { %v4339_v20 = vsel %vm1188_vm5, 1.0, %v5385_v13  ;;  %v4338_v21 = vsel %vm1187_vm6, 1.0, %v5385_v13  ;;  %3978 = vst.msk [vmem:[%s7989_s2 + $0x190] sm:$0xff] %vm3927_vm10, %v2898_v19 }
 0x1ac   :  { %v5060_v24 = vpop.f32.mrf.mxu0  ;;  %5205 = vmatprep.mubr.msk.f32.mxu1 %vm1813_vm0, %v4338_v21 }
 0x1ad   :  { %3981 = vst.msk [vmem:[%s7989_s2 + $0x1a8] sm:$0xff] %vm3927_vm10, %v5060_v24  ;;  %v730_v25 = vpop.permute.xlu1 %729  ;;  %5206 = vmatmul.mubr.msk.f32.gmra.mxu1 %vm1813_vm0, %v4339_v20  ;;  %v727_v26 = vpop.permute.xlu0 %726  ;;  %v244_v24 = vld [vmem:[%s7987_s0 + $0x738] sm:$0xff] }
 0x1ae   :  { %vm1190_vm7 = vcmp.eq.s32.totalorder %v5611_v8, %v730_v25  ;;  %vm1189_vm8 = vcmp.eq.s32.totalorder %v5611_v8, %v727_v26  ;;  %915 = vperm.xlu1 %5383, %v228_v22   ;;  %v2908_v27 = vpop.f32.mrf.mxu0  ;;  %912 = vperm.xlu0 %5382, %v227_v23   ;;  %v243_v25 = vld [vmem:[%s7987_s0 + $0x730] sm:$0xff] }
 0x1af   :  { %v4341_v28 = vsel %vm1190_vm7, 1.0, %v5385_v13  ;;  %v4340_v29 = vsel %vm1189_vm8, 1.0, %v5385_v13  ;;  %3980 = vst.msk [vmem:[%s7989_s2 + $0x1a0] sm:$0xff] %vm3927_vm10, %v2908_v27 }
 0x1b0   :  { %v5063_v32 = vpop.f32.mrf.mxu0  ;;  %5208 = vmatprep.mubr.msk.f32.mxu1 %vm1813_vm0, %v4340_v29 }
 0x1b1   :  { %3983 = vst.msk [vmem:[%s7989_s2 + $0x1b8] sm:$0xff] %vm3927_vm10, %v5063_v32  ;;  %v736_v33 = vpop.permute.xlu1 %735  ;;  %5209 = vmatmul.mubr.msk.f32.gmra.mxu1 %vm1813_vm0, %v4341_v28  ;;  %v733_v34 = vpop.permute.xlu0 %732  ;;  %v246_v32 = vld [vmem:[%s7987_s0 + $0x748] sm:$0xff] }
 0x1b2   :  { %vm1192_vm9 = vcmp.eq.s32.totalorder %v5611_v8, %v736_v33  ;;  %vm1191_vm11 = vcmp.eq.s32.totalorder %v5611_v8, %v733_v34  ;;  %921 = vperm.xlu1 %5383, %v230_v30   ;;  %v2918_v35 = vpop.f32.mrf.mxu0  ;;  %918 = vperm.xlu0 %5382, %v229_v31   ;;  %v245_v33 = vld [vmem:[%s7987_s0 + $0x740] sm:$0xff] }
 0x1b3   :  { %v4343_v36 = vsel %vm1192_vm9, 1.0, %v5385_v13  ;;  %v4342_v37 = vsel %vm1191_vm11, 1.0, %v5385_v13  ;;  %3982 = vst.msk [vmem:[%s7989_s2 + $0x1b0] sm:$0xff] %vm3927_vm10, %v2918_v35 }
 0x1b4   :  { %v5066_v40 = vpop.f32.mrf.mxu0  ;;  %5211 = vmatprep.mubr.msk.f32.mxu1 %vm1813_vm0, %v4342_v37 }
 0x1b5   :  { %3985 = vst.msk [vmem:[%s7989_s2 + $0x1c8] sm:$0xff] %vm3927_vm10, %v5066_v40  ;;  %v742_v41 = vpop.permute.xlu1 %741  ;;  %5212 = vmatmul.mubr.msk.f32.gmra.mxu1 %vm1813_vm0, %v4343_v36  ;;  %v739_v42 = vpop.permute.xlu0 %738  ;;  %v248_v40 = vld [vmem:[%s7987_s0 + $0x758] sm:$0xff] }
 0x1b6   :  { %vm1194_vm12 = vcmp.eq.s32.totalorder %v5611_v8, %v742_v41  ;;  %vm1193_vm13 = vcmp.eq.s32.totalorder %v5611_v8, %v739_v42  ;;  %927 = vperm.xlu1 %5383, %v232_v38   ;;  %v2928_v43 = vpop.f32.mrf.mxu0  ;;  %924 = vperm.xlu0 %5382, %v231_v39   ;;  %v247_v41 = vld [vmem:[%s7987_s0 + $0x750] sm:$0xff] }
 0x1b7   :  { %v4345_v44 = vsel %vm1194_vm12, 1.0, %v5385_v13  ;;  %v4344_v45 = vsel %vm1193_vm13, 1.0, %v5385_v13  ;;  %3984 = vst.msk [vmem:[%s7989_s2 + $0x1c0] sm:$0xff] %vm3927_vm10, %v2928_v43 }
 0x1b8   :  { %v5069_v48 = vpop.f32.mrf.mxu0  ;;  %5214 = vmatprep.mubr.msk.f32.mxu1 %vm1813_vm0, %v4344_v45 }
 0x1b9   :  { %3987 = vst.msk [vmem:[%s7989_s2 + $0x1d8] sm:$0xff] %vm3927_vm10, %v5069_v48  ;;  %v748_v49 = vpop.permute.xlu1 %747  ;;  %5215 = vmatmul.mubr.msk.f32.gmra.mxu1 %vm1813_vm0, %v4345_v44  ;;  %v745_v50 = vpop.permute.xlu0 %744  ;;  %v250_v48 = vld [vmem:[%s7987_s0 + $0x768] sm:$0xff] }
 0x1ba   :  { %vm1196_vm14 = vcmp.eq.s32.totalorder %v5611_v8, %v748_v49  ;;  %vm1195_vm15 = vcmp.eq.s32.totalorder %v5611_v8, %v745_v50  ;;  %933 = vperm.xlu1 %5383, %v234_v46   ;;  %v2938_v51 = vpop.f32.mrf.mxu0  ;;  %930 = vperm.xlu0 %5382, %v233_v47   ;;  %v249_v49 = vld [vmem:[%s7987_s0 + $0x760] sm:$0xff] }
 0x1bb   :  { %v4347_v52 = vsel %vm1196_vm14, 1.0, %v5385_v13  ;;  %v4346_v53 = vsel %vm1195_vm15, 1.0, %v5385_v13  ;;  %3986 = vst.msk [vmem:[%s7989_s2 + $0x1d0] sm:$0xff] %vm3927_vm10, %v2938_v51 }
 0x1bc   :  { %v5072_v56 = vpop.f32.mrf.mxu0  ;;  %5217 = vmatprep.mubr.msk.f32.mxu1 %vm1813_vm0, %v4346_v53 }
 0x1bd   :  { %3989 = vst.msk [vmem:[%s7989_s2 + $0x1e8] sm:$0xff] %vm3927_vm10, %v5072_v56  ;;  %v754_v57 = vpop.permute.xlu1 %753  ;;  %5218 = vmatmul.mubr.msk.f32.gmra.mxu1 %vm1813_vm0, %v4347_v52  ;;  %v751_v58 = vpop.permute.xlu0 %750  ;;  %v252_v56 = vld [vmem:[%s7987_s0 + $0x778] sm:$0xff] }
 0x1be   :  { %vm1198_vm1 = vcmp.eq.s32.totalorder %v5611_v8, %v754_v57  ;;  %vm1197_vm2 = vcmp.eq.s32.totalorder %v5611_v8, %v751_v58  ;;  %939 = vperm.xlu1 %5383, %v236_v54   ;;  %v2948_v59 = vpop.f32.mrf.mxu0  ;;  %936 = vperm.xlu0 %5382, %v235_v55   ;;  %v251_v57 = vld [vmem:[%s7987_s0 + $0x770] sm:$0xff] }
 0x1bf   :  { %v4349_v60 = vsel %vm1198_vm1, 1.0, %v5385_v13  ;;  %v4348_v61 = vsel %vm1197_vm2, 1.0, %v5385_v13  ;;  %3988 = vst.msk [vmem:[%s7989_s2 + $0x1e0] sm:$0xff] %vm3927_vm10, %v2948_v59 }
 0x1c0   :  { %v5075_v0 = vpop.f32.mrf.mxu0  ;;  %5220 = vmatprep.mubr.msk.f32.mxu1 %vm1813_vm0, %v4348_v61 }
 0x1c1   :  { %3991 = vst.msk [vmem:[%s7989_s2 + $0x1f8] sm:$0xff] %vm3927_vm10, %v5075_v0  ;;  %v760_v1 = vpop.permute.xlu1 %759  ;;  %5221 = vmatmul.mubr.msk.f32.gmra.mxu1 %vm1813_vm0, %v4349_v60  ;;  %v757_v2 = vpop.permute.xlu0 %756  ;;  %v254_v0 = vld [vmem:[%s7987_s0 + $0x788] sm:$0xff] }
 0x1c2   :  { %vm1200_vm3 = vcmp.eq.s32.totalorder %v5611_v8, %v760_v1  ;;  %vm1199_vm4 = vcmp.eq.s32.totalorder %v5611_v8, %v757_v2  ;;  %945 = vperm.xlu1 %5383, %v238_v62   ;;  %v2958_v3 = vpop.f32.mrf.mxu0  ;;  %942 = vperm.xlu0 %5382, %v237_v63   ;;  %v253_v1 = vld [vmem:[%s7987_s0 + $0x780] sm:$0xff] }
 0x1c3   :  { %v4351_v4 = vsel %vm1200_vm3, 1.0, %v5385_v13  ;;  %v4350_v5 = vsel %vm1199_vm4, 1.0, %v5385_v13  ;;  %3990 = vst.msk [vmem:[%s7989_s2 + $0x1f0] sm:$0xff] %vm3927_vm10, %v2958_v3 }
 0x1c4   :  { %v5078_v9 = vpop.f32.mrf.mxu0  ;;  %5223 = vmatprep.mubr.msk.f32.mxu1 %vm1813_vm0, %v4350_v5 }
 0x1c5   :  { %3993 = vst.msk [vmem:[%s7989_s2 + $0x208] sm:$0xff] %vm3927_vm10, %v5078_v9  ;;  %v766_v10 = vpop.permute.xlu1 %765  ;;  %5224 = vmatmul.mubr.msk.f32.gmra.mxu1 %vm1813_vm0, %v4351_v4  ;;  %v763_v11 = vpop.permute.xlu0 %762  ;;  %v256_v9 = vld [vmem:[%s7987_s0 + $0x798] sm:$0xff] }
 0x1c6   :  { %vm1202_vm5 = vcmp.eq.s32.totalorder %v5611_v8, %v766_v10  ;;  %vm1201_vm6 = vcmp.eq.s32.totalorder %v5611_v8, %v763_v11  ;;  %951 = vperm.xlu1 %5383, %v240_v6   ;;  %v2968_v12 = vpop.f32.mrf.mxu0  ;;  %948 = vperm.xlu0 %5382, %v239_v7   ;;  %v255_v10 = vld [vmem:[%s7987_s0 + $0x790] sm:$0xff] }
 0x1c7   :  { %v4353_v14 = vsel %vm1202_vm5, 1.0, %v5385_v13  ;;  %v4352_v15 = vsel %vm1201_vm6, 1.0, %v5385_v13  ;;  %3992 = vst.msk [vmem:[%s7989_s2 + $0x200] sm:$0xff] %vm3927_vm10, %v2968_v12 }
 0x1c8   :  { %v5081_v18 = vpop.f32.mrf.mxu0  ;;  %5226 = vmatprep.mubr.msk.f32.mxu1 %vm1813_vm0, %v4352_v15 }
 0x1c9   :  { %3995 = vst.msk [vmem:[%s7989_s2 + $0x218] sm:$0xff] %vm3927_vm10, %v5081_v18  ;;  %v772_v19 = vpop.permute.xlu1 %771  ;;  %5227 = vmatmul.mubr.msk.f32.gmra.mxu1 %vm1813_vm0, %v4353_v14  ;;  %v769_v20 = vpop.permute.xlu0 %768  ;;  %v258_v18 = vld [vmem:[%s7987_s0 + $0x7a8] sm:$0xff] }
 0x1ca   :  { %vm1204_vm7 = vcmp.eq.s32.totalorder %v5611_v8, %v772_v19  ;;  %vm1203_vm8 = vcmp.eq.s32.totalorder %v5611_v8, %v769_v20  ;;  %957 = vperm.xlu1 %5383, %v242_v16   ;;  %v2978_v21 = vpop.f32.mrf.mxu0  ;;  %954 = vperm.xlu0 %5382, %v241_v17   ;;  %v257_v19 = vld [vmem:[%s7987_s0 + $0x7a0] sm:$0xff] }
 0x1cb   :  { %v4355_v22 = vsel %vm1204_vm7, 1.0, %v5385_v13  ;;  %v4354_v23 = vsel %vm1203_vm8, 1.0, %v5385_v13  ;;  %3994 = vst.msk [vmem:[%s7989_s2 + $0x210] sm:$0xff] %vm3927_vm10, %v2978_v21 }
 0x1cc   :  { %v5084_v26 = vpop.f32.mrf.mxu0  ;;  %5229 = vmatprep.mubr.msk.f32.mxu1 %vm1813_vm0, %v4354_v23 }
 0x1cd   :  { %3997 = vst.msk [vmem:[%s7989_s2 + $0x228] sm:$0xff] %vm3927_vm10, %v5084_v26  ;;  %v778_v27 = vpop.permute.xlu1 %777  ;;  %5230 = vmatmul.mubr.msk.f32.gmra.mxu1 %vm1813_vm0, %v4355_v22  ;;  %v775_v28 = vpop.permute.xlu0 %774  ;;  %v260_v26 = vld [vmem:[%s7987_s0 + $0x7b8] sm:$0xff] }
 0x1ce   :  { %vm1206_vm9 = vcmp.eq.s32.totalorder %v5611_v8, %v778_v27  ;;  %vm1205_vm11 = vcmp.eq.s32.totalorder %v5611_v8, %v775_v28  ;;  %963 = vperm.xlu1 %5383, %v244_v24   ;;  %v2988_v29 = vpop.f32.mrf.mxu0  ;;  %960 = vperm.xlu0 %5382, %v243_v25   ;;  %v259_v27 = vld [vmem:[%s7987_s0 + $0x7b0] sm:$0xff] }
 0x1cf   :  { %v4357_v30 = vsel %vm1206_vm9, 1.0, %v5385_v13  ;;  %v4356_v31 = vsel %vm1205_vm11, 1.0, %v5385_v13  ;;  %3996 = vst.msk [vmem:[%s7989_s2 + $0x220] sm:$0xff] %vm3927_vm10, %v2988_v29 }
 0x1d0   :  { %v5087_v34 = vpop.f32.mrf.mxu0  ;;  %5232 = vmatprep.mubr.msk.f32.mxu1 %vm1813_vm0, %v4356_v31 }
 0x1d1   :  { %3999 = vst.msk [vmem:[%s7989_s2 + $0x238] sm:$0xff] %vm3927_vm10, %v5087_v34  ;;  %v784_v35 = vpop.permute.xlu1 %783  ;;  %5233 = vmatmul.mubr.msk.f32.gmra.mxu1 %vm1813_vm0, %v4357_v30  ;;  %v781_v36 = vpop.permute.xlu0 %780  ;;  %v262_v34 = vld [vmem:[%s7987_s0 + $0x7c8] sm:$0xff] }
 0x1d2   :  { %vm1208_vm12 = vcmp.eq.s32.totalorder %v5611_v8, %v784_v35  ;;  %vm1207_vm13 = vcmp.eq.s32.totalorder %v5611_v8, %v781_v36  ;;  %969 = vperm.xlu1 %5383, %v246_v32   ;;  %v2998_v37 = vpop.f32.mrf.mxu0  ;;  %966 = vperm.xlu0 %5382, %v245_v33   ;;  %v261_v35 = vld [vmem:[%s7987_s0 + $0x7c0] sm:$0xff] }
 0x1d3   :  { %v4359_v38 = vsel %vm1208_vm12, 1.0, %v5385_v13  ;;  %v4358_v39 = vsel %vm1207_vm13, 1.0, %v5385_v13  ;;  %3998 = vst.msk [vmem:[%s7989_s2 + $0x230] sm:$0xff] %vm3927_vm10, %v2998_v37 }
 0x1d4   :  { %v5090_v42 = vpop.f32.mrf.mxu0  ;;  %5235 = vmatprep.mubr.msk.f32.mxu1 %vm1813_vm0, %v4358_v39 }
 0x1d5   :  { %4001 = vst.msk [vmem:[%s7989_s2 + $0x248] sm:$0xff] %vm3927_vm10, %v5090_v42  ;;  %v790_v43 = vpop.permute.xlu1 %789  ;;  %5236 = vmatmul.mubr.msk.f32.gmra.mxu1 %vm1813_vm0, %v4359_v38  ;;  %v787_v44 = vpop.permute.xlu0 %786  ;;  %v264_v42 = vld [vmem:[%s7987_s0 + $0x7d8] sm:$0xff] }
 0x1d6   :  { %vm1210_vm14 = vcmp.eq.s32.totalorder %v5611_v8, %v790_v43  ;;  %vm1209_vm15 = vcmp.eq.s32.totalorder %v5611_v8, %v787_v44  ;;  %975 = vperm.xlu1 %5383, %v248_v40   ;;  %v3008_v45 = vpop.f32.mrf.mxu0  ;;  %972 = vperm.xlu0 %5382, %v247_v41   ;;  %v263_v43 = vld [vmem:[%s7987_s0 + $0x7d0] sm:$0xff] }
 0x1d7   :  { %v4361_v46 = vsel %vm1210_vm14, 1.0, %v5385_v13  ;;  %v4360_v47 = vsel %vm1209_vm15, 1.0, %v5385_v13  ;;  %4000 = vst.msk [vmem:[%s7989_s2 + $0x240] sm:$0xff] %vm3927_vm10, %v3008_v45 }
 0x1d8   :  { %v5093_v50 = vpop.f32.mrf.mxu0  ;;  %5238 = vmatprep.mubr.msk.f32.mxu1 %vm1813_vm0, %v4360_v47 }
 0x1d9   :  { %4003 = vst.msk [vmem:[%s7989_s2 + $0x258] sm:$0xff] %vm3927_vm10, %v5093_v50  ;;  %v796_v51 = vpop.permute.xlu1 %795  ;;  %5239 = vmatmul.mubr.msk.f32.gmra.mxu1 %vm1813_vm0, %v4361_v46  ;;  %v793_v52 = vpop.permute.xlu0 %792  ;;  %v266_v50 = vld [vmem:[%s7987_s0 + $0x7e8] sm:$0xff] }
 0x1da   :  { %vm1212_vm1 = vcmp.eq.s32.totalorder %v5611_v8, %v796_v51  ;;  %vm1211_vm2 = vcmp.eq.s32.totalorder %v5611_v8, %v793_v52  ;;  %981 = vperm.xlu1 %5383, %v250_v48   ;;  %v3018_v53 = vpop.f32.mrf.mxu0  ;;  %978 = vperm.xlu0 %5382, %v249_v49   ;;  %v265_v51 = vld [vmem:[%s7987_s0 + $0x7e0] sm:$0xff] }
 0x1db   :  { %v4363_v54 = vsel %vm1212_vm1, 1.0, %v5385_v13  ;;  %v4362_v55 = vsel %vm1211_vm2, 1.0, %v5385_v13  ;;  %4002 = vst.msk [vmem:[%s7989_s2 + $0x250] sm:$0xff] %vm3927_vm10, %v3018_v53 }
 0x1dc   :  { %v5096_v58 = vpop.f32.mrf.mxu0  ;;  %5241 = vmatprep.mubr.msk.f32.mxu1 %vm1813_vm0, %v4362_v55 }
 0x1dd   :  { %4005 = vst.msk [vmem:[%s7989_s2 + $0x268] sm:$0xff] %vm3927_vm10, %v5096_v58  ;;  %v802_v59 = vpop.permute.xlu1 %801  ;;  %5242 = vmatmul.mubr.msk.f32.gmra.mxu1 %vm1813_vm0, %v4363_v54  ;;  %v799_v60 = vpop.permute.xlu0 %798  ;;  %v268_v58 = vld [vmem:[%s7987_s0 + $0x7f8] sm:$0xff] }
 0x1de   :  { %vm1214_vm3 = vcmp.eq.s32.totalorder %v5611_v8, %v802_v59  ;;  %vm1213_vm4 = vcmp.eq.s32.totalorder %v5611_v8, %v799_v60  ;;  %987 = vperm.xlu1 %5383, %v252_v56   ;;  %v3028_v61 = vpop.f32.mrf.mxu0  ;;  %984 = vperm.xlu0 %5382, %v251_v57   ;;  %v267_v59 = vld [vmem:[%s7987_s0 + $0x7f0] sm:$0xff] }
 0x1df   :  { %v4365_v62 = vsel %vm1214_vm3, 1.0, %v5385_v13  ;;  %v4364_v63 = vsel %vm1213_vm4, 1.0, %v5385_v13  ;;  %4004 = vst.msk [vmem:[%s7989_s2 + $0x260] sm:$0xff] %vm3927_vm10, %v3028_v61 }
 0x1e0   :  { %v5099_v2 = vpop.f32.mrf.mxu0  ;;  %5244 = vmatprep.mubr.msk.f32.mxu1 %vm1813_vm0, %v4364_v63 }
 0x1e1   :  { %4007 = vst.msk [vmem:[%s7989_s2 + $0x278] sm:$0xff] %vm3927_vm10, %v5099_v2  ;;  %v808_v3 = vpop.permute.xlu1 %807  ;;  %5245 = vmatmul.mubr.msk.f32.gmra.mxu1 %vm1813_vm0, %v4365_v62  ;;  %v805_v4 = vpop.permute.xlu0 %804 }
 0x1e2   :  { %vm1216_vm5 = vcmp.eq.s32.totalorder %v5611_v8, %v808_v3  ;;  %vm1215_vm6 = vcmp.eq.s32.totalorder %v5611_v8, %v805_v4  ;;  %993 = vperm.xlu1 %5383, %v254_v0   ;;  %v3038_v5 = vpop.f32.mrf.mxu0  ;;  %990 = vperm.xlu0 %5382, %v253_v1  }
 0x1e3   :  { %v4367_v6 = vsel %vm1216_vm5, 1.0, %v5385_v13  ;;  %v4366_v7 = vsel %vm1215_vm6, 1.0, %v5385_v13  ;;  %4006 = vst.msk [vmem:[%s7989_s2 + $0x270] sm:$0xff] %vm3927_vm10, %v3038_v5 }
 0x1e4   :  { %v5102_v11 = vpop.f32.mrf.mxu0  ;;  %5247 = vmatprep.mubr.msk.f32.mxu1 %vm1813_vm0, %v4366_v7 }
 0x1e5   :  { %4009 = vst.msk [vmem:[%s7989_s2 + $0x288] sm:$0xff] %vm3927_vm10, %v5102_v11  ;;  %v814_v12 = vpop.permute.xlu1 %813  ;;  %5248 = vmatmul.mubr.msk.f32.gmra.mxu1 %vm1813_vm0, %v4367_v6  ;;  %v811_v14 = vpop.permute.xlu0 %810 }
 0x1e6   :  { %vm1218_vm7 = vcmp.eq.s32.totalorder %v5611_v8, %v814_v12  ;;  %vm1217_vm8 = vcmp.eq.s32.totalorder %v5611_v8, %v811_v14  ;;  %999 = vperm.xlu1 %5383, %v256_v9   ;;  %v3048_v15 = vpop.f32.mrf.mxu0  ;;  %996 = vperm.xlu0 %5382, %v255_v10  }
 0x1e7   :  { %v4369_v16 = vsel %vm1218_vm7, 1.0, %v5385_v13  ;;  %v4368_v17 = vsel %vm1217_vm8, 1.0, %v5385_v13  ;;  %4008 = vst.msk [vmem:[%s7989_s2 + $0x280] sm:$0xff] %vm3927_vm10, %v3048_v15 }
 0x1e8   :  { %v5105_v20 = vpop.f32.mrf.mxu0  ;;  %5250 = vmatprep.mubr.msk.f32.mxu1 %vm1813_vm0, %v4368_v17 }
 0x1e9   :  { %4011 = vst.msk [vmem:[%s7989_s2 + $0x298] sm:$0xff] %vm3927_vm10, %v5105_v20  ;;  %v820_v21 = vpop.permute.xlu1 %819  ;;  %5251 = vmatmul.mubr.msk.f32.gmra.mxu1 %vm1813_vm0, %v4369_v16  ;;  %v817_v22 = vpop.permute.xlu0 %816 }
 0x1ea   :  { %vm1220_vm9 = vcmp.eq.s32.totalorder %v5611_v8, %v820_v21  ;;  %vm1219_vm11 = vcmp.eq.s32.totalorder %v5611_v8, %v817_v22  ;;  %1005 = vperm.xlu1 %5383, %v258_v18   ;;  %v3058_v23 = vpop.f32.mrf.mxu0  ;;  %1002 = vperm.xlu0 %5382, %v257_v19  }
 0x1eb   :  { %v4371_v24 = vsel %vm1220_vm9, 1.0, %v5385_v13  ;;  %v4370_v25 = vsel %vm1219_vm11, 1.0, %v5385_v13  ;;  %4010 = vst.msk [vmem:[%s7989_s2 + $0x290] sm:$0xff] %vm3927_vm10, %v3058_v23 }
 0x1ec   :  { %v5108_v28 = vpop.f32.mrf.mxu0  ;;  %5253 = vmatprep.mubr.msk.f32.mxu1 %vm1813_vm0, %v4370_v25 }
 0x1ed   :  { %4013 = vst.msk [vmem:[%s7989_s2 + $0x2a8] sm:$0xff] %vm3927_vm10, %v5108_v28  ;;  %v826_v29 = vpop.permute.xlu1 %825  ;;  %5254 = vmatmul.mubr.msk.f32.gmra.mxu1 %vm1813_vm0, %v4371_v24  ;;  %v823_v30 = vpop.permute.xlu0 %822 }
 0x1ee   :  { %vm1222_vm12 = vcmp.eq.s32.totalorder %v5611_v8, %v826_v29  ;;  %vm1221_vm13 = vcmp.eq.s32.totalorder %v5611_v8, %v823_v30  ;;  %1011 = vperm.xlu1 %5383, %v260_v26   ;;  %v3068_v31 = vpop.f32.mrf.mxu0  ;;  %1008 = vperm.xlu0 %5382, %v259_v27  }
 0x1ef   :  { %v4373_v32 = vsel %vm1222_vm12, 1.0, %v5385_v13  ;;  %v4372_v33 = vsel %vm1221_vm13, 1.0, %v5385_v13  ;;  %4012 = vst.msk [vmem:[%s7989_s2 + $0x2a0] sm:$0xff] %vm3927_vm10, %v3068_v31 }
 0x1f0   :  { %v5111_v36 = vpop.f32.mrf.mxu0  ;;  %5256 = vmatprep.mubr.msk.f32.mxu1 %vm1813_vm0, %v4372_v33 }
 0x1f1   :  { %4015 = vst.msk [vmem:[%s7989_s2 + $0x2b8] sm:$0xff] %vm3927_vm10, %v5111_v36  ;;  %v832_v37 = vpop.permute.xlu1 %831  ;;  %5257 = vmatmul.mubr.msk.f32.gmra.mxu1 %vm1813_vm0, %v4373_v32  ;;  %v829_v38 = vpop.permute.xlu0 %828 }
 0x1f2   :  { %vm1224_vm14 = vcmp.eq.s32.totalorder %v5611_v8, %v832_v37  ;;  %vm1223_vm15 = vcmp.eq.s32.totalorder %v5611_v8, %v829_v38  ;;  %1017 = vperm.xlu1 %5383, %v262_v34   ;;  %v3078_v39 = vpop.f32.mrf.mxu0  ;;  %1014 = vperm.xlu0 %5382, %v261_v35  }
 0x1f3   :  { %v4375_v40 = vsel %vm1224_vm14, 1.0, %v5385_v13  ;;  %v4374_v41 = vsel %vm1223_vm15, 1.0, %v5385_v13  ;;  %4014 = vst.msk [vmem:[%s7989_s2 + $0x2b0] sm:$0xff] %vm3927_vm10, %v3078_v39 }
 0x1f4   :  { %v5114_v44 = vpop.f32.mrf.mxu0  ;;  %5259 = vmatprep.mubr.msk.f32.mxu1 %vm1813_vm0, %v4374_v41 }
 0x1f5   :  { %4017 = vst.msk [vmem:[%s7989_s2 + $0x2c8] sm:$0xff] %vm3927_vm10, %v5114_v44  ;;  %v838_v45 = vpop.permute.xlu1 %837  ;;  %5260 = vmatmul.mubr.msk.f32.gmra.mxu1 %vm1813_vm0, %v4375_v40  ;;  %v835_v46 = vpop.permute.xlu0 %834 }
 0x1f6   :  { %vm1226_vm1 = vcmp.eq.s32.totalorder %v5611_v8, %v838_v45  ;;  %vm1225_vm2 = vcmp.eq.s32.totalorder %v5611_v8, %v835_v46  ;;  %1023 = vperm.xlu1 %5383, %v264_v42   ;;  %v3088_v47 = vpop.f32.mrf.mxu0  ;;  %1020 = vperm.xlu0 %5382, %v263_v43  }
 0x1f7   :  { %v4377_v48 = vsel %vm1226_vm1, 1.0, %v5385_v13  ;;  %v4376_v49 = vsel %vm1225_vm2, 1.0, %v5385_v13  ;;  %4016 = vst.msk [vmem:[%s7989_s2 + $0x2c0] sm:$0xff] %vm3927_vm10, %v3088_v47 }
 0x1f8   :  { %v5117_v52 = vpop.f32.mrf.mxu0  ;;  %5262 = vmatprep.mubr.msk.f32.mxu1 %vm1813_vm0, %v4376_v49 }
 0x1f9   :  { %4019 = vst.msk [vmem:[%s7989_s2 + $0x2d8] sm:$0xff] %vm3927_vm10, %v5117_v52  ;;  %v844_v53 = vpop.permute.xlu1 %843  ;;  %5263 = vmatmul.mubr.msk.f32.gmra.mxu1 %vm1813_vm0, %v4377_v48  ;;  %v841_v54 = vpop.permute.xlu0 %840 }
 0x1fa   :  { %vm1228_vm3 = vcmp.eq.s32.totalorder %v5611_v8, %v844_v53  ;;  %vm1227_vm4 = vcmp.eq.s32.totalorder %v5611_v8, %v841_v54  ;;  %1029 = vperm.xlu1 %5383, %v266_v50   ;;  %v3098_v55 = vpop.f32.mrf.mxu0  ;;  %1026 = vperm.xlu0 %5382, %v265_v51  }
 0x1fb   :  { %v4379_v56 = vsel %vm1228_vm3, 1.0, %v5385_v13  ;;  %v4378_v57 = vsel %vm1227_vm4, 1.0, %v5385_v13  ;;  %4018 = vst.msk [vmem:[%s7989_s2 + $0x2d0] sm:$0xff] %vm3927_vm10, %v3098_v55 }
 0x1fc   :  { %v5120_v60 = vpop.f32.mrf.mxu0  ;;  %5265 = vmatprep.mubr.msk.f32.mxu1 %vm1813_vm0, %v4378_v57 }
 0x1fd   :  { %4021 = vst.msk [vmem:[%s7989_s2 + $0x2e8] sm:$0xff] %vm3927_vm10, %v5120_v60  ;;  %v850_v61 = vpop.permute.xlu1 %849  ;;  %5266 = vmatmul.mubr.msk.f32.gmra.mxu1 %vm1813_vm0, %v4379_v56  ;;  %v847_v62 = vpop.permute.xlu0 %846 }
 0x1fe   :  { %vm1230_vm5 = vcmp.eq.s32.totalorder %v5611_v8, %v850_v61  ;;  %vm1229_vm6 = vcmp.eq.s32.totalorder %v5611_v8, %v847_v62  ;;  %1035 = vperm.xlu1 %5383, %v268_v58   ;;  %v3108_v63 = vpop.f32.mrf.mxu0  ;;  %1032 = vperm.xlu0 %5382, %v267_v59  }
 0x1ff   :  { %v4381_v0 = vsel %vm1230_vm5, 1.0, %v5385_v13  ;;  %v4380_v1 = vsel %vm1229_vm6, 1.0, %v5385_v13  ;;  %4020 = vst.msk [vmem:[%s7989_s2 + $0x2e0] sm:$0xff] %vm3927_vm10, %v3108_v63 }
 0x200   :  { %v5123_v2 = vpop.f32.mrf.mxu0  ;;  %5268 = vmatprep.mubr.msk.f32.mxu1 %vm1813_vm0, %v4380_v1 }
 0x201   :  { %4023 = vst.msk [vmem:[%s7989_s2 + $0x2f8] sm:$0xff] %vm3927_vm10, %v5123_v2  ;;  %v856_v3 = vpop.permute.xlu1 %855  ;;  %5269 = vmatmul.mubr.msk.f32.gmra.mxu1 %vm1813_vm0, %v4381_v0  ;;  %v853_v4 = vpop.permute.xlu0 %852 }
 0x202   :  { %vm1232_vm7 = vcmp.eq.s32.totalorder %v5611_v8, %v856_v3  ;;  %vm1231_vm8 = vcmp.eq.s32.totalorder %v5611_v8, %v853_v4  ;;  %v3118_v5 = vpop.f32.mrf.mxu0 }
 0x203   :  { %v4383_v6 = vsel %vm1232_vm7, 1.0, %v5385_v13  ;;  %v4382_v7 = vsel %vm1231_vm8, 1.0, %v5385_v13  ;;  %4022 = vst.msk [vmem:[%s7989_s2 + $0x2f0] sm:$0xff] %vm3927_vm10, %v3118_v5 }
 0x204   :  { %v5126_v9 = vpop.f32.mrf.mxu0  ;;  %5271 = vmatprep.mubr.msk.f32.mxu1 %vm1813_vm0, %v4382_v7 }
 0x205   :  { %4025 = vst.msk [vmem:[%s7989_s2 + $0x308] sm:$0xff] %vm3927_vm10, %v5126_v9  ;;  %v862_v10 = vpop.permute.xlu1 %861  ;;  %5272 = vmatmul.mubr.msk.f32.gmra.mxu1 %vm1813_vm0, %v4383_v6  ;;  %v859_v11 = vpop.permute.xlu0 %858 }
 0x206   :  { %vm1234_vm9 = vcmp.eq.s32.totalorder %v5611_v8, %v862_v10  ;;  %vm1233_vm11 = vcmp.eq.s32.totalorder %v5611_v8, %v859_v11  ;;  %v3128_v12 = vpop.f32.mrf.mxu0 }
 0x207   :  { %v4385_v14 = vsel %vm1234_vm9, 1.0, %v5385_v13  ;;  %v4384_v15 = vsel %vm1233_vm11, 1.0, %v5385_v13  ;;  %4024 = vst.msk [vmem:[%s7989_s2 + $0x300] sm:$0xff] %vm3927_vm10, %v3128_v12 }
 0x208   :  { %v5129_v16 = vpop.f32.mrf.mxu0  ;;  %5274 = vmatprep.mubr.msk.f32.mxu1 %vm1813_vm0, %v4384_v15 }
 0x209   :  { %4027 = vst.msk [vmem:[%s7989_s2 + $0x318] sm:$0xff] %vm3927_vm10, %v5129_v16  ;;  %v868_v17 = vpop.permute.xlu1 %867  ;;  %5275 = vmatmul.mubr.msk.f32.gmra.mxu1 %vm1813_vm0, %v4385_v14  ;;  %v865_v18 = vpop.permute.xlu0 %864 }
 0x20a   :  { %vm1236_vm12 = vcmp.eq.s32.totalorder %v5611_v8, %v868_v17  ;;  %vm1235_vm13 = vcmp.eq.s32.totalorder %v5611_v8, %v865_v18  ;;  %v3138_v19 = vpop.f32.mrf.mxu0 }
 0x20b   :  { %v4387_v20 = vsel %vm1236_vm12, 1.0, %v5385_v13  ;;  %v4386_v21 = vsel %vm1235_vm13, 1.0, %v5385_v13  ;;  %4026 = vst.msk [vmem:[%s7989_s2 + $0x310] sm:$0xff] %vm3927_vm10, %v3138_v19 }
 0x20c   :  { %v5132_v22 = vpop.f32.mrf.mxu0  ;;  %5277 = vmatprep.mubr.msk.f32.mxu1 %vm1813_vm0, %v4386_v21 }
 0x20d   :  { %4029 = vst.msk [vmem:[%s7989_s2 + $0x328] sm:$0xff] %vm3927_vm10, %v5132_v22  ;;  %v874_v23 = vpop.permute.xlu1 %873  ;;  %5278 = vmatmul.mubr.msk.f32.gmra.mxu1 %vm1813_vm0, %v4387_v20  ;;  %v871_v24 = vpop.permute.xlu0 %870 }
 0x20e   :  { %vm1238_vm14 = vcmp.eq.s32.totalorder %v5611_v8, %v874_v23  ;;  %vm1237_vm15 = vcmp.eq.s32.totalorder %v5611_v8, %v871_v24  ;;  %v3148_v25 = vpop.f32.mrf.mxu0 }
 0x20f   :  { %v4389_v26 = vsel %vm1238_vm14, 1.0, %v5385_v13  ;;  %v4388_v27 = vsel %vm1237_vm15, 1.0, %v5385_v13  ;;  %4028 = vst.msk [vmem:[%s7989_s2 + $0x320] sm:$0xff] %vm3927_vm10, %v3148_v25 }
 0x210   :  { %v5135_v28 = vpop.f32.mrf.mxu0  ;;  %5280 = vmatprep.mubr.msk.f32.mxu1 %vm1813_vm0, %v4388_v27 }
 0x211   :  { %4031 = vst.msk [vmem:[%s7989_s2 + $0x338] sm:$0xff] %vm3927_vm10, %v5135_v28  ;;  %v880_v29 = vpop.permute.xlu1 %879  ;;  %5281 = vmatmul.mubr.msk.f32.gmra.mxu1 %vm1813_vm0, %v4389_v26  ;;  %v877_v30 = vpop.permute.xlu0 %876 }
 0x212   :  { %vm1240_vm1 = vcmp.eq.s32.totalorder %v5611_v8, %v880_v29  ;;  %vm1239_vm2 = vcmp.eq.s32.totalorder %v5611_v8, %v877_v30  ;;  %v3158_v31 = vpop.f32.mrf.mxu0 }
 0x213   :  { %v4391_v32 = vsel %vm1240_vm1, 1.0, %v5385_v13  ;;  %v4390_v33 = vsel %vm1239_vm2, 1.0, %v5385_v13  ;;  %4030 = vst.msk [vmem:[%s7989_s2 + $0x330] sm:$0xff] %vm3927_vm10, %v3158_v31 }
 0x214   :  { %v5138_v34 = vpop.f32.mrf.mxu0  ;;  %5283 = vmatprep.mubr.msk.f32.mxu1 %vm1813_vm0, %v4390_v33 }
 0x215   :  { %4033 = vst.msk [vmem:[%s7989_s2 + $0x348] sm:$0xff] %vm3927_vm10, %v5138_v34  ;;  %v886_v35 = vpop.permute.xlu1 %885  ;;  %5284 = vmatmul.mubr.msk.f32.gmra.mxu1 %vm1813_vm0, %v4391_v32  ;;  %v883_v36 = vpop.permute.xlu0 %882 }
 0x216   :  { %vm1242_vm3 = vcmp.eq.s32.totalorder %v5611_v8, %v886_v35  ;;  %vm1241_vm4 = vcmp.eq.s32.totalorder %v5611_v8, %v883_v36  ;;  %v3168_v37 = vpop.f32.mrf.mxu0 }
 0x217   :  { %v4393_v38 = vsel %vm1242_vm3, 1.0, %v5385_v13  ;;  %v4392_v39 = vsel %vm1241_vm4, 1.0, %v5385_v13  ;;  %4032 = vst.msk [vmem:[%s7989_s2 + $0x340] sm:$0xff] %vm3927_vm10, %v3168_v37 }
 0x218   :  { %v5141_v40 = vpop.f32.mrf.mxu0  ;;  %5286 = vmatprep.mubr.msk.f32.mxu1 %vm1813_vm0, %v4392_v39 }
 0x219   :  { %4035 = vst.msk [vmem:[%s7989_s2 + $0x358] sm:$0xff] %vm3927_vm10, %v5141_v40  ;;  %v892_v41 = vpop.permute.xlu1 %891  ;;  %5287 = vmatmul.mubr.msk.f32.gmra.mxu1 %vm1813_vm0, %v4393_v38  ;;  %v889_v42 = vpop.permute.xlu0 %888 }
 0x21a   :  { %vm1244_vm5 = vcmp.eq.s32.totalorder %v5611_v8, %v892_v41  ;;  %vm1243_vm6 = vcmp.eq.s32.totalorder %v5611_v8, %v889_v42  ;;  %v3178_v43 = vpop.f32.mrf.mxu0 }
 0x21b   :  { %v4395_v44 = vsel %vm1244_vm5, 1.0, %v5385_v13  ;;  %v4394_v45 = vsel %vm1243_vm6, 1.0, %v5385_v13  ;;  %4034 = vst.msk [vmem:[%s7989_s2 + $0x350] sm:$0xff] %vm3927_vm10, %v3178_v43 }
 0x21c   :  { %v5144_v46 = vpop.f32.mrf.mxu0  ;;  %5289 = vmatprep.mubr.msk.f32.mxu1 %vm1813_vm0, %v4394_v45 }
 0x21d   :  { %4037 = vst.msk [vmem:[%s7989_s2 + $0x368] sm:$0xff] %vm3927_vm10, %v5144_v46  ;;  %v898_v47 = vpop.permute.xlu1 %897  ;;  %5290 = vmatmul.mubr.msk.f32.gmra.mxu1 %vm1813_vm0, %v4395_v44  ;;  %v895_v48 = vpop.permute.xlu0 %894 }
 0x21e   :  { %vm1246_vm7 = vcmp.eq.s32.totalorder %v5611_v8, %v898_v47  ;;  %vm1245_vm8 = vcmp.eq.s32.totalorder %v5611_v8, %v895_v48  ;;  %v3188_v49 = vpop.f32.mrf.mxu0 }
 0x21f   :  { %v4397_v50 = vsel %vm1246_vm7, 1.0, %v5385_v13  ;;  %v4396_v51 = vsel %vm1245_vm8, 1.0, %v5385_v13  ;;  %4036 = vst.msk [vmem:[%s7989_s2 + $0x360] sm:$0xff] %vm3927_vm10, %v3188_v49 }
 0x220   :  { %v5147_v52 = vpop.f32.mrf.mxu0  ;;  %5292 = vmatprep.mubr.msk.f32.mxu1 %vm1813_vm0, %v4396_v51 }
 0x221   :  { %4039 = vst.msk [vmem:[%s7989_s2 + $0x378] sm:$0xff] %vm3927_vm10, %v5147_v52  ;;  %v904_v53 = vpop.permute.xlu1 %903  ;;  %5293 = vmatmul.mubr.msk.f32.gmra.mxu1 %vm1813_vm0, %v4397_v50  ;;  %v901_v54 = vpop.permute.xlu0 %900 }
 0x222   :  { %vm1248_vm9 = vcmp.eq.s32.totalorder %v5611_v8, %v904_v53  ;;  %vm1247_vm11 = vcmp.eq.s32.totalorder %v5611_v8, %v901_v54  ;;  %v3198_v55 = vpop.f32.mrf.mxu0 }
 0x223   :  { %v4399_v56 = vsel %vm1248_vm9, 1.0, %v5385_v13  ;;  %v4398_v57 = vsel %vm1247_vm11, 1.0, %v5385_v13  ;;  %4038 = vst.msk [vmem:[%s7989_s2 + $0x370] sm:$0xff] %vm3927_vm10, %v3198_v55 }
 0x224   :  { %v5150_v58 = vpop.f32.mrf.mxu0  ;;  %5295 = vmatprep.mubr.msk.f32.mxu1 %vm1813_vm0, %v4398_v57 }
 0x225   :  { %4041 = vst.msk [vmem:[%s7989_s2 + $0x388] sm:$0xff] %vm3927_vm10, %v5150_v58  ;;  %v910_v59 = vpop.permute.xlu1 %909  ;;  %5296 = vmatmul.mubr.msk.f32.gmra.mxu1 %vm1813_vm0, %v4399_v56  ;;  %v907_v60 = vpop.permute.xlu0 %906 }
 0x226   :  { %vm1250_vm12 = vcmp.eq.s32.totalorder %v5611_v8, %v910_v59  ;;  %vm1249_vm13 = vcmp.eq.s32.totalorder %v5611_v8, %v907_v60  ;;  %v3208_v61 = vpop.f32.mrf.mxu0 }
 0x227   :  { %v4401_v62 = vsel %vm1250_vm12, 1.0, %v5385_v13  ;;  %v4400_v63 = vsel %vm1249_vm13, 1.0, %v5385_v13  ;;  %4040 = vst.msk [vmem:[%s7989_s2 + $0x380] sm:$0xff] %vm3927_vm10, %v3208_v61 }
 0x228   :  { %v5153_v0 = vpop.f32.mrf.mxu0  ;;  %5298 = vmatprep.mubr.msk.f32.mxu1 %vm1813_vm0, %v4400_v63 }
 0x229   :  { %4043 = vst.msk [vmem:[%s7989_s2 + $0x398] sm:$0xff] %vm3927_vm10, %v5153_v0  ;;  %v916_v1 = vpop.permute.xlu1 %915  ;;  %5299 = vmatmul.mubr.msk.f32.gmra.mxu1 %vm1813_vm0, %v4401_v62  ;;  %v913_v2 = vpop.permute.xlu0 %912 }
 0x22a   :  { %vm1252_vm14 = vcmp.eq.s32.totalorder %v5611_v8, %v916_v1  ;;  %vm1251_vm15 = vcmp.eq.s32.totalorder %v5611_v8, %v913_v2  ;;  %v3218_v3 = vpop.f32.mrf.mxu0 }
 0x22b   :  { %v4403_v4 = vsel %vm1252_vm14, 1.0, %v5385_v13  ;;  %v4402_v5 = vsel %vm1251_vm15, 1.0, %v5385_v13  ;;  %4042 = vst.msk [vmem:[%s7989_s2 + $0x390] sm:$0xff] %vm3927_vm10, %v3218_v3 }
 0x22c   :  { %v5156_v6 = vpop.f32.mrf.mxu0  ;;  %5301 = vmatprep.mubr.msk.f32.mxu1 %vm1813_vm0, %v4402_v5 }
 0x22d   :  { %4045 = vst.msk [vmem:[%s7989_s2 + $0x3a8] sm:$0xff] %vm3927_vm10, %v5156_v6  ;;  %v922_v7 = vpop.permute.xlu1 %921  ;;  %5302 = vmatmul.mubr.msk.f32.gmra.mxu1 %vm1813_vm0, %v4403_v4  ;;  %v919_v9 = vpop.permute.xlu0 %918 }
 0x22e   :  { %vm1254_vm1 = vcmp.eq.s32.totalorder %v5611_v8, %v922_v7  ;;  %vm1253_vm2 = vcmp.eq.s32.totalorder %v5611_v8, %v919_v9  ;;  %v3228_v10 = vpop.f32.mrf.mxu0 }
 0x22f   :  { %v4405_v11 = vsel %vm1254_vm1, 1.0, %v5385_v13  ;;  %v4404_v12 = vsel %vm1253_vm2, 1.0, %v5385_v13  ;;  %4044 = vst.msk [vmem:[%s7989_s2 + $0x3a0] sm:$0xff] %vm3927_vm10, %v3228_v10 }
 0x230   :  { %v5159_v14 = vpop.f32.mrf.mxu0  ;;  %5304 = vmatprep.mubr.msk.f32.mxu1 %vm1813_vm0, %v4404_v12 }
 0x231   :  { %4047 = vst.msk [vmem:[%s7989_s2 + $0x3b8] sm:$0xff] %vm3927_vm10, %v5159_v14  ;;  %v928_v15 = vpop.permute.xlu1 %927  ;;  %5305 = vmatmul.mubr.msk.f32.gmra.mxu1 %vm1813_vm0, %v4405_v11  ;;  %v925_v16 = vpop.permute.xlu0 %924 }
 0x232   :  { %vm1256_vm3 = vcmp.eq.s32.totalorder %v5611_v8, %v928_v15  ;;  %vm1255_vm4 = vcmp.eq.s32.totalorder %v5611_v8, %v925_v16  ;;  %v3238_v17 = vpop.f32.mrf.mxu0 }
 0x233   :  { %v4407_v18 = vsel %vm1256_vm3, 1.0, %v5385_v13  ;;  %v4406_v19 = vsel %vm1255_vm4, 1.0, %v5385_v13  ;;  %4046 = vst.msk [vmem:[%s7989_s2 + $0x3b0] sm:$0xff] %vm3927_vm10, %v3238_v17 }
 0x234   :  { %v5162_v20 = vpop.f32.mrf.mxu0  ;;  %5307 = vmatprep.mubr.msk.f32.mxu1 %vm1813_vm0, %v4406_v19 }
 0x235   :  { %4049 = vst.msk [vmem:[%s7989_s2 + $0x3c8] sm:$0xff] %vm3927_vm10, %v5162_v20  ;;  %v934_v21 = vpop.permute.xlu1 %933  ;;  %5308 = vmatmul.mubr.msk.f32.gmra.mxu1 %vm1813_vm0, %v4407_v18  ;;  %v931_v22 = vpop.permute.xlu0 %930 }
 0x236   :  { %vm1258_vm5 = vcmp.eq.s32.totalorder %v5611_v8, %v934_v21  ;;  %vm1257_vm6 = vcmp.eq.s32.totalorder %v5611_v8, %v931_v22  ;;  %v3248_v23 = vpop.f32.mrf.mxu0 }
 0x237   :  { %v4409_v24 = vsel %vm1258_vm5, 1.0, %v5385_v13  ;;  %v4408_v25 = vsel %vm1257_vm6, 1.0, %v5385_v13  ;;  %4048 = vst.msk [vmem:[%s7989_s2 + $0x3c0] sm:$0xff] %vm3927_vm10, %v3248_v23 }
 0x238   :  { %v5165_v26 = vpop.f32.mrf.mxu0  ;;  %5310 = vmatprep.mubr.msk.f32.mxu1 %vm1813_vm0, %v4408_v25 }
 0x239   :  { %4051 = vst.msk [vmem:[%s7989_s2 + $0x3d8] sm:$0xff] %vm3927_vm10, %v5165_v26  ;;  %v940_v27 = vpop.permute.xlu1 %939  ;;  %5311 = vmatmul.mubr.msk.f32.gmra.mxu1 %vm1813_vm0, %v4409_v24  ;;  %v937_v28 = vpop.permute.xlu0 %936 }
 0x23a   :  { %vm1260_vm7 = vcmp.eq.s32.totalorder %v5611_v8, %v940_v27  ;;  %vm1259_vm8 = vcmp.eq.s32.totalorder %v5611_v8, %v937_v28  ;;  %v3258_v29 = vpop.f32.mrf.mxu0 }
 0x23b   :  { %v4411_v30 = vsel %vm1260_vm7, 1.0, %v5385_v13  ;;  %v4410_v31 = vsel %vm1259_vm8, 1.0, %v5385_v13  ;;  %4050 = vst.msk [vmem:[%s7989_s2 + $0x3d0] sm:$0xff] %vm3927_vm10, %v3258_v29 }
 0x23c   :  { %v5168_v32 = vpop.f32.mrf.mxu0  ;;  %5313 = vmatprep.mubr.msk.f32.mxu1 %vm1813_vm0, %v4410_v31 }
 0x23d   :  { %4053 = vst.msk [vmem:[%s7989_s2 + $0x3e8] sm:$0xff] %vm3927_vm10, %v5168_v32  ;;  %v946_v33 = vpop.permute.xlu1 %945  ;;  %5314 = vmatmul.mubr.msk.f32.gmra.mxu1 %vm1813_vm0, %v4411_v30  ;;  %v943_v34 = vpop.permute.xlu0 %942 }
 0x23e   :  { %vm1262_vm9 = vcmp.eq.s32.totalorder %v5611_v8, %v946_v33  ;;  %vm1261_vm11 = vcmp.eq.s32.totalorder %v5611_v8, %v943_v34  ;;  %v3268_v35 = vpop.f32.mrf.mxu0 }
 0x23f   :  { %v4413_v36 = vsel %vm1262_vm9, 1.0, %v5385_v13  ;;  %v4412_v37 = vsel %vm1261_vm11, 1.0, %v5385_v13  ;;  %4052 = vst.msk [vmem:[%s7989_s2 + $0x3e0] sm:$0xff] %vm3927_vm10, %v3268_v35 }
 0x240   :  { %v5171_v38 = vpop.f32.mrf.mxu0  ;;  %5316 = vmatprep.mubr.msk.f32.mxu1 %vm1813_vm0, %v4412_v37 }
 0x241   :  { %4055 = vst.msk [vmem:[%s7989_s2 + $0x3f8] sm:$0xff] %vm3927_vm10, %v5171_v38  ;;  %v952_v39 = vpop.permute.xlu1 %951  ;;  %v5174_v40 = vpop.f32.mrf.mxu1  ;;  %5317 = vmatmul.mubr.msk.f32.gmra.mxu1 %vm1813_vm0, %v4413_v36 }
 0x242   :  { %vm1264_vm12 = vcmp.eq.s32.totalorder %v5611_v8, %v952_v39  ;;  %4057 = vst.msk [vmem:[%s7989_s2 + $0x408] sm:$0xff] %vm3927_vm10, %v5174_v40  ;;  %v949_v41 = vpop.permute.xlu0 %948  ;;  %v3278_v42 = vpop.f32.mrf.mxu0 }
 0x243   :  { %v4415_v43 = vsel %vm1264_vm12, 1.0, %v5385_v13  ;;  %vm1263_vm13 = vcmp.eq.s32.totalorder %v5611_v8, %v949_v41  ;;  %4054 = vst.msk [vmem:[%s7989_s2 + $0x3f0] sm:$0xff] %vm3927_vm10, %v3278_v42  ;;  %v3288_v44 = vpop.f32.mrf.mxu1 }
 0x244   :  { %v4414_v45 = vsel %vm1263_vm13, 1.0, %v5385_v13  ;;  %4056 = vst.msk [vmem:[%s7989_s2 + $0x400] sm:$0xff] %vm3927_vm10, %v3288_v44 }
 0x245   :  { %5319 = vmatprep.mubr.msk.f32.mxu1 %vm1813_vm0, %v4414_v45  ;;  %v958_v46 = vpop.permute.xlu1 %957  ;;  %v5177_v47 = vpop.f32.mrf.mxu1 }
 0x246   :  { %vm1266_vm14 = vcmp.eq.s32.totalorder %v5611_v8, %v958_v46  ;;  %4059 = vst.msk [vmem:[%s7989_s2 + $0x418] sm:$0xff] %vm3927_vm10, %v5177_v47  ;;  %5320 = vmatmul.mubr.msk.f32.gmra.mxu1 %vm1813_vm0, %v4415_v43  ;;  %v955_v48 = vpop.permute.xlu0 %954 }
 0x247   :  { %v4417_v49 = vsel %vm1266_vm14, 1.0, %v5385_v13  ;;  %vm1265_vm15 = vcmp.eq.s32.totalorder %v5611_v8, %v955_v48  ;;  %v3298_v50 = vpop.f32.mrf.mxu1 }
 0x248   :  { %v4416_v51 = vsel %vm1265_vm15, 1.0, %v5385_v13  ;;  %4058 = vst.msk [vmem:[%s7989_s2 + $0x410] sm:$0xff] %vm3927_vm10, %v3298_v50 }
 0x249   :  { %5322 = vmatprep.mubr.msk.f32.mxu1 %vm1813_vm0, %v4416_v51  ;;  %v964_v52 = vpop.permute.xlu1 %963  ;;  %v5180_v53 = vpop.f32.mrf.mxu1 }
 0x24a   :  { %vm1268_vm1 = vcmp.eq.s32.totalorder %v5611_v8, %v964_v52  ;;  %4061 = vst.msk [vmem:[%s7989_s2 + $0x428] sm:$0xff] %vm3927_vm10, %v5180_v53  ;;  %5323 = vmatmul.mubr.msk.f32.gmra.mxu1 %vm1813_vm0, %v4417_v49  ;;  %v961_v54 = vpop.permute.xlu0 %960 }
 0x24b   :  { %v4419_v55 = vsel %vm1268_vm1, 1.0, %v5385_v13  ;;  %vm1267_vm2 = vcmp.eq.s32.totalorder %v5611_v8, %v961_v54  ;;  %v3308_v56 = vpop.f32.mrf.mxu1 }
 0x24c   :  { %v4418_v57 = vsel %vm1267_vm2, 1.0, %v5385_v13  ;;  %4060 = vst.msk [vmem:[%s7989_s2 + $0x420] sm:$0xff] %vm3927_vm10, %v3308_v56 }
 0x24d   :  { %5325 = vmatprep.mubr.msk.f32.mxu1 %vm1813_vm0, %v4418_v57  ;;  %v970_v58 = vpop.permute.xlu1 %969  ;;  %v5183_v59 = vpop.f32.mrf.mxu1 }
 0x24e   :  { %vm1270_vm3 = vcmp.eq.s32.totalorder %v5611_v8, %v970_v58  ;;  %4063 = vst.msk [vmem:[%s7989_s2 + $0x438] sm:$0xff] %vm3927_vm10, %v5183_v59  ;;  %5326 = vmatmul.mubr.msk.f32.gmra.mxu1 %vm1813_vm0, %v4419_v55  ;;  %v967_v60 = vpop.permute.xlu0 %966 }
 0x24f   :  { %v4421_v61 = vsel %vm1270_vm3, 1.0, %v5385_v13  ;;  %vm1269_vm4 = vcmp.eq.s32.totalorder %v5611_v8, %v967_v60  ;;  %v3318_v62 = vpop.f32.mrf.mxu1 }
 0x250   :  { %v4420_v63 = vsel %vm1269_vm4, 1.0, %v5385_v13  ;;  %4062 = vst.msk [vmem:[%s7989_s2 + $0x430] sm:$0xff] %vm3927_vm10, %v3318_v62 }
 0x251   :  { %5328 = vmatprep.mubr.msk.f32.mxu1 %vm1813_vm0, %v4420_v63  ;;  %v976_v0 = vpop.permute.xlu1 %975  ;;  %v5186_v1 = vpop.f32.mrf.mxu1 }
 0x252   :  { %vm1272_vm5 = vcmp.eq.s32.totalorder %v5611_v8, %v976_v0  ;;  %4065 = vst.msk [vmem:[%s7989_s2 + $0x448] sm:$0xff] %vm3927_vm10, %v5186_v1  ;;  %5329 = vmatmul.mubr.msk.f32.gmra.mxu1 %vm1813_vm0, %v4421_v61  ;;  %v973_v2 = vpop.permute.xlu0 %972 }
 0x253   :  { %v4423_v3 = vsel %vm1272_vm5, 1.0, %v5385_v13  ;;  %vm1271_vm6 = vcmp.eq.s32.totalorder %v5611_v8, %v973_v2  ;;  %v3328_v4 = vpop.f32.mrf.mxu1 }
 0x254   :  { %v4422_v5 = vsel %vm1271_vm6, 1.0, %v5385_v13  ;;  %4064 = vst.msk [vmem:[%s7989_s2 + $0x440] sm:$0xff] %vm3927_vm10, %v3328_v4 }
 0x255   :  { %5331 = vmatprep.mubr.msk.f32.mxu1 %vm1813_vm0, %v4422_v5  ;;  %v982_v6 = vpop.permute.xlu1 %981  ;;  %v5189_v7 = vpop.f32.mrf.mxu1 }
 0x256   :  { %vm1274_vm7 = vcmp.eq.s32.totalorder %v5611_v8, %v982_v6  ;;  %4067 = vst.msk [vmem:[%s7989_s2 + $0x458] sm:$0xff] %vm3927_vm10, %v5189_v7  ;;  %5332 = vmatmul.mubr.msk.f32.gmra.mxu1 %vm1813_vm0, %v4423_v3  ;;  %v979_v9 = vpop.permute.xlu0 %978 }
 0x257   :  { %v4425_v10 = vsel %vm1274_vm7, 1.0, %v5385_v13  ;;  %vm1273_vm8 = vcmp.eq.s32.totalorder %v5611_v8, %v979_v9  ;;  %v3338_v11 = vpop.f32.mrf.mxu1 }
 0x258   :  { %v4424_v12 = vsel %vm1273_vm8, 1.0, %v5385_v13  ;;  %4066 = vst.msk [vmem:[%s7989_s2 + $0x450] sm:$0xff] %vm3927_vm10, %v3338_v11 }
 0x259   :  { %5334 = vmatprep.mubr.msk.f32.mxu1 %vm1813_vm0, %v4424_v12  ;;  %v988_v14 = vpop.permute.xlu1 %987  ;;  %v5192_v15 = vpop.f32.mrf.mxu1 }
 0x25a   :  { %vm1276_vm9 = vcmp.eq.s32.totalorder %v5611_v8, %v988_v14  ;;  %4069 = vst.msk [vmem:[%s7989_s2 + $0x468] sm:$0xff] %vm3927_vm10, %v5192_v15  ;;  %5335 = vmatmul.mubr.msk.f32.gmra.mxu1 %vm1813_vm0, %v4425_v10  ;;  %v985_v16 = vpop.permute.xlu0 %984 }
 0x25b   :  { %v4427_v17 = vsel %vm1276_vm9, 1.0, %v5385_v13  ;;  %vm1275_vm11 = vcmp.eq.s32.totalorder %v5611_v8, %v985_v16  ;;  %v3348_v18 = vpop.f32.mrf.mxu1 }
 0x25c   :  { %v4426_v19 = vsel %vm1275_vm11, 1.0, %v5385_v13  ;;  %4068 = vst.msk [vmem:[%s7989_s2 + $0x460] sm:$0xff] %vm3927_vm10, %v3348_v18 }
 0x25d   :  { %5337 = vmatprep.mubr.msk.f32.mxu1 %vm1813_vm0, %v4426_v19  ;;  %v994_v20 = vpop.permute.xlu1 %993  ;;  %v5195_v21 = vpop.f32.mrf.mxu1 }
 0x25e   :  { %vm1278_vm12 = vcmp.eq.s32.totalorder %v5611_v8, %v994_v20  ;;  %4071 = vst.msk [vmem:[%s7989_s2 + $0x478] sm:$0xff] %vm3927_vm10, %v5195_v21  ;;  %5338 = vmatmul.mubr.msk.f32.gmra.mxu1 %vm1813_vm0, %v4427_v17  ;;  %v991_v22 = vpop.permute.xlu0 %990 }
 0x25f   :  { %v4429_v23 = vsel %vm1278_vm12, 1.0, %v5385_v13  ;;  %vm1277_vm13 = vcmp.eq.s32.totalorder %v5611_v8, %v991_v22  ;;  %v3358_v24 = vpop.f32.mrf.mxu1 }
 0x260   :  { %v4428_v25 = vsel %vm1277_vm13, 1.0, %v5385_v13  ;;  %4070 = vst.msk [vmem:[%s7989_s2 + $0x470] sm:$0xff] %vm3927_vm10, %v3358_v24 }
 0x261   :  { %5340 = vmatprep.mubr.msk.f32.mxu1 %vm1813_vm0, %v4428_v25  ;;  %v1000_v26 = vpop.permute.xlu1 %999  ;;  %v5198_v27 = vpop.f32.mrf.mxu1 }
 0x262   :  { %vm1280_vm14 = vcmp.eq.s32.totalorder %v5611_v8, %v1000_v26  ;;  %4073 = vst.msk [vmem:[%s7989_s2 + $0x488] sm:$0xff] %vm3927_vm10, %v5198_v27  ;;  %5341 = vmatmul.mubr.msk.f32.gmra.mxu1 %vm1813_vm0, %v4429_v23  ;;  %v997_v28 = vpop.permute.xlu0 %996 }
 0x263   :  { %v4431_v29 = vsel %vm1280_vm14, 1.0, %v5385_v13  ;;  %vm1279_vm15 = vcmp.eq.s32.totalorder %v5611_v8, %v997_v28  ;;  %v3368_v30 = vpop.f32.mrf.mxu1 }
 0x264   :  { %v4430_v31 = vsel %vm1279_vm15, 1.0, %v5385_v13  ;;  %4072 = vst.msk [vmem:[%s7989_s2 + $0x480] sm:$0xff] %vm3927_vm10, %v3368_v30 }
 0x265   :  { %5343 = vmatprep.mubr.msk.f32.mxu1 %vm1813_vm0, %v4430_v31  ;;  %v1006_v32 = vpop.permute.xlu1 %1005  ;;  %v5201_v33 = vpop.f32.mrf.mxu1 }
 0x266   :  { %vm1282_vm1 = vcmp.eq.s32.totalorder %v5611_v8, %v1006_v32  ;;  %4075 = vst.msk [vmem:[%s7989_s2 + $0x498] sm:$0xff] %vm3927_vm10, %v5201_v33  ;;  %5344 = vmatmul.mubr.msk.f32.gmra.mxu1 %vm1813_vm0, %v4431_v29  ;;  %v1003_v34 = vpop.permute.xlu0 %1002 }
 0x267   :  { %v4433_v35 = vsel %vm1282_vm1, 1.0, %v5385_v13  ;;  %vm1281_vm2 = vcmp.eq.s32.totalorder %v5611_v8, %v1003_v34  ;;  %v3378_v36 = vpop.f32.mrf.mxu1 }
 0x268   :  { %v4432_v37 = vsel %vm1281_vm2, 1.0, %v5385_v13  ;;  %4074 = vst.msk [vmem:[%s7989_s2 + $0x490] sm:$0xff] %vm3927_vm10, %v3378_v36 }
 0x269   :  { %5346 = vmatprep.mubr.msk.f32.mxu1 %vm1813_vm0, %v4432_v37  ;;  %v1012_v38 = vpop.permute.xlu1 %1011  ;;  %v5204_v39 = vpop.f32.mrf.mxu1 }
 0x26a   :  { %vm1284_vm3 = vcmp.eq.s32.totalorder %v5611_v8, %v1012_v38  ;;  %4077 = vst.msk [vmem:[%s7989_s2 + $0x4a8] sm:$0xff] %vm3927_vm10, %v5204_v39  ;;  %5347 = vmatmul.mubr.msk.f32.gmra.mxu1 %vm1813_vm0, %v4433_v35  ;;  %v1009_v40 = vpop.permute.xlu0 %1008 }
 0x26b   :  { %v4435_v41 = vsel %vm1284_vm3, 1.0, %v5385_v13  ;;  %vm1283_vm4 = vcmp.eq.s32.totalorder %v5611_v8, %v1009_v40  ;;  %v3388_v42 = vpop.f32.mrf.mxu1 }
 0x26c   :  { %v4434_v43 = vsel %vm1283_vm4, 1.0, %v5385_v13  ;;  %4076 = vst.msk [vmem:[%s7989_s2 + $0x4a0] sm:$0xff] %vm3927_vm10, %v3388_v42 }
 0x26d   :  { %5349 = vmatprep.mubr.msk.f32.mxu1 %vm1813_vm0, %v4434_v43  ;;  %v1018_v44 = vpop.permute.xlu1 %1017  ;;  %v5207_v45 = vpop.f32.mrf.mxu1 }
 0x26e   :  { %vm1286_vm5 = vcmp.eq.s32.totalorder %v5611_v8, %v1018_v44  ;;  %4079 = vst.msk [vmem:[%s7989_s2 + $0x4b8] sm:$0xff] %vm3927_vm10, %v5207_v45  ;;  %5350 = vmatmul.mubr.msk.f32.gmra.mxu1 %vm1813_vm0, %v4435_v41  ;;  %v1015_v46 = vpop.permute.xlu0 %1014 }
 0x26f   :  { %v4437_v47 = vsel %vm1286_vm5, 1.0, %v5385_v13  ;;  %vm1285_vm6 = vcmp.eq.s32.totalorder %v5611_v8, %v1015_v46  ;;  %v3398_v48 = vpop.f32.mrf.mxu1 }
 0x270   :  { %v4436_v49 = vsel %vm1285_vm6, 1.0, %v5385_v13  ;;  %4078 = vst.msk [vmem:[%s7989_s2 + $0x4b0] sm:$0xff] %vm3927_vm10, %v3398_v48 }
 0x271   :  { %5352 = vmatprep.mubr.msk.f32.mxu1 %vm1813_vm0, %v4436_v49  ;;  %v1024_v50 = vpop.permute.xlu1 %1023  ;;  %v5210_v51 = vpop.f32.mrf.mxu1 }
 0x272   :  { %vm1288_vm7 = vcmp.eq.s32.totalorder %v5611_v8, %v1024_v50  ;;  %4081 = vst.msk [vmem:[%s7989_s2 + $0x4c8] sm:$0xff] %vm3927_vm10, %v5210_v51  ;;  %5353 = vmatmul.mubr.msk.f32.gmra.mxu1 %vm1813_vm0, %v4437_v47  ;;  %v1021_v52 = vpop.permute.xlu0 %1020 }
 0x273   :  { %v4439_v53 = vsel %vm1288_vm7, 1.0, %v5385_v13  ;;  %vm1287_vm8 = vcmp.eq.s32.totalorder %v5611_v8, %v1021_v52  ;;  %v3408_v54 = vpop.f32.mrf.mxu1 }
 0x274   :  { %v4438_v55 = vsel %vm1287_vm8, 1.0, %v5385_v13  ;;  %4080 = vst.msk [vmem:[%s7989_s2 + $0x4c0] sm:$0xff] %vm3927_vm10, %v3408_v54 }
 0x275   :  { %5355 = vmatprep.mubr.msk.f32.mxu1 %vm1813_vm0, %v4438_v55  ;;  %v1030_v56 = vpop.permute.xlu1 %1029  ;;  %v5213_v57 = vpop.f32.mrf.mxu1 }
 0x276   :  { %vm1290_vm9 = vcmp.eq.s32.totalorder %v5611_v8, %v1030_v56  ;;  %4083 = vst.msk [vmem:[%s7989_s2 + $0x4d8] sm:$0xff] %vm3927_vm10, %v5213_v57  ;;  %5356 = vmatmul.mubr.msk.f32.gmra.mxu1 %vm1813_vm0, %v4439_v53  ;;  %v1027_v58 = vpop.permute.xlu0 %1026 }
 0x277   :  { %v4441_v59 = vsel %vm1290_vm9, 1.0, %v5385_v13  ;;  %vm1289_vm11 = vcmp.eq.s32.totalorder %v5611_v8, %v1027_v58  ;;  %v3418_v60 = vpop.f32.mrf.mxu1 }
 0x278   :  { %v4440_v61 = vsel %vm1289_vm11, 1.0, %v5385_v13  ;;  %4082 = vst.msk [vmem:[%s7989_s2 + $0x4d0] sm:$0xff] %vm3927_vm10, %v3418_v60 }
 0x279   :  { %5358 = vmatprep.mubr.msk.f32.mxu1 %vm1813_vm0, %v4440_v61  ;;  %v1036_v62 = vpop.permute.xlu1 %1035  ;;  %v5216_v63 = vpop.f32.mrf.mxu1 }
 0x27a   :  { %vm1292_vm12 = vcmp.eq.s32.totalorder %v5611_v8, %v1036_v62  ;;  %4085 = vst.msk [vmem:[%s7989_s2 + $0x4e8] sm:$0xff] %vm3927_vm10, %v5216_v63  ;;  %5359 = vmatmul.mubr.msk.f32.gmra.mxu1 %vm1813_vm0, %v4441_v59  ;;  %v1033_v0 = vpop.permute.xlu0 %1032 }
 0x27b   :  { %v4443_v1 = vsel %vm1292_vm12, 1.0, %v5385_v13  ;;  %vm1291_vm13 = vcmp.eq.s32.totalorder %v5611_v8, %v1033_v0  ;;  %v3428_v2 = vpop.f32.mrf.mxu1 }
 0x27c   :  { %v4442_v3 = vsel %vm1291_vm13, 1.0, %v5385_v13  ;;  %4084 = vst.msk [vmem:[%s7989_s2 + $0x4e0] sm:$0xff] %vm3927_vm10, %v3428_v2 }
 0x27d   :  { %5361 = vmatprep.mubr.msk.f32.mxu1 %vm1813_vm0, %v4442_v3  ;;  %v5219_v4 = vpop.f32.mrf.mxu1 }
 0x27e   :  { %4087 = vst.msk [vmem:[%s7989_s2 + $0x4f8] sm:$0xff] %vm3927_vm10, %v5219_v4  ;;  %5362 = vmatmul.mubr.msk.f32.gmra.mxu1 %vm1813_vm0, %v4443_v1 }
 0x27f   :  { %v3438_v5 = vpop.f32.mrf.mxu1 }
 0x280   :  { %4086 = vst.msk [vmem:[%s7989_s2 + $0x4f0] sm:$0xff] %vm3927_vm10, %v3438_v5 }
 0x281   :  { %v5222_v8 = vpop.f32.mrf.mxu1 }
 0x282   :  { %4089 = vst.msk [vmem:[%s7989_s2 + $0x508] sm:$0xff] %vm3927_vm10, %v5222_v8 }
 0x283   :  { %v3448_v13 = vpop.f32.mrf.mxu1 }
 0x284   :  { %4088 = vst.msk [vmem:[%s7989_s2 + $0x500] sm:$0xff] %vm3927_vm10, %v3448_v13 }
 0x285   :  { %v5225_v6 = vpop.f32.mrf.mxu1 }
 0x286   :  { %4091 = vst.msk [vmem:[%s7989_s2 + $0x518] sm:$0xff] %vm3927_vm10, %v5225_v6 }
 0x287   :  { %v3458_v7 = vpop.f32.mrf.mxu1 }
 0x288   :  { %4090 = vst.msk [vmem:[%s7989_s2 + $0x510] sm:$0xff] %vm3927_vm10, %v3458_v7 }
 0x289   :  { %v5228_v9 = vpop.f32.mrf.mxu1 }
 0x28a   :  { %4093 = vst.msk [vmem:[%s7989_s2 + $0x528] sm:$0xff] %vm3927_vm10, %v5228_v9 }
 0x28b   :  { %v3468_v10 = vpop.f32.mrf.mxu1 }
 0x28c   :  { %4092 = vst.msk [vmem:[%s7989_s2 + $0x520] sm:$0xff] %vm3927_vm10, %v3468_v10 }
 0x28d   :  { %v5231_v11 = vpop.f32.mrf.mxu1 }
 0x28e   :  { %4095 = vst.msk [vmem:[%s7989_s2 + $0x538] sm:$0xff] %vm3927_vm10, %v5231_v11 }
 0x28f   :  { %v3478_v12 = vpop.f32.mrf.mxu1 }
 0x290   :  { %4094 = vst.msk [vmem:[%s7989_s2 + $0x530] sm:$0xff] %vm3927_vm10, %v3478_v12 }
 0x291   :  { %v5234_v14 = vpop.f32.mrf.mxu1 }
 0x292   :  { %4097 = vst.msk [vmem:[%s7989_s2 + $0x548] sm:$0xff] %vm3927_vm10, %v5234_v14 }
 0x293   :  { %v3488_v15 = vpop.f32.mrf.mxu1 }
 0x294   :  { %4096 = vst.msk [vmem:[%s7989_s2 + $0x540] sm:$0xff] %vm3927_vm10, %v3488_v15 }
 0x295   :  { %v5237_v16 = vpop.f32.mrf.mxu1 }
 0x296   :  { %4099 = vst.msk [vmem:[%s7989_s2 + $0x558] sm:$0xff] %vm3927_vm10, %v5237_v16 }
 0x297   :  { %v3498_v17 = vpop.f32.mrf.mxu1 }
 0x298   :  { %4098 = vst.msk [vmem:[%s7989_s2 + $0x550] sm:$0xff] %vm3927_vm10, %v3498_v17 }
 0x299   :  { %v5240_v18 = vpop.f32.mrf.mxu1 }
 0x29a   :  { %4101 = vst.msk [vmem:[%s7989_s2 + $0x568] sm:$0xff] %vm3927_vm10, %v5240_v18 }
 0x29b   :  { %v3508_v19 = vpop.f32.mrf.mxu1 }
 0x29c   :  { %4100 = vst.msk [vmem:[%s7989_s2 + $0x560] sm:$0xff] %vm3927_vm10, %v3508_v19 }
 0x29d   :  { %v5243_v20 = vpop.f32.mrf.mxu1 }
 0x29e   :  { %4103 = vst.msk [vmem:[%s7989_s2 + $0x578] sm:$0xff] %vm3927_vm10, %v5243_v20 }
 0x29f   :  { %v3518_v21 = vpop.f32.mrf.mxu1 }
 0x2a0   :  { %4102 = vst.msk [vmem:[%s7989_s2 + $0x570] sm:$0xff] %vm3927_vm10, %v3518_v21 }
 0x2a1   :  { %v5246_v22 = vpop.f32.mrf.mxu1 }
 0x2a2   :  { %4105 = vst.msk [vmem:[%s7989_s2 + $0x588] sm:$0xff] %vm3927_vm10, %v5246_v22 }
 0x2a3   :  { %v3528_v23 = vpop.f32.mrf.mxu1 }
 0x2a4   :  { %4104 = vst.msk [vmem:[%s7989_s2 + $0x580] sm:$0xff] %vm3927_vm10, %v3528_v23 }
 0x2a5   :  { %v5249_v24 = vpop.f32.mrf.mxu1 }
 0x2a6   :  { %4107 = vst.msk [vmem:[%s7989_s2 + $0x598] sm:$0xff] %vm3927_vm10, %v5249_v24 }
 0x2a7   :  { %v3538_v25 = vpop.f32.mrf.mxu1 }
 0x2a8   :  { %4106 = vst.msk [vmem:[%s7989_s2 + $0x590] sm:$0xff] %vm3927_vm10, %v3538_v25 }
 0x2a9   :  { %v5252_v26 = vpop.f32.mrf.mxu1 }
 0x2aa   :  { %4109 = vst.msk [vmem:[%s7989_s2 + $0x5a8] sm:$0xff] %vm3927_vm10, %v5252_v26 }
 0x2ab   :  { %v3548_v27 = vpop.f32.mrf.mxu1 }
 0x2ac   :  { %4108 = vst.msk [vmem:[%s7989_s2 + $0x5a0] sm:$0xff] %vm3927_vm10, %v3548_v27 }
 0x2ad   :  { %v5255_v28 = vpop.f32.mrf.mxu1 }
 0x2ae   :  { %4111 = vst.msk [vmem:[%s7989_s2 + $0x5b8] sm:$0xff] %vm3927_vm10, %v5255_v28 }
 0x2af   :  { %v3558_v29 = vpop.f32.mrf.mxu1 }
 0x2b0   :  { %4110 = vst.msk [vmem:[%s7989_s2 + $0x5b0] sm:$0xff] %vm3927_vm10, %v3558_v29 }
 0x2b1   :  { %v5258_v30 = vpop.f32.mrf.mxu1 }
 0x2b2   :  { %4113 = vst.msk [vmem:[%s7989_s2 + $0x5c8] sm:$0xff] %vm3927_vm10, %v5258_v30 }
 0x2b3   :  { %v3568_v31 = vpop.f32.mrf.mxu1 }
 0x2b4   :  { %4112 = vst.msk [vmem:[%s7989_s2 + $0x5c0] sm:$0xff] %vm3927_vm10, %v3568_v31 }
 0x2b5   :  { %v5261_v32 = vpop.f32.mrf.mxu1 }
 0x2b6   :  { %4115 = vst.msk [vmem:[%s7989_s2 + $0x5d8] sm:$0xff] %vm3927_vm10, %v5261_v32 }
 0x2b7   :  { %v3578_v33 = vpop.f32.mrf.mxu1 }
 0x2b8   :  { %4114 = vst.msk [vmem:[%s7989_s2 + $0x5d0] sm:$0xff] %vm3927_vm10, %v3578_v33 }
 0x2b9   :  { %v5264_v34 = vpop.f32.mrf.mxu1 }
 0x2ba   :  { %4117 = vst.msk [vmem:[%s7989_s2 + $0x5e8] sm:$0xff] %vm3927_vm10, %v5264_v34 }
 0x2bb   :  { %v3588_v35 = vpop.f32.mrf.mxu1 }
 0x2bc   :  { %4116 = vst.msk [vmem:[%s7989_s2 + $0x5e0] sm:$0xff] %vm3927_vm10, %v3588_v35 }
 0x2bd   :  { %v5267_v36 = vpop.f32.mrf.mxu1 }
 0x2be   :  { %4119 = vst.msk [vmem:[%s7989_s2 + $0x5f8] sm:$0xff] %vm3927_vm10, %v5267_v36 }
 0x2bf   :  { %v3598_v37 = vpop.f32.mrf.mxu1 }
 0x2c0   :  { %4118 = vst.msk [vmem:[%s7989_s2 + $0x5f0] sm:$0xff] %vm3927_vm10, %v3598_v37 }
 0x2c1   :  { %v5270_v38 = vpop.f32.mrf.mxu1 }
 0x2c2   :  { %4121 = vst.msk [vmem:[%s7989_s2 + $0x608] sm:$0xff] %vm3927_vm10, %v5270_v38 }
 0x2c3   :  { %v3608_v39 = vpop.f32.mrf.mxu1 }
 0x2c4   :  { %4120 = vst.msk [vmem:[%s7989_s2 + $0x600] sm:$0xff] %vm3927_vm10, %v3608_v39 }
 0x2c5   :  { %v5273_v40 = vpop.f32.mrf.mxu1 }
 0x2c6   :  { %4123 = vst.msk [vmem:[%s7989_s2 + $0x618] sm:$0xff] %vm3927_vm10, %v5273_v40 }
 0x2c7   :  { %v3618_v41 = vpop.f32.mrf.mxu1 }
 0x2c8   :  { %4122 = vst.msk [vmem:[%s7989_s2 + $0x610] sm:$0xff] %vm3927_vm10, %v3618_v41 }
 0x2c9   :  { %v5276_v42 = vpop.f32.mrf.mxu1 }
 0x2ca   :  { %4125 = vst.msk [vmem:[%s7989_s2 + $0x628] sm:$0xff] %vm3927_vm10, %v5276_v42 }
 0x2cb   :  { %v3628_v43 = vpop.f32.mrf.mxu1 }
 0x2cc   :  { %4124 = vst.msk [vmem:[%s7989_s2 + $0x620] sm:$0xff] %vm3927_vm10, %v3628_v43 }
 0x2cd   :  { %v5279_v44 = vpop.f32.mrf.mxu1 }
 0x2ce   :  { %4127 = vst.msk [vmem:[%s7989_s2 + $0x638] sm:$0xff] %vm3927_vm10, %v5279_v44 }
 0x2cf   :  { %v3638_v45 = vpop.f32.mrf.mxu1 }
 0x2d0   :  { %4126 = vst.msk [vmem:[%s7989_s2 + $0x630] sm:$0xff] %vm3927_vm10, %v3638_v45 }
 0x2d1   :  { %v5282_v46 = vpop.f32.mrf.mxu1 }
 0x2d2   :  { %4129 = vst.msk [vmem:[%s7989_s2 + $0x648] sm:$0xff] %vm3927_vm10, %v5282_v46 }
 0x2d3   :  { %v3648_v47 = vpop.f32.mrf.mxu1 }
 0x2d4   :  { %4128 = vst.msk [vmem:[%s7989_s2 + $0x640] sm:$0xff] %vm3927_vm10, %v3648_v47 }
 0x2d5   :  { %v5285_v48 = vpop.f32.mrf.mxu1 }
 0x2d6   :  { %4131 = vst.msk [vmem:[%s7989_s2 + $0x658] sm:$0xff] %vm3927_vm10, %v5285_v48 }
 0x2d7   :  { %v3658_v49 = vpop.f32.mrf.mxu1 }
 0x2d8   :  { %4130 = vst.msk [vmem:[%s7989_s2 + $0x650] sm:$0xff] %vm3927_vm10, %v3658_v49 }
 0x2d9   :  { %v5288_v50 = vpop.f32.mrf.mxu1 }
 0x2da   :  { %4133 = vst.msk [vmem:[%s7989_s2 + $0x668] sm:$0xff] %vm3927_vm10, %v5288_v50 }
 0x2db   :  { %v3668_v51 = vpop.f32.mrf.mxu1 }
 0x2dc   :  { %4132 = vst.msk [vmem:[%s7989_s2 + $0x660] sm:$0xff] %vm3927_vm10, %v3668_v51 }
 0x2dd   :  { %v5291_v52 = vpop.f32.mrf.mxu1 }
 0x2de   :  { %4135 = vst.msk [vmem:[%s7989_s2 + $0x678] sm:$0xff] %vm3927_vm10, %v5291_v52 }
 0x2df   :  { %v3678_v53 = vpop.f32.mrf.mxu1 }
 0x2e0   :  { %4134 = vst.msk [vmem:[%s7989_s2 + $0x670] sm:$0xff] %vm3927_vm10, %v3678_v53 }
 0x2e1   :  { %v5294_v54 = vpop.f32.mrf.mxu1 }
 0x2e2   :  { %4137 = vst.msk [vmem:[%s7989_s2 + $0x688] sm:$0xff] %vm3927_vm10, %v5294_v54 }
 0x2e3   :  { %v3688_v55 = vpop.f32.mrf.mxu1 }
 0x2e4   :  { %4136 = vst.msk [vmem:[%s7989_s2 + $0x680] sm:$0xff] %vm3927_vm10, %v3688_v55 }
 0x2e5   :  { %v5297_v56 = vpop.f32.mrf.mxu1 }
 0x2e6   :  { %4139 = vst.msk [vmem:[%s7989_s2 + $0x698] sm:$0xff] %vm3927_vm10, %v5297_v56 }
 0x2e7   :  { %v3698_v57 = vpop.f32.mrf.mxu1 }
 0x2e8   :  { %4138 = vst.msk [vmem:[%s7989_s2 + $0x690] sm:$0xff] %vm3927_vm10, %v3698_v57 }
 0x2e9   :  { %v5300_v58 = vpop.f32.mrf.mxu1 }
 0x2ea   :  { %4141 = vst.msk [vmem:[%s7989_s2 + $0x6a8] sm:$0xff] %vm3927_vm10, %v5300_v58 }
 0x2eb   :  { %v3708_v59 = vpop.f32.mrf.mxu1 }
 0x2ec   :  { %4140 = vst.msk [vmem:[%s7989_s2 + $0x6a0] sm:$0xff] %vm3927_vm10, %v3708_v59 }
 0x2ed   :  { %v5303_v60 = vpop.f32.mrf.mxu1 }
 0x2ee   :  { %4143 = vst.msk [vmem:[%s7989_s2 + $0x6b8] sm:$0xff] %vm3927_vm10, %v5303_v60 }
 0x2ef   :  { %v3718_v61 = vpop.f32.mrf.mxu1 }
 0x2f0   :  { %4142 = vst.msk [vmem:[%s7989_s2 + $0x6b0] sm:$0xff] %vm3927_vm10, %v3718_v61 }
 0x2f1   :  { %v5306_v62 = vpop.f32.mrf.mxu1 }
 0x2f2   :  { %4145 = vst.msk [vmem:[%s7989_s2 + $0x6c8] sm:$0xff] %vm3927_vm10, %v5306_v62 }
 0x2f3   :  { %v3728_v63 = vpop.f32.mrf.mxu1 }
 0x2f4   :  { %4144 = vst.msk [vmem:[%s7989_s2 + $0x6c0] sm:$0xff] %vm3927_vm10, %v3728_v63 }
 0x2f5   :  { %v5309_v0 = vpop.f32.mrf.mxu1 }
 0x2f6   :  { %4147 = vst.msk [vmem:[%s7989_s2 + $0x6d8] sm:$0xff] %vm3927_vm10, %v5309_v0 }
 0x2f7   :  { %v3738_v1 = vpop.f32.mrf.mxu1 }
 0x2f8   :  { %4146 = vst.msk [vmem:[%s7989_s2 + $0x6d0] sm:$0xff] %vm3927_vm10, %v3738_v1 }
 0x2f9   :  { %v5312_v2 = vpop.f32.mrf.mxu1 }
 0x2fa   :  { %4149 = vst.msk [vmem:[%s7989_s2 + $0x6e8] sm:$0xff] %vm3927_vm10, %v5312_v2 }
 0x2fb   :  { %v3748_v3 = vpop.f32.mrf.mxu1 }
 0x2fc   :  { %4148 = vst.msk [vmem:[%s7989_s2 + $0x6e0] sm:$0xff] %vm3927_vm10, %v3748_v3 }
 0x2fd   :  { %v5315_v4 = vpop.f32.mrf.mxu1 }
 0x2fe   :  { %4151 = vst.msk [vmem:[%s7989_s2 + $0x6f8] sm:$0xff] %vm3927_vm10, %v5315_v4 }
 0x2ff   :  { %v3758_v5 = vpop.f32.mrf.mxu1 }
 0x300   :  { %4150 = vst.msk [vmem:[%s7989_s2 + $0x6f0] sm:$0xff] %vm3927_vm10, %v3758_v5 }
 0x301   :  { %v5318_v8 = vpop.f32.mrf.mxu1 }
 0x302   :  { %4153 = vst.msk [vmem:[%s7989_s2 + $0x708] sm:$0xff] %vm3927_vm10, %v5318_v8 }
 0x303   :  { %v3768_v13 = vpop.f32.mrf.mxu1 }
 0x304   :  { %4152 = vst.msk [vmem:[%s7989_s2 + $0x700] sm:$0xff] %vm3927_vm10, %v3768_v13 }
 0x306   :  { %v5321_v6 = vpop.f32.mrf.mxu1 }
 0x307   :  { %4155 = vst.msk [vmem:[%s7989_s2 + $0x718] sm:$0xff] %vm3927_vm10, %v5321_v6 }
 0x308   :  { %v3778_v7 = vpop.f32.mrf.mxu1 }
 0x309   :  { %4154 = vst.msk [vmem:[%s7989_s2 + $0x710] sm:$0xff] %vm3927_vm10, %v3778_v7 }
 0x30a   :  { %v5324_v9 = vpop.f32.mrf.mxu1 }
 0x30b   :  { %4157 = vst.msk [vmem:[%s7989_s2 + $0x728] sm:$0xff] %vm3927_vm10, %v5324_v9 }
 0x30c   :  { %v3788_v10 = vpop.f32.mrf.mxu1 }
 0x30d   :  { %4156 = vst.msk [vmem:[%s7989_s2 + $0x720] sm:$0xff] %vm3927_vm10, %v3788_v10 }
 0x30e   :  { %v5327_v11 = vpop.f32.mrf.mxu1 }
 0x30f   :  { %4159 = vst.msk [vmem:[%s7989_s2 + $0x738] sm:$0xff] %vm3927_vm10, %v5327_v11 }
 0x310   :  { %v3798_v12 = vpop.f32.mrf.mxu1 }
 0x311   :  { %4158 = vst.msk [vmem:[%s7989_s2 + $0x730] sm:$0xff] %vm3927_vm10, %v3798_v12 }
 0x312   :  { %v5330_v14 = vpop.f32.mrf.mxu1 }
 0x313   :  { %4161 = vst.msk [vmem:[%s7989_s2 + $0x748] sm:$0xff] %vm3927_vm10, %v5330_v14 }
 0x314   :  { %v3808_v15 = vpop.f32.mrf.mxu1 }
 0x315   :  { %4160 = vst.msk [vmem:[%s7989_s2 + $0x740] sm:$0xff] %vm3927_vm10, %v3808_v15 }
 0x316   :  { %v5333_v16 = vpop.f32.mrf.mxu1 }
 0x317   :  { %4163 = vst.msk [vmem:[%s7989_s2 + $0x758] sm:$0xff] %vm3927_vm10, %v5333_v16 }
 0x318   :  { %v3818_v17 = vpop.f32.mrf.mxu1 }
 0x319   :  { %4162 = vst.msk [vmem:[%s7989_s2 + $0x750] sm:$0xff] %vm3927_vm10, %v3818_v17 }
 0x31a   :  { %v5336_v18 = vpop.f32.mrf.mxu1 }
 0x31b   :  { %4165 = vst.msk [vmem:[%s7989_s2 + $0x768] sm:$0xff] %vm3927_vm10, %v5336_v18 }
 0x31c   :  { %v3828_v19 = vpop.f32.mrf.mxu1 }
 0x31d   :  { %4164 = vst.msk [vmem:[%s7989_s2 + $0x760] sm:$0xff] %vm3927_vm10, %v3828_v19 }
 0x31e   :  { %v5339_v20 = vpop.f32.mrf.mxu1 }
 0x31f   :  { %4167 = vst.msk [vmem:[%s7989_s2 + $0x778] sm:$0xff] %vm3927_vm10, %v5339_v20 }
 0x320   :  { %v3838_v21 = vpop.f32.mrf.mxu1 }
 0x321   :  { %4166 = vst.msk [vmem:[%s7989_s2 + $0x770] sm:$0xff] %vm3927_vm10, %v3838_v21 }
 0x322   :  { %v5342_v22 = vpop.f32.mrf.mxu1 }
 0x323   :  { %4169 = vst.msk [vmem:[%s7989_s2 + $0x788] sm:$0xff] %vm3927_vm10, %v5342_v22 }
 0x324   :  { %v3848_v23 = vpop.f32.mrf.mxu1 }
 0x325   :  { %4168 = vst.msk [vmem:[%s7989_s2 + $0x780] sm:$0xff] %vm3927_vm10, %v3848_v23 }
 0x326   :  { %v5345_v24 = vpop.f32.mrf.mxu1 }
 0x327   :  { %4171 = vst.msk [vmem:[%s7989_s2 + $0x798] sm:$0xff] %vm3927_vm10, %v5345_v24 }
 0x328   :  { %v3858_v25 = vpop.f32.mrf.mxu1 }
 0x329   :  { %4170 = vst.msk [vmem:[%s7989_s2 + $0x790] sm:$0xff] %vm3927_vm10, %v3858_v25 }
 0x32a   :  { %v5348_v26 = vpop.f32.mrf.mxu1 }
 0x32b   :  { %4173 = vst.msk [vmem:[%s7989_s2 + $0x7a8] sm:$0xff] %vm3927_vm10, %v5348_v26 }
 0x32c   :  { %v3868_v27 = vpop.f32.mrf.mxu1 }
 0x32d   :  { %4172 = vst.msk [vmem:[%s7989_s2 + $0x7a0] sm:$0xff] %vm3927_vm10, %v3868_v27 }
 0x32e   :  { %v5351_v28 = vpop.f32.mrf.mxu1 }
 0x32f   :  { %4175 = vst.msk [vmem:[%s7989_s2 + $0x7b8] sm:$0xff] %vm3927_vm10, %v5351_v28 }
 0x330   :  { %v3878_v29 = vpop.f32.mrf.mxu1 }
 0x331   :  { %4174 = vst.msk [vmem:[%s7989_s2 + $0x7b0] sm:$0xff] %vm3927_vm10, %v3878_v29 }
 0x332   :  { %v5354_v30 = vpop.f32.mrf.mxu1 }
 0x333   :  { %4177 = vst.msk [vmem:[%s7989_s2 + $0x7c8] sm:$0xff] %vm3927_vm10, %v5354_v30 }
 0x334   :  { %v3888_v31 = vpop.f32.mrf.mxu1 }
 0x335   :  { %4176 = vst.msk [vmem:[%s7989_s2 + $0x7c0] sm:$0xff] %vm3927_vm10, %v3888_v31 }
 0x336   :  { %v5357_v32 = vpop.f32.mrf.mxu1 }
 0x337   :  { %4179 = vst.msk [vmem:[%s7989_s2 + $0x7d8] sm:$0xff] %vm3927_vm10, %v5357_v32 }
 0x338   :  { %v3898_v33 = vpop.f32.mrf.mxu1 }
 0x339   :  { %4178 = vst.msk [vmem:[%s7989_s2 + $0x7d0] sm:$0xff] %vm3927_vm10, %v3898_v33 }
 0x33a   :  { %v5360_v34 = vpop.f32.mrf.mxu1 }
 0x33b   :  { %4181 = vst.msk [vmem:[%s7989_s2 + $0x7e8] sm:$0xff] %vm3927_vm10, %v5360_v34 }
 0x33c   :  { %v3908_v35 = vpop.f32.mrf.mxu1 }
 0x33d   :  { %4180 = vst.msk [vmem:[%s7989_s2 + $0x7e0] sm:$0xff] %vm3927_vm10, %v3908_v35 }
 0x33e   :  { %v5363_v36 = vpop.f32.mrf.mxu1 }
 0x33f   :  { %4183 = vst.msk [vmem:[%s7989_s2 + $0x7f8] sm:$0xff] %vm3927_vm10, %v5363_v36 }
 0x340   :  { %v3918_v37 = vpop.f32.mrf.mxu1 }
 0x341   :  { %4182 = vst.msk [vmem:[%s7989_s2 + $0x7f0] sm:$0xff] %vm3927_vm10, %v3918_v37 }

</bundles_post_ra>
